<compile_context>
chip_gen: v5e
topology: v5e:2x2
jax: 0.10.0
libtpu: 0.0.40
codegen_flags: <defaults>
</compile_context>

<pallas_src>
import numpy as np
import jax
import jax.numpy as jnp
from jax.experimental import pallas as pl
from jax.experimental.pallas import tpu as pltpu


def _asap_kernel(x_ref, are_ref, aim_ref, bre_ref, bim_ref, bsum_ref, win_ref,
                 gre_ref, gim_ref, gsum_ref, hre_ref, him_ref, o_ref):
    dot = lambda a, b: jnp.dot(a, b, precision=jax.lax.Precision.HIGHEST,
                               preferred_element_type=jnp.float32)
    x = x_ref[0]                                  # (H, TB*W) real, TB images lane-stacked
    # U = A_c @ X   (fftshift + crop + ifftshift folded into A_c; X is real)
    u_re = dot(are_ref[...], x)
    u_im = dot(aim_ref[...], x)
    # T = U @ blockdiag(B_c)   -- Gauss 3-multiplication complex product
    p1 = dot(u_re, bre_ref[...])
    p2 = dot(u_im, bim_ref[...])
    p3 = dot(u_re + u_im, bsum_ref[...])
    w = win_ref[...]                              # cropped window * 1/(H*W), lane-tiled
    t_re = (p1 - p2) * w
    t_im = (p3 - p1 - p2) * w
    # V = T @ blockdiag(GW^T)  -- Gauss again
    q1 = dot(t_re, gre_ref[...])
    q2 = dot(t_im, gim_ref[...])
    q3 = dot(t_re + t_im, gsum_ref[...])
    v_re = q1 - q2
    v_im = q3 - q1 - q2
    # OUT = Re(GH @ V)  -> one lane-dense (Hc, TB*Wc) store
    out = dot(hre_ref[...], v_re) - dot(him_ref[...], v_im)
    o_ref[0] = out.astype(o_ref.dtype)


def _make_operator_mats(H, W, TB):
    """Fold fft2(norm='forward') + fftshift + hamming window + center crop +
    ifftshift + ifft2(norm='forward') into dense real matrices.  Right-side
    operators are replicated block-diagonally for TB lane-stacked images."""
    nh = np.arange(H)
    FH = np.exp(-2j * np.pi * np.outer(nh, nh) / H)       # forward DFT (rows)
    nw = np.arange(W)
    FW = np.exp(-2j * np.pi * np.outer(nw, nw) / W)       # forward DFT (cols)
    A = np.roll(FH, H // 2, axis=0)                       # row-fftshifted forward DFT
    B = np.roll(FW, W // 2, axis=0).T                     # col-fftshifted forward DFT (transposed)

    w1 = np.abs(np.hamming(H))
    w2 = np.abs(np.hamming(W))
    win = np.sqrt(np.outer(w1, w2)) / (H * W)             # includes norm='forward' 1/(HW)

    r0, r1 = int(H / 4), int(H / 4 * 3)
    c0, c1 = int(W / 4), int(W / 4 * 3)
    Hc, Wc = r1 - r0, c1 - c0
    # crop + ifftshift selections folded into the operators (no zero blocks)
    idx_h = r0 + ((np.arange(Hc) + Hc // 2) % Hc)
    idx_w = c0 + ((np.arange(Wc) + Wc // 2) % Wc)

    A_c = A[idx_h, :]                                     # (Hc, H)
    B_c = B[:, idx_w]                                     # (W, Wc)
    win_c = win[np.ix_(idx_h, idx_w)]                     # (Hc, Wc)

    kh = np.arange(Hc)
    GH = np.exp(2j * np.pi * np.outer(kh, kh) / Hc)       # unnormalized inverse DFT (rows)
    kw = np.arange(Wc)
    GWt = np.exp(2j * np.pi * np.outer(kw, kw) / Wc)      # symmetric -> equals GW^T

    eye = np.eye(TB)
    BDB = np.kron(eye, B_c)                               # (TB*W, TB*Wc)
    BDG = np.kron(eye, GWt)                               # (TB*Wc, TB*Wc)
    winw = np.tile(win_c, (1, TB))                        # (Hc, TB*Wc)

    f32 = lambda a: jnp.asarray(np.ascontiguousarray(a), dtype=jnp.float32)
    return (f32(A_c.real), f32(A_c.imag),
            f32(BDB.real), f32(BDB.imag), f32(BDB.real + BDB.imag),
            f32(winw),
            f32(BDG.real), f32(BDG.imag), f32(BDG.real + BDG.imag),
            f32(GH.real), f32(GH.imag))


def asap_pallas(x, transpose=True):
    if transpose:
        x = jnp.swapaxes(x, 2, 3)
    N, C, H, W = x.shape
    assert H % 4 == 0 and W % 4 == 0, "ASAP crop assumes H and W divisible by 4"
    Hc, Wc = H // 2, W // 2

    # Batch tile: stack TB images along lanes so the output slab is a dense
    # multiple of 128 lanes (TB*Wc % 128 == 0) whenever Wc is not already one.
    if Wc % 128 == 0:
        TB = 1
    else:
        TB = int(np.lcm(Wc, 128) // Wc)

    Bt = N * C
    G = -(-Bt // TB)                                      # ceil
    Bt_pad = G * TB

    mats = _make_operator_mats(H, W, TB)

    xf = x.reshape(Bt, H, W).astype(jnp.float32)
    if Bt_pad != Bt:
        xf = jnp.concatenate(
            [xf, jnp.zeros((Bt_pad - Bt, H, W), jnp.float32)], axis=0)
    # Lane-stack TB images per grid step: (G, H, TB*W).  Layout plumbing stays in
    # the wrapper (fused by XLA), not inside the kernel.
    xw = xf.reshape(G, TB, H, W).transpose(0, 2, 1, 3).reshape(G, H, TB * W)

    const_spec = lambda m: pl.BlockSpec(tuple(m.shape), lambda g: (0, 0))
    out = pl.pallas_call(
        _asap_kernel,
        out_shape=jax.ShapeDtypeStruct((G, Hc, TB * Wc), jnp.float32),
        grid=(G,),
        in_specs=[pl.BlockSpec((1, H, TB * W), lambda g: (g, 0, 0))]
                 + [const_spec(m) for m in mats],
        out_specs=pl.BlockSpec((1, Hc, TB * Wc), lambda g: (g, 0, 0)),
        compiler_params=pltpu.CompilerParams(dimension_semantics=("parallel",)),
    )(xw, *mats)

    # Un-stack the lane-dense output slab back to (N, C, Hc, Wc) in the wrapper.
    out = out.reshape(G, Hc, TB, Wc).transpose(0, 2, 1, 3).reshape(Bt_pad, Hc, Wc)
    return out[:Bt].reshape(N, C, Hc, Wc)


def asap_reference(x, transpose=True):
    """Pure-JAX mirror of the PyTorch forward (for verification)."""
    if transpose:
        x = jnp.swapaxes(x, 2, 3)
    H, W = x.shape[2], x.shape[3]
    w1 = np.abs(np.hamming(H))
    w2 = np.abs(np.hamming(W))
    w2d = jnp.asarray(np.sqrt(np.outer(w1, w2)), dtype=jnp.float32)
    low = jnp.fft.fftshift(jnp.fft.fft2(x, norm="forward"))   # shifts ALL dims (torch default)
    low = low * w2d[None, None]
    low = low[:, :, int(H / 4):int(H / 4 * 3), int(W / 4):int(W / 4 * 3)]
    return jnp.fft.ifft2(jnp.fft.ifftshift(low), norm="forward").real


if __name__ == "__main__":
    key = jax.random.PRNGKey(0)
    x = jax.random.normal(key, (2, 4, 16, 16), dtype=jnp.float32)

    out = asap_pallas(x, transpose=True)
    out = jax.block_until_ready(out)

    ref = jax.block_until_ready(asap_reference(x, transpose=True))
    assert out.shape == ref.shape == (2, 4, 8, 8), (out.shape, ref.shape)
    np.testing.assert_allclose(np.asarray(out), np.asarray(ref), rtol=1e-3, atol=5e-4)

    print("KERNEL_OK")
</pallas_src>

<mosaic_0001>
module attributes {stable_mosaic.version = 11 : i64} {
  func.func @_asap_kernel(%arg0: i32, %arg1: memref<1x16x256xf32, #tpu.memory_space<vmem>>, %arg2: memref<8x16xf32, #tpu.memory_space<vmem>>, %arg3: memref<8x16xf32, #tpu.memory_space<vmem>>, %arg4: memref<256x128xf32, #tpu.memory_space<vmem>>, %arg5: memref<256x128xf32, #tpu.memory_space<vmem>>, %arg6: memref<256x128xf32, #tpu.memory_space<vmem>>, %arg7: memref<8x128xf32, #tpu.memory_space<vmem>>, %arg8: memref<128x128xf32, #tpu.memory_space<vmem>>, %arg9: memref<128x128xf32, #tpu.memory_space<vmem>>, %arg10: memref<128x128xf32, #tpu.memory_space<vmem>>, %arg11: memref<8x8xf32, #tpu.memory_space<vmem>>, %arg12: memref<8x8xf32, #tpu.memory_space<vmem>>, %arg13: memref<1x8x128xf32, #tpu.memory_space<vmem>>) attributes {dimension_semantics = [#tpu.dimension_semantics<parallel>], iteration_bounds = array<i64: 1>, scalar_prefetch = 0 : i64, scratch_operands = 0 : i64, tpu.core_type = #tpu.core_type<tc>, window_params = [{transform_indices = @transform_0, window_bounds = array<i64: 1, 16, 256>}, {pipeline_mode = #tpu.pipeline_mode<synchronous>, transform_indices = @transform_1, window_bounds = array<i64: 8, 16>}, {pipeline_mode = #tpu.pipeline_mode<synchronous>, transform_indices = @transform_2, window_bounds = array<i64: 8, 16>}, {pipeline_mode = #tpu.pipeline_mode<synchronous>, transform_indices = @transform_3, window_bounds = array<i64: 256, 128>}, {pipeline_mode = #tpu.pipeline_mode<synchronous>, transform_indices = @transform_4, window_bounds = array<i64: 256, 128>}, {pipeline_mode = #tpu.pipeline_mode<synchronous>, transform_indices = @transform_5, window_bounds = array<i64: 256, 128>}, {pipeline_mode = #tpu.pipeline_mode<synchronous>, transform_indices = @transform_6, window_bounds = array<i64: 8, 128>}, {pipeline_mode = #tpu.pipeline_mode<synchronous>, transform_indices = @transform_7, window_bounds = array<i64: 128, 128>}, {pipeline_mode = #tpu.pipeline_mode<synchronous>, transform_indices = @transform_8, window_bounds = array<i64: 128, 128>}, {pipeline_mode = #tpu.pipeline_mode<synchronous>, transform_indices = @transform_9, window_bounds = array<i64: 128, 128>}, {pipeline_mode = #tpu.pipeline_mode<synchronous>, transform_indices = @transform_10, window_bounds = array<i64: 8, 8>}, {pipeline_mode = #tpu.pipeline_mode<synchronous>, transform_indices = @transform_11, window_bounds = array<i64: 8, 8>}, {transform_indices = @transform_12, window_bounds = array<i64: 1, 8, 128>}]} {
    %c0 = arith.constant 0 : index
    %c0_0 = arith.constant 0 : index
    %c0_1 = arith.constant 0 : index
    %0 = vector.load %arg1[%c0, %c0_0, %c0_1] : memref<1x16x256xf32, #tpu.memory_space<vmem>>, vector<1x16x256xf32>
    %1 = vector.shape_cast %0 : vector<1x16x256xf32> to vector<16x256xf32>
    %c0_2 = arith.constant 0 : index
    %c0_3 = arith.constant 0 : index
    %2 = vector.load %arg2[%c0_2, %c0_3] : memref<8x16xf32, #tpu.memory_space<vmem>>, vector<8x16xf32>
    %cst = arith.constant dense<0.000000e+00> : vector<8x256xf32>
    %3 = tpu.matmul %2, %1, %cst {dimension_numbers = #tpu.dot_dimension_numbers<[1], [0], [0], [1], [0, 0, 1, 1], [], []>, precision = #tpu.contract_precision<fp32>} : vector<8x16xf32>, vector<16x256xf32>, vector<8x256xf32> -> vector<8x256xf32>
    %c0_4 = arith.constant 0 : index
    %c0_5 = arith.constant 0 : index
    %4 = vector.load %arg3[%c0_4, %c0_5] : memref<8x16xf32, #tpu.memory_space<vmem>>, vector<8x16xf32>
    %cst_6 = arith.constant dense<0.000000e+00> : vector<8x256xf32>
    %5 = tpu.matmul %4, %1, %cst_6 {dimension_numbers = #tpu.dot_dimension_numbers<[1], [0], [0], [1], [0, 0, 1, 1], [], []>, precision = #tpu.contract_precision<fp32>} : vector<8x16xf32>, vector<16x256xf32>, vector<8x256xf32> -> vector<8x256xf32>
    %c0_7 = arith.constant 0 : index
    %c0_8 = arith.constant 0 : index
    %6 = vector.load %arg4[%c0_7, %c0_8] : memref<256x128xf32, #tpu.memory_space<vmem>>, vector<256x128xf32>
    %cst_9 = arith.constant dense<0.000000e+00> : vector<8x128xf32>
    %7 = tpu.matmul %3, %6, %cst_9 {dimension_numbers = #tpu.dot_dimension_numbers<[1], [0], [0], [1], [0, 0, 1, 1], [], []>, precision = #tpu.contract_precision<fp32>} : vector<8x256xf32>, vector<256x128xf32>, vector<8x128xf32> -> vector<8x128xf32>
    %c0_10 = arith.constant 0 : index
    %c0_11 = arith.constant 0 : index
    %8 = vector.load %arg5[%c0_10, %c0_11] : memref<256x128xf32, #tpu.memory_space<vmem>>, vector<256x128xf32>
    %cst_12 = arith.constant dense<0.000000e+00> : vector<8x128xf32>
    %9 = tpu.matmul %5, %8, %cst_12 {dimension_numbers = #tpu.dot_dimension_numbers<[1], [0], [0], [1], [0, 0, 1, 1], [], []>, precision = #tpu.contract_precision<fp32>} : vector<8x256xf32>, vector<256x128xf32>, vector<8x128xf32> -> vector<8x128xf32>
    %10 = arith.addf %3, %5 : vector<8x256xf32>
    %c0_13 = arith.constant 0 : index
    %c0_14 = arith.constant 0 : index
    %11 = vector.load %arg6[%c0_13, %c0_14] : memref<256x128xf32, #tpu.memory_space<vmem>>, vector<256x128xf32>
    %cst_15 = arith.constant dense<0.000000e+00> : vector<8x128xf32>
    %12 = tpu.matmul %10, %11, %cst_15 {dimension_numbers = #tpu.dot_dimension_numbers<[1], [0], [0], [1], [0, 0, 1, 1], [], []>, precision = #tpu.contract_precision<fp32>} : vector<8x256xf32>, vector<256x128xf32>, vector<8x128xf32> -> vector<8x128xf32>
    %c0_16 = arith.constant 0 : index
    %c0_17 = arith.constant 0 : index
    %13 = vector.load %arg7[%c0_16, %c0_17] : memref<8x128xf32, #tpu.memory_space<vmem>>, vector<8x128xf32>
    %14 = arith.subf %7, %9 : vector<8x128xf32>
    %15 = arith.mulf %14, %13 : vector<8x128xf32>
    %16 = arith.subf %12, %7 : vector<8x128xf32>
    %17 = arith.subf %16, %9 : vector<8x128xf32>
    %18 = arith.mulf %17, %13 : vector<8x128xf32>
    %c0_18 = arith.constant 0 : index
    %c0_19 = arith.constant 0 : index
    %19 = vector.load %arg8[%c0_18, %c0_19] : memref<128x128xf32, #tpu.memory_space<vmem>>, vector<128x128xf32>
    %cst_20 = arith.constant dense<0.000000e+00> : vector<8x128xf32>
    %20 = tpu.matmul %15, %19, %cst_20 {dimension_numbers = #tpu.dot_dimension_numbers<[1], [0], [0], [1], [0, 0, 1, 1], [], []>, precision = #tpu.contract_precision<fp32>} : vector<8x128xf32>, vector<128x128xf32>, vector<8x128xf32> -> vector<8x128xf32>
    %c0_21 = arith.constant 0 : index
    %c0_22 = arith.constant 0 : index
    %21 = vector.load %arg9[%c0_21, %c0_22] : memref<128x128xf32, #tpu.memory_space<vmem>>, vector<128x128xf32>
    %cst_23 = arith.constant dense<0.000000e+00> : vector<8x128xf32>
    %22 = tpu.matmul %18, %21, %cst_23 {dimension_numbers = #tpu.dot_dimension_numbers<[1], [0], [0], [1], [0, 0, 1, 1], [], []>, precision = #tpu.contract_precision<fp32>} : vector<8x128xf32>, vector<128x128xf32>, vector<8x128xf32> -> vector<8x128xf32>
    %23 = arith.addf %15, %18 : vector<8x128xf32>
    %c0_24 = arith.constant 0 : index
    %c0_25 = arith.constant 0 : index
    %24 = vector.load %arg10[%c0_24, %c0_25] : memref<128x128xf32, #tpu.memory_space<vmem>>, vector<128x128xf32>
    %cst_26 = arith.constant dense<0.000000e+00> : vector<8x128xf32>
    %25 = tpu.matmul %23, %24, %cst_26 {dimension_numbers = #tpu.dot_dimension_numbers<[1], [0], [0], [1], [0, 0, 1, 1], [], []>, precision = #tpu.contract_precision<fp32>} : vector<8x128xf32>, vector<128x128xf32>, vector<8x128xf32> -> vector<8x128xf32>
    %26 = arith.subf %20, %22 : vector<8x128xf32>
    %27 = arith.subf %25, %20 : vector<8x128xf32>
    %28 = arith.subf %27, %22 : vector<8x128xf32>
    %c0_27 = arith.constant 0 : index
    %c0_28 = arith.constant 0 : index
    %29 = vector.load %arg11[%c0_27, %c0_28] : memref<8x8xf32, #tpu.memory_space<vmem>>, vector<8x8xf32>
    %cst_29 = arith.constant dense<0.000000e+00> : vector<8x128xf32>
    %30 = tpu.matmul %29, %26, %cst_29 {dimension_numbers = #tpu.dot_dimension_numbers<[1], [0], [0], [1], [0, 0, 1, 1], [], []>, precision = #tpu.contract_precision<fp32>} : vector<8x8xf32>, vector<8x128xf32>, vector<8x128xf32> -> vector<8x128xf32>
    %c0_30 = arith.constant 0 : index
    %c0_31 = arith.constant 0 : index
    %31 = vector.load %arg12[%c0_30, %c0_31] : memref<8x8xf32, #tpu.memory_space<vmem>>, vector<8x8xf32>
    %cst_32 = arith.constant dense<0.000000e+00> : vector<8x128xf32>
    %32 = tpu.matmul %31, %28, %cst_32 {dimension_numbers = #tpu.dot_dimension_numbers<[1], [0], [0], [1], [0, 0, 1, 1], [], []>, precision = #tpu.contract_precision<fp32>} : vector<8x8xf32>, vector<8x128xf32>, vector<8x128xf32> -> vector<8x128xf32>
    %33 = arith.subf %30, %32 : vector<8x128xf32>
    %c0_33 = arith.constant 0 : index
    %c0_34 = arith.constant 0 : index
    %c0_35 = arith.constant 0 : index
    %34 = vector.load %arg13[%c0_33, %c0_34, %c0_35] : memref<1x8x128xf32, #tpu.memory_space<vmem>>, vector<1x8x128xf32>
    %35 = vector.shape_cast %34 : vector<1x8x128xf32> to vector<8x128xf32>
    %36 = vector.shape_cast %33 : vector<8x128xf32> to vector<1x8x128xf32>
    tpu.vector_store %arg13[%c0_33, %c0_34, %c0_35], %36 {strides = array<i32>} : memref<1x8x128xf32, #tpu.memory_space<vmem>>, vector<1x8x128xf32>,
    return
  }
  func.func @transform_0(%arg0: i32) -> (i32, i32, i32) {
    %c0_i32 = arith.constant 0 : i32
    %c0_i32_0 = arith.constant 0 : i32
    %c0_i32_1 = arith.constant 0 : i32
    return %arg0, %c0_i32, %c0_i32_0 : i32, i32, i32
  }
  func.func @transform_1(%arg0: i32) -> (i32, i32) {
    %c0_i32 = arith.constant 0 : i32
    %c0_i32_0 = arith.constant 0 : i32
    %c0_i32_1 = arith.constant 0 : i32
    return %c0_i32, %c0_i32_0 : i32, i32
  }
  func.func @transform_2(%arg0: i32) -> (i32, i32) {
    %c0_i32 = arith.constant 0 : i32
    %c0_i32_0 = arith.constant 0 : i32
    %c0_i32_1 = arith.constant 0 : i32
    return %c0_i32, %c0_i32_0 : i32, i32
  }
  func.func @transform_3(%arg0: i32) -> (i32, i32) {
    %c0_i32 = arith.constant 0 : i32
    %c0_i32_0 = arith.constant 0 : i32
    %c0_i32_1 = arith.constant 0 : i32
    return %c0_i32, %c0_i32_0 : i32, i32
  }
  func.func @transform_4(%arg0: i32) -> (i32, i32) {
    %c0_i32 = arith.constant 0 : i32
    %c0_i32_0 = arith.constant 0 : i32
    %c0_i32_1 = arith.constant 0 : i32
    return %c0_i32, %c0_i32_0 : i32, i32
  }
  func.func @transform_5(%arg0: i32) -> (i32, i32) {
    %c0_i32 = arith.constant 0 : i32
    %c0_i32_0 = arith.constant 0 : i32
    %c0_i32_1 = arith.constant 0 : i32
    return %c0_i32, %c0_i32_0 : i32, i32
  }
  func.func @transform_6(%arg0: i32) -> (i32, i32) {
    %c0_i32 = arith.constant 0 : i32
    %c0_i32_0 = arith.constant 0 : i32
    %c0_i32_1 = arith.constant 0 : i32
    return %c0_i32, %c0_i32_0 : i32, i32
  }
  func.func @transform_7(%arg0: i32) -> (i32, i32) {
    %c0_i32 = arith.constant 0 : i32
    %c0_i32_0 = arith.constant 0 : i32
    %c0_i32_1 = arith.constant 0 : i32
    return %c0_i32, %c0_i32_0 : i32, i32
  }
  func.func @transform_8(%arg0: i32) -> (i32, i32) {
    %c0_i32 = arith.constant 0 : i32
    %c0_i32_0 = arith.constant 0 : i32
    %c0_i32_1 = arith.constant 0 : i32
    return %c0_i32, %c0_i32_0 : i32, i32
  }
  func.func @transform_9(%arg0: i32) -> (i32, i32) {
    %c0_i32 = arith.constant 0 : i32
    %c0_i32_0 = arith.constant 0 : i32
    %c0_i32_1 = arith.constant 0 : i32
    return %c0_i32, %c0_i32_0 : i32, i32
  }
  func.func @transform_10(%arg0: i32) -> (i32, i32) {
    %c0_i32 = arith.constant 0 : i32
    %c0_i32_0 = arith.constant 0 : i32
    %c0_i32_1 = arith.constant 0 : i32
    return %c0_i32, %c0_i32_0 : i32, i32
  }
  func.func @transform_11(%arg0: i32) -> (i32, i32) {
    %c0_i32 = arith.constant 0 : i32
    %c0_i32_0 = arith.constant 0 : i32
    %c0_i32_1 = arith.constant 0 : i32
    return %c0_i32, %c0_i32_0 : i32, i32
  }
  func.func @transform_12(%arg0: i32) -> (i32, i32, i32) {
    %c0_i32 = arith.constant 0 : i32
    %c0_i32_0 = arith.constant 0 : i32
    %c0_i32_1 = arith.constant 0 : i32
    return %arg0, %c0_i32, %c0_i32_0 : i32, i32, i32
  }
}

</mosaic_0001>

<bundles_post_ra>
// kernel: tpu_custom_call.1
= control target key start
LH: loop header
LB: loop body
LE: loop exit
PB: predicated region body
PF: predicated region fallthrough
CT: control target
= control target key end

     0   :  { %17 = vsyncpa [#allocation3], 0  ;;  %s7292_s0 = inlined_call_operand.hbm [shape: f32[1,16,256], index: 0, kind: input, shape index: {}]   ;;  %s7293_s1 = inlined_call_operand.hbm [shape: f32[8,16], index: 1, kind: input, shape index: {}]   ;;  %s7294_s2 = inlined_call_operand.hbm [shape: f32[8,16], index: 2, kind: input, shape index: {}]   ;;  %s7295_s3 = inlined_call_operand.hbm [shape: f32[256,128], index: 3, kind: input, shape index: {}]   ;;  %s7296_s4 = inlined_call_operand.hbm [shape: f32[256,128], index: 4, kind: input, shape index: {}]   ;;  %s7297_s5 = inlined_call_operand.hbm [shape: f32[256,128], index: 5, kind: input, shape index: {}]   ;;  %s7298_s6 = inlined_call_operand.hbm [shape: f32[8,128], index: 6, kind: input, shape index: {}]   ;;  %s7299_s7 = inlined_call_operand.hbm [shape: f32[128,128], index: 7, kind: input, shape index: {}]   ;;  %s7300_s8 = inlined_call_operand.hbm [shape: f32[128,128], index: 8, kind: input, shape index: {}]   ;;  %s7301_s9 = inlined_call_operand.hbm [shape: f32[128,128], index: 9, kind: input, shape index: {}]   ;;  %s7302_s10 = inlined_call_operand.vmem [shape: f32[8,8], index: 10, kind: input, shape index: {}]   ;;  %s7303_s11 = inlined_call_operand.hbm [shape: f32[8,8], index: 11, kind: input, shape index: {}]   ;;  %s7304_s12 = inlined_call_operand.hbm [shape: f32[1,8,128], index: 12, kind: output, shape index: {}]  }
   0x1   :  { %18 = vsyncpa [#allocation6], 0 }
   0x2   :  { %19 = vsyncpa [#allocation9], 0 }
   0x3   :  { %20 = vsyncpa [#allocation12], 0 }
   0x4   :  { %21 = vsyncpa [#allocation15], 0 }
   0x5   :  { %22 = vsyncpa [#allocation18], 0  ;;  %s42_s23 = sshll.u32 %s7293_s1, 4  ;;  %s43_s23 = int_to_ptr.hbm [resolvable:$true] %s42_s23 }
   0x6   :  { %23 = vsyncpa [#allocation4], 0  ;;  %s4722_s24 = smov [#allocation5]   ;;  %s63_s28 = sshll.u32 %s7295_s3, 4  ;;  %s64_s28 = int_to_ptr.hbm [resolvable:$true] %s63_s28 }
   0x7   :  { %s44_s25 = sshll.u32 %s4722_s24, 4  ;;  %s4723_s29 = smov [#allocation8]   ;;  %s45_s25 = int_to_ptr.vmem [resolvable:$true] %s44_s25 }
   0x8   :  { %47 = dma.hbm_to_vmem [thread:$0]  %s43_s23, 128, %s45_s25, [#allocation6]  }
   0x9   :  { %s65_s30 = sshll.u32 %s4723_s29, 4  ;;  %s4724_s13 = smov 128   ;;  %s66_s30 = int_to_ptr.vmem [resolvable:$true] %s65_s30 }
   0xa   :  { %s4725_s14 = smov 8   ;;  %s89_s16 = sshll.u32 %s7297_s5, 4  ;;  %s90_s16 = int_to_ptr.hbm [resolvable:$true] %s89_s16 }
   0xb   :  { %71 = dma.hbm_to_vmem [thread:$0]  %s64_s28, 4096, %s66_s30, [#allocation9], %s4724_s13, %s4724_s13, %s4725_s14  }
   0xc   :  { %s4726_s17 = smov [#allocation11]   ;;  %s113_s20 = sshll.u32 %s7299_s7, 4  ;;  %s114_s20 = int_to_ptr.hbm [resolvable:$true] %s113_s20 }
   0xd   :  { %s91_s18 = sshll.u32 %s4726_s17, 4  ;;  %s4727_s21 = smov [#allocation14]   ;;  %s92_s18 = int_to_ptr.vmem [resolvable:$true] %s91_s18 }
   0xe   :  { %97 = dma.hbm_to_vmem [thread:$0]  %s90_s16, 4096, %s92_s18, [#allocation12], %s4724_s13, %s4724_s13, %s4725_s14  }
   0xf   :  { %s115_s22 = sshll.u32 %s4727_s21, 4  ;;  %s139_s25 = sshll.u32 %s7301_s9, 4  ;;  %s116_s22 = int_to_ptr.vmem [resolvable:$true] %s115_s22  ;;  %s140_s25 = int_to_ptr.hbm [resolvable:$true] %s139_s25 }
  0x10   :  { %121 = dma.hbm_to_vmem [thread:$0]  %s114_s20, 2048, %s116_s22, [#allocation15], %s4724_s13, %s4724_s13, %s4725_s14  }
  0x11   :  { %s28_s7 = sshll.u32 %s7292_s0, 4  ;;  %s4728_s27 = smov [#allocation17]   ;;  %s29_s7 = int_to_ptr.hbm [resolvable:$true] %s28_s7 }
  0x12   :  { %s141_s28 = sshll.u32 %s4728_s27, 4  ;;  %s4729_s29 = smov [#allocation2]   ;;  %s142_s28 = int_to_ptr.vmem [resolvable:$true] %s141_s28 }
  0x13   :  { %147 = dma.hbm_to_vmem [thread:$0]  %s140_s25, 2048, %s142_s28, [#allocation18], %s4724_s13, %s4724_s13, %s4725_s14  }
  0x14   :  { %s30_s9 = sshll.u32 %s4729_s29, 4  ;;  %s4730_s30 = smov 256   ;;  %s31_s9 = int_to_ptr.vmem [resolvable:$true] %s30_s9 }
  0x15   :  { %s4731_s1 = smov 16   ;;  %s53_s17 = sshll.u32 %s7294_s2, 4  ;;  %s54_s17 = int_to_ptr.hbm [resolvable:$true] %s53_s17 }
  0x16   :  { %36 = dma.hbm_to_vmem [thread:$0]  %s29_s7, 512, %s31_s9, [#allocation3], %s4730_s30, %s4730_s30, %s4731_s1  }
  0x17   :  { %s4732_s0 = smov [#allocation7]   ;;  %s76_s20 = sshll.u32 %s7296_s4, 4  ;;  %s77_s20 = int_to_ptr.hbm [resolvable:$true] %s76_s20 }
  0x18   :  { %s55_s18 = sshll.u32 %s4732_s0, 4  ;;  %s4733_s21 = smov [#allocation10]   ;;  %s56_s18 = int_to_ptr.vmem [resolvable:$true] %s55_s18 }
  0x19   :  { %58 = dma.hbm_to_vmem [thread:$0]  %s54_s17, 128, %s56_s18, [#allocation6]  }
  0x1a   :  { %s78_s22 = sshll.u32 %s4733_s21, 4  ;;  %s103_s25 = sshll.u32 %s7298_s6, 4  ;;  %s79_s22 = int_to_ptr.vmem [resolvable:$true] %s78_s22  ;;  %s104_s25 = int_to_ptr.hbm [resolvable:$true] %s103_s25 }
  0x1b   :  { %84 = dma.hbm_to_vmem [thread:$0]  %s77_s20, 4096, %s79_s22, [#allocation9], %s4724_s13, %s4724_s13, %s4725_s14  }
  0x1c   :  { %s126_s26 = sshll.u32 %s7300_s8, 4  ;;  %s4734_s7 = smov [#allocation13]   ;;  %s127_s26 = int_to_ptr.hbm [resolvable:$true] %s126_s26 }
  0x1d   :  { %s105_s4 = sshll.u32 %s4734_s7, 4  ;;  %s4735_s27 = smov [#allocation16]   ;;  %s106_s4 = int_to_ptr.vmem [resolvable:$true] %s105_s4 }
  0x1e   :  { %108 = dma.hbm_to_vmem [thread:$0]  %s104_s25, 128, %s106_s4, [#allocation12]  }
  0x1f   :  { %s128_s28 = sshll.u32 %s4735_s27, 4  ;;  %s155_s6 = sshll.u32 %s7303_s11, 4  ;;  %s129_s28 = int_to_ptr.vmem [resolvable:$true] %s128_s28  ;;  %s156_s6 = int_to_ptr.hbm [resolvable:$true] %s155_s6 }
  0x20   :  { %134 = dma.hbm_to_vmem [thread:$0]  %s127_s26, 2048, %s129_s28, [#allocation15], %s4724_s13, %s4724_s13, %s4725_s14  }
  0x21   :  { %s4736_s30 = smov [#allocation19]  }
  0x22   :  { %s157_s1 = sshll.u32 %s4736_s30, 4  ;;  %s158_s1 = int_to_ptr.vmem [resolvable:$true] %s157_s1 }
  0x23   :  { %160 = dma.hbm_to_vmem [thread:$0]  %s156_s6, 128, %s158_s1, [#allocation18]  }
  0x24   :  { %4708 = dma.done.wait [#allocation3], 512  }
  0x25   :  { %4709 = vsyncadd [#allocation3], 4294966784 }
  0x26   :  { %4710 = dma.done.wait [#allocation6], 256  }
  0x27   :  { %4711 = vsyncadd [#allocation6], 4294967040 }
  0x28   :  { %4712 = dma.done.wait [#allocation9], 8192  }
  0x29   :  { %4713 = vsyncadd [#allocation9], 4294959104 }
  0x2a   :  { %4714 = dma.done.wait [#allocation12], 4224  }
  0x2b   :  { %4715 = vsyncadd [#allocation12], 4294963072 }
  0x2c   :  { %4716 = dma.done.wait [#allocation15], 4096  }
  0x2d   :  { %4717 = vsyncadd [#allocation15], 4294963200 }
  0x2e   :  { %4718 = dma.done.wait [#allocation18], 2176  }
  0x2f   :  { %4719 = vsyncadd [#allocation18], 4294965120  ;;  %vm210_vm0 = vcmask 130048   ;;  %v207_v0 = vld [vmem:[#allocation2 + $0x10] sm:$0xff]  ;;  %v205_v1 = vld [vmem:[#allocation2] sm:$0xff]  ;;  %vm4080_vm1 = vcmask 64512  }
  0x30   :  { %v209_v2 = vld [vmem:[#allocation5] sm:$0xff]  ;;  %v4854_v3 = vand.u32 4294901760, %v207_v0  ;;  %v4856_v4 = vand.u32 4294901760, %v205_v1  ;;  %v208_v6 = vld [vmem:[#allocation2 + $0x18] sm:$0xff]  ;;  %v206_v7 = vld [vmem:[#allocation2 + $0x8] sm:$0xff]  ;;  %s4389_s16 = sshll.u32 %s7304_s12, 4  ;;  %s4390_s16 = int_to_ptr.hbm [resolvable:$true] %s4389_s16 }
  0x31   :  { %v212_v5 = vsel %vm210_vm0, %v209_v2, 0  ;;  %v4861_v9 = vand.u32 4294901760, %v208_v6  ;;  %v4863_v10 = vand.u32 4294901760, %v206_v7  ;;  %v532_v31 = vld [vmem:[#allocation7] sm:$0xff]  ;;  %v868_v37 = vld [vmem:[#allocation8 + $0x70] sm:$0xff]  ;;  %v867_v40 = vld [vmem:[#allocation8 + $0x68] sm:$0xff] }
  0x32   :  { %v4859_v8 = vand.u32 4294901760, %v212_v5  ;;  %v256_v11 = vsub.f32 %v207_v0, %v4854_v3  ;;  %229 = vmatpush.msra.mxu0 %v4854_v3  ;;  %v262_v12 = vsub.f32 %v205_v1, %v4856_v4  ;;  %313 = vmatpush.msra.mxu3 %v4854_v3  ;;  %v534_v32 = vsel %vm210_vm0, %v532_v31, 0  ;;  %v869_v36 = vld [vmem:[#allocation8 + $0x78] sm:$0xff]  ;;  %v866_v42 = vld [vmem:[#allocation8 + $0x60] sm:$0xff]  ;;  %v864_v50 = vld [vmem:[#allocation8 + $0x50] sm:$0xff] }
  0x33   :  { %v4873_v14 = vsub.f32 %v208_v6, %v4861_v9  ;;  %v4876_v15 = vsub.f32 %v206_v7, %v4863_v10  ;;  %v4913_v33 = vand.u32 4294901760, %v534_v32  ;;  %v4937_v38 = vand.u32 4294901760, %v869_v36  ;;  %v865_v45 = vld [vmem:[#allocation8 + $0x58] sm:$0xff]  ;;  %v863_v53 = vld [vmem:[#allocation8 + $0x48] sm:$0xff]  ;;  %v862_v57 = vld [vmem:[#allocation8 + $0x40] sm:$0xff] }
  0x34   :  { %v4870_v13 = vsub.f32 %v212_v5, %v4859_v8  ;;  %288 = vmatpush.msra.mxu2 %v256_v11  ;;  %231 = vmatpush.msra.mxu0 %v4856_v4  ;;  %v4879_v16 = vand.u32 4294901760, %v256_v11  ;;  %v4881_v17 = vand.u32 4294901760, %v262_v12  ;;  %v4944_v41 = vand.u32 4294901760, %v868_v37  ;;  %v861_v63 = vld [vmem:[#allocation8 + $0x38] sm:$0xff] }
  0x35   :  { %315 = vmatpush.msra.mxu3 %v4856_v4  ;;  %v4888_v19 = vand.u32 4294901760, %v4873_v14  ;;  %v4891_v20 = vand.u32 4294901760, %v4876_v15  ;;  %v4923_v34 = vsub.f32 %v534_v32, %v4913_v33  ;;  %v4950_v43 = vsub.f32 %v869_v36, %v4937_v38 }
  0x36   :  { %v4885_v18 = vand.u32 4294901760, %v4870_v13  ;;  %291 = vmatpush.msra.mxu2 %v262_v12  ;;  %v258_v21 = vsub.f32 %v256_v11, %v4879_v16  ;;  %v264_v22 = vsub.f32 %v262_v12, %v4881_v17  ;;  %340 = vmatpush.msrb.mxu0 %v4879_v16  ;;  %v4952_v44 = vand.u32 4294901760, %v867_v40 }
  0x37   :  { %294 = vmatmul.f32.vlgmr.msra.gmra.mxu2 %v4870_v13  ;;  %v417_v24 = vsub.f32 %v4873_v14, %v4888_v19  ;;  %v423_v25 = vsub.f32 %v4876_v15, %v4891_v20  ;;  %v4933_v35 = vand.u32 4294901760, %v4923_v34  ;;  %v4959_v47 = vsub.f32 %v868_v37, %v4944_v41  ;;  %v855_v37 = vld [vmem:[#allocation8 + $0x8] sm:$0xff] }
  0x38   :  { %v235_v23 = vsub.f32 %v4870_v13, %v4885_v18  ;;  %319 = vmatmul.f32.vlgmr.msra.gmra.mxu3 %v4885_v18  ;;  %v259_v26 = vand.u32 4294901760, %v258_v21  ;;  %v265_v27 = vand.u32 4294901760, %v264_v22  ;;  %388 = vmatpush.msrb.mxu2 %v4861_v9  ;;  %v4961_v48 = vand.u32 4294901760, %v866_v42 }
  0x39   :  { %344 = vmatpush.msrb.mxu0 %v4881_v17  ;;  %v418_v29 = vand.u32 4294901760, %v417_v24  ;;  %v424_v30 = vand.u32 4294901760, %v423_v25  ;;  %v557_v39 = vsub.f32 %v4923_v34, %v4933_v35  ;;  %v4964_v49 = vand.u32 4294901760, %v865_v45 }
  0x3a   :  { %v236_v28 = vand.u32 4294901760, %v235_v23  ;;  %260 = vmatpush.msra.mxu1 %v259_v26  ;;  %390 = vmatpush.msrb.mxu2 %v4863_v10  ;;  %v929_v51 = vand.u32 4294901760, %v4950_v43  ;;  %v4969_v52 = vsub.f32 %v867_v40, %v4952_v44  ;;  %v935_v54 = vand.u32 4294901760, %v4959_v47  ;;  %v857_v23 = vld [vmem:[#allocation8 + $0x18] sm:$0xff] }
  0x3b   :  { %419 = vmatpush.msrb.mxu3 %v418_v29  ;;  %v558_v46 = vand.u32 4294901760, %v557_v39  ;;  %v4975_v55 = vsub.f32 %v866_v42, %v4961_v48  ;;  %v4977_v56 = vand.u32 4294901760, %v864_v50  ;;  %v4981_v58 = vsub.f32 %v865_v45, %v4964_v49  ;;  %v854_v45 = vld [vmem:[#allocation8] sm:$0xff] }
  0x3c   :  { %237 = vmatmul.f32.vlgmr.msra.gmra.mxu0 %v236_v28  ;;  %266 = vmatpush.msra.mxu1 %v265_v27  ;;  %v930_v59 = vsub.f32 %v4950_v43, %v929_v51  ;;  %v941_v60 = vand.u32 4294901760, %v4969_v52  ;;  %v4989_v61 = vand.u32 4294901760, %v863_v53  ;;  %v4992_v62 = vand.u32 4294901760, %v862_v57 }
  0x3d   :  { %499 = vmatpush.msra.mxu2 %v4888_v19  ;;  %268 = vmatmul.f32.vlgmr.msra.gmra.mxu1 %v4859_v8  ;;  %v936_v0 = vsub.f32 %v4959_v47, %v935_v54  ;;  %v947_v1 = vand.u32 4294901760, %v4975_v55  ;;  %v5001_v2 = vsub.f32 %v864_v50, %v4977_v56  ;;  %v5061_v32 = vand.u32 4294901760, %v857_v23 }
  0x3e   :  { %425 = vmatpush.msrb.mxu3 %v424_v30  ;;  %365 = vmatpush.msrb.mxu1 %v4854_v3  ;;  %v931_v5 = vand.u32 4294901760, %v930_v59  ;;  %v942_v6 = vsub.f32 %v4969_v52, %v941_v60  ;;  %v5010_v7 = vsub.f32 %v863_v53, %v4989_v61  ;;  %v5085_v59 = vand.u32 4294901760, %v855_v37 }
  0x3f   :  { %447 = vmatpush.msra.mxu0 %v4873_v14  ;;  %396 = vmatmul.f32.vlgmr.msrb.gmra.mxu2 %v236_v28  ;;  %v856_v28 = vld [vmem:[#allocation8 + $0x10] sm:$0xff] }
  0x40   :  { %427 = vmatmul.f32.vlgmr.msrb.gmra.mxu3 %v4859_v8  ;;  %367 = vmatpush.msrb.mxu1 %v4856_v4  ;;  %v5073_v42 = vand.u32 4294901760, %v856_v28 }
  0x41   :  { %503 = vmatpush.msra.mxu2 %v4891_v20  ;;  %524 = vmatpush.msra.mxu3 %v4861_v9 }
  0x42   :  { %450 = vmatpush.msra.mxu0 %v4876_v15  ;;  %472 = vmatpush.msra.mxu1 %v4861_v9 }
  0x43   :  { %610 = vmatpush.msrb.mxu2 %v256_v11  ;;  %526 = vmatpush.msra.mxu3 %v4863_v10 }
  0x44   :  { %346 = vmatmul.f32.vlgmr.msrb.gmra.mxu0 %v4859_v8  ;;  %474 = vmatpush.msra.mxu1 %v4863_v10 }
  0x45   :  { %551 = vmatpush.msrb.mxu0 %v4854_v3  ;;  %369 = vmatmul.f32.vlgmr.msrb.gmra.mxu1 %v4859_v8 }
  0x46   :  { %613 = vmatpush.msrb.mxu2 %v262_v12  ;;  %635 = vmatpush.msrb.mxu3 %v4854_v3  ;;  %v937_v12 = vand.u32 4294901760, %v936_v0  ;;  %v884_v0 = vld [vmem:[#allocation8 + $0xf0] sm:$0xff] }
  0x47   :  { %553 = vmatpush.msrb.mxu0 %v4856_v4  ;;  %505 = vmatmul.f32.vlgmr.msra.gmra.mxu2 %v4859_v8 }
  0x48   :  { %528 = vmatmul.f32.vlgmr.msra.gmra.mxu3 %v4859_v8  ;;  %582 = vmatpush.msrb.mxu1 %v259_v26  ;;  %v5012_v8 = vand.u32 4294901760, %v861_v63 }
  0x49   :  { %637 = vmatpush.msrb.mxu3 %v4856_v4  ;;  %710 = vmatpush.msra.mxu2 %v4861_v9 }
  0x4a   :  { %588 = vmatpush.msrb.mxu1 %v265_v27 }
  0x4b   :  { %741 = vmatpush.msra.mxu3 %v418_v29  ;;  %712 = vmatpush.msra.mxu2 %v4863_v10 }
  0x4c   :  { %453 = vmatmul.f32.vlgmr.msra.gmra.mxu0 %v4870_v13  ;;  %v948_v13 = vsub.f32 %v4975_v55, %v947_v1 }
  0x4d   :  { %662 = vmatpush.msra.mxu0 %v4879_v16  ;;  %747 = vmatpush.msra.mxu3 %v424_v30  ;;  %v858_v16 = vld [vmem:[#allocation8 + $0x20] sm:$0xff] }
  0x4e   :  { %478 = vmatmul.f32.vlgmr.msra.gmra.mxu1 %v4885_v18  ;;  %v949_v24 = vand.u32 4294901760, %v948_v13  ;;  %v5049_v26 = vand.u32 4294901760, %v858_v16 }
  0x4f   :  { %666 = vmatpush.msra.mxu0 %v4881_v17  ;;  %687 = vmatpush.msra.mxu1 %v4854_v3  ;;  %v860_v3 = vld [vmem:[#allocation8 + $0x30] sm:$0xff]  ;;  %v943_v17 = vand.u32 4294901760, %v942_v6  ;;  %v5097_v6 = vand.u32 4294901760, %v854_v45 }
  0x50   :  { %616 = vmatmul.f32.vlgmr.msrb.gmra.mxu2 %v4923_v34  ;;  %641 = vmatmul.f32.vlgmr.msrb.gmra.mxu3 %v4933_v35  ;;  %v5019_v11 = vand.u32 4294901760, %v860_v3  ;;  %v5071_v40 = vsub.f32 %v858_v16, %v5049_v26 }
  0x51   :  { %689 = vmatpush.msra.mxu1 %v4856_v4  ;;  %821 = vmatpush.msrb.mxu2 %v4888_v19  ;;  %v953_v4 = vand.u32 4294901760, %v4981_v58  ;;  %v965_v19 = vand.u32 4294901760, %v5010_v7 }
  0x52   :  { %846 = vmatpush.msrb.mxu3 %v4861_v9  ;;  %v5043_v22 = vsub.f32 %v860_v3, %v5019_v11  ;;  %v7306_v3 = vand.u32 4294901760, %v5071_v40 }
  0x53   :  { %825 = vmatpush.msrb.mxu2 %v4891_v20  ;;  %v954_v18 = vsub.f32 %v4981_v58, %v953_v4  ;;  %v5037_v20 = vsub.f32 %v861_v63, %v5012_v8  ;;  %v966_v30 = vsub.f32 %v5010_v7, %v965_v19 }
  0x54   :  { %559 = vmatmul.f32.vlgmr.msrb.gmra.mxu0 %v558_v46  ;;  %848 = vmatpush.msrb.mxu3 %v4863_v10  ;;  %v7309_v36 = vand.u32 4294901760, %v5043_v22 }
  0x55   :  { %769 = vmatpush.msrb.mxu0 %v4873_v14  ;;  %v959_v14 = vand.u32 4294901760, %v5001_v2  ;;  %v955_v29 = vand.u32 4294901760, %v954_v18  ;;  %v7311_v31 = vand.u32 4294901760, %v5037_v20  ;;  %v967_v50 = vand.u32 4294901760, %v966_v30 }
  0x56   :  { %590 = vmatmul.f32.vlgmr.msrb.gmra.mxu1 %v4913_v33  ;;  %v984_v63 = vsub.f32 %v5043_v22, %v7309_v36  ;;  %v5111_v18 = vand.u32 4294901760, %v884_v0 }
  0x57   :  { %772 = vmatpush.msrb.mxu0 %v4876_v15  ;;  %794 = vmatpush.msrb.mxu1 %v4861_v9  ;;  %v859_v9 = vld [vmem:[#allocation8 + $0x28] sm:$0xff]  ;;  %v960_v25 = vsub.f32 %v5001_v2, %v959_v14  ;;  %v978_v53 = vsub.f32 %v5037_v20, %v7311_v31 }
  0x58   :  { %718 = vmatmul.f32.vlgmr.msra.gmra.mxu2 %v558_v46  ;;  %749 = vmatmul.f32.vlgmr.msra.gmra.mxu3 %v4913_v33  ;;  %v5029_v15 = vand.u32 4294901760, %v859_v9  ;;  %v885_v46 = vld [vmem:[#allocation8 + $0xf8] sm:$0xff] }
  0x59   :  { %796 = vmatpush.msrb.mxu1 %v4863_v10  ;;  %1030 = vmatpush.msra.mxu2 %v4950_v43  ;;  %v5017_v10 = vsub.f32 %v862_v57, %v4992_v62  ;;  %v961_v39 = vand.u32 4294901760, %v960_v25  ;;  %v5083_v57 = vsub.f32 %v857_v23, %v5061_v32  ;;  %v979_v13 = vand.u32 4294901760, %v978_v53  ;;  %v883_v23 = vld [vmem:[#allocation8 + $0xe8] sm:$0xff]  ;;  %v881_v53 = vld [vmem:[#allocation8 + $0xd8] sm:$0xff] }
  0x5a   :  { %1083 = vmatpush.msra.mxu3 %v4937_v38  ;;  %v5054_v27 = vsub.f32 %v859_v9, %v5029_v15  ;;  %v5099_v9 = vand.u32 4294901760, %v885_v46  ;;  %v996_v25 = vsub.f32 %v5071_v40, %v7306_v3 }
  0x5b   :  { %1033 = vmatpush.msra.mxu2 %v4959_v47  ;;  %v971_v21 = vand.u32 4294901760, %v5017_v10  ;;  %v7305_v16 = vand.u32 4294901760, %v5083_v57 }
  0x5c   :  { %668 = vmatmul.f32.vlgmr.msra.gmra.mxu0 %v4913_v33  ;;  %1085 = vmatpush.msra.mxu3 %v4944_v41  ;;  %v5124_v30 = vsub.f32 %v885_v46, %v5099_v9  ;;  %v5136_v46 = vsub.f32 %v884_v0, %v5111_v18 }
  0x5d   :  { %1036 = vmatpush.msra.mxu2 %v4969_v52  ;;  %887 = vmatpush.msra.mxu0 %v4937_v38 }
  0x5e   :  { %691 = vmatmul.f32.vlgmr.msra.gmra.mxu1 %v4913_v33  ;;  %1087 = vmatpush.msra.mxu3 %v4952_v44  ;;  %v7312_v0 = vand.u32 4294901760, %v5124_v30 }
  0x5f   :  { %932 = vmatpush.msra.mxu1 %v931_v5  ;;  %1039 = vmatpush.msra.mxu2 %v4975_v55  ;;  %v5095_v5 = vsub.f32 %v856_v28, %v5073_v42 }
  0x60   :  { %827 = vmatmul.f32.vlgmr.msrb.gmra.mxu2 %v4913_v33  ;;  %850 = vmatmul.f32.vlgmr.msrb.gmra.mxu3 %v4913_v33  ;;  %v972_v33 = vsub.f32 %v5017_v10, %v971_v21 }
  0x61   :  { %938 = vmatpush.msra.mxu1 %v937_v12  ;;  %889 = vmatpush.msra.mxu0 %v4944_v41  ;;  %v7307_v28 = vand.u32 4294901760, %v5095_v5 }
  0x62   :  { %1042 = vmatpush.msra.mxu2 %v4981_v58  ;;  %1089 = vmatpush.msra.mxu3 %v4961_v48  ;;  %v876_v58 = vld [vmem:[#allocation8 + $0xb0] sm:$0xff] }
  0x63   :  { %944 = vmatpush.msra.mxu1 %v943_v17  ;;  %891 = vmatpush.msra.mxu0 %v4952_v44  ;;  %v5109_v17 = vsub.f32 %v855_v37, %v5085_v59  ;;  %v5128_v37 = vand.u32 4294901760, %v883_v23 }
  0x64   :  { %775 = vmatmul.f32.vlgmr.msrb.gmra.mxu0 %v4923_v34  ;;  %1045 = vmatpush.msra.mxu2 %v5001_v2  ;;  %v7308_v34 = vand.u32 4294901760, %v5054_v27  ;;  %v7384_v2 = vand.u32 4294901760, %v5054_v27 }
  0x65   :  { %950 = vmatpush.msra.mxu1 %v949_v24  ;;  %1091 = vmatpush.msra.mxu3 %v4964_v49  ;;  %v985_v24 = vand.u32 4294901760, %v984_v63  ;;  %v997_v63 = vand.u32 4294901760, %v996_v25  ;;  %v5151_v3 = vsub.f32 %v883_v23, %v5128_v37 }
  0x66   :  { %800 = vmatmul.f32.vlgmr.msrb.gmra.mxu1 %v4933_v35  ;;  %893 = vmatpush.msra.mxu0 %v4961_v48  ;;  %v973_v35 = vand.u32 4294901760, %v972_v33  ;;  %v990_v12 = vsub.f32 %v5054_v27, %v7308_v34  ;;  %v882_v33 = vld [vmem:[#allocation8 + $0xe0] sm:$0xff]  ;;  %v7314_v34 = vand.u32 4294901760, %v5136_v46 }
  0x67   :  { %956 = vmatpush.msra.mxu1 %v955_v29  ;;  %1048 = vmatpush.msra.mxu2 %v5010_v7  ;;  %v5121_v29 = vsub.f32 %v854_v45, %v5097_v6  ;;  %v7310_v45 = vand.u32 4294901760, %v5109_v17 }
  0x68   :  { %1093 = vmatpush.msra.mxu3 %v4977_v56  ;;  %895 = vmatpush.msra.mxu0 %v4964_v49 }
  0x69   :  { %962 = vmatpush.msra.mxu1 %v961_v39  ;;  %1051 = vmatpush.msra.mxu2 %v5017_v10  ;;  %v991_v39 = vand.u32 4294901760, %v990_v12  ;;  %v1008_v12 = vsub.f32 %v5095_v5, %v7307_v28  ;;  %v1014_v28 = vsub.f32 %v5109_v17, %v7310_v45  ;;  %v1271_v45 = vsub.f32 %v5124_v30, %v7312_v0 }
  0x6a   :  { %1095 = vmatpush.msra.mxu3 %v4989_v61  ;;  %897 = vmatpush.msra.mxu0 %v4977_v56 }
  0x6b   :  { %968 = vmatpush.msra.mxu1 %v967_v50  ;;  %1054 = vmatpush.msra.mxu2 %v5037_v20  ;;  %v1002_v50 = vsub.f32 %v5083_v57, %v7305_v16  ;;  %v880_v16 = vld [vmem:[#allocation8 + $0xd0] sm:$0xff] }
  0x6c   :  { %1097 = vmatpush.msra.mxu3 %v4992_v62  ;;  %899 = vmatpush.msra.mxu0 %v4989_v61  ;;  %v5165_v23 = vand.u32 4294901760, %v880_v16 }
  0x6d   :  { %974 = vmatpush.msra.mxu1 %v973_v35  ;;  %1057 = vmatpush.msra.mxu2 %v5043_v22  ;;  %v5140_v35 = vand.u32 4294901760, %v882_v33  ;;  %v1003_v25 = vand.u32 4294901760, %v1002_v50 }
  0x6e   :  { %1099 = vmatpush.msra.mxu3 %v5012_v8  ;;  %901 = vmatpush.msra.mxu0 %v4992_v62 }
  0x6f   :  { %980 = vmatpush.msra.mxu1 %v979_v13  ;;  %1060 = vmatpush.msra.mxu2 %v5054_v27  ;;  %v7313_v13 = vand.u32 4294901760, %v5121_v29  ;;  %v5163_v36 = vsub.f32 %v882_v33, %v5140_v35  ;;  %v1282_v33 = vand.u32 4294901760, %v5151_v3 }
  0x70   :  { %1101 = vmatpush.msra.mxu3 %v5019_v11  ;;  %903 = vmatpush.msra.mxu0 %v5012_v8 }
  0x71   :  { %986 = vmatpush.msra.mxu1 %v985_v24  ;;  %1063 = vmatpush.msra.mxu2 %v5071_v40  ;;  %v5153_v24 = vand.u32 4294901760, %v881_v53  ;;  %v1020_v50 = vsub.f32 %v5121_v29, %v7313_v13  ;;  %v1288_v0 = vand.u32 4294901760, %v5163_v36  ;;  %v5188_v13 = vsub.f32 %v880_v16, %v5165_v23 }
  0x72   :  { %1103 = vmatpush.msra.mxu3 %v5029_v15  ;;  %905 = vmatpush.msra.mxu0 %v5019_v11 }
  0x73   :  { %992 = vmatpush.msra.mxu1 %v991_v39  ;;  %1066 = vmatpush.msra.mxu2 %v5083_v57  ;;  %v1009_v39 = vand.u32 4294901760, %v1008_v12  ;;  %v5178_v31 = vsub.f32 %v881_v53, %v5153_v24  ;;  %v1277_v12 = vsub.f32 %v5136_v46, %v7314_v34  ;;  %v1021_v53 = vand.u32 4294901760, %v1020_v50 }
  0x74   :  { %1105 = vmatpush.msra.mxu3 %v5049_v26  ;;  %907 = vmatpush.msra.mxu0 %v5029_v15 }
  0x75   :  { %998 = vmatpush.msra.mxu1 %v997_v63  ;;  %1069 = vmatpush.msra.mxu2 %v5095_v5  ;;  %v1015_v63 = vand.u32 4294901760, %v1014_v28  ;;  %v1272_v28 = vand.u32 4294901760, %v1271_v45  ;;  %v1294_v34 = vand.u32 4294901760, %v5178_v31  ;;  %v1278_v16 = vand.u32 4294901760, %v1277_v12 }
  0x76   :  { %1107 = vmatpush.msra.mxu3 %v5061_v32  ;;  %909 = vmatpush.msra.mxu0 %v5049_v26  ;;  %v1289_v45 = vsub.f32 %v5163_v36, %v1288_v0 }
  0x77   :  { %1004 = vmatpush.msra.mxu1 %v1003_v25  ;;  %1072 = vmatpush.msra.mxu2 %v5109_v17  ;;  %v1283_v25 = vsub.f32 %v5151_v3, %v1282_v33 }
  0x78   :  { %1109 = vmatpush.msra.mxu3 %v5073_v42  ;;  %911 = vmatpush.msra.mxu0 %v5061_v32  ;;  %v1290_v12 = vand.u32 4294901760, %v1289_v45 }
  0x79   :  { %1010 = vmatpush.msra.mxu1 %v1009_v39  ;;  %1075 = vmatpush.msra.mxu2 %v5121_v29  ;;  %v1300_v39 = vand.u32 4294901760, %v5188_v13  ;;  %v1284_v50 = vand.u32 4294901760, %v1283_v25 }
  0x7a   :  { %1111 = vmatpush.msra.mxu3 %v5085_v59  ;;  %913 = vmatpush.msra.mxu0 %v5073_v42 }
  0x7b   :  { %1228 = vmatpush.msrb.mxu2 %v5099_v9  ;;  %1016 = vmatpush.msra.mxu1 %v1015_v63  ;;  %v1295_v63 = vsub.f32 %v5178_v31, %v1294_v34 }
  0x7c   :  { %1113 = vmatpush.msra.mxu3 %v5097_v6  ;;  %915 = vmatpush.msra.mxu0 %v5085_v59 }
  0x7d   :  { %1230 = vmatpush.msrb.mxu2 %v5111_v18  ;;  %1022 = vmatpush.msra.mxu1 %v1021_v53  ;;  %v1301_v53 = vsub.f32 %v5188_v13, %v1300_v39 }
  0x7e   :  { %1273 = vmatpush.msrb.mxu3 %v1272_v28  ;;  %917 = vmatpush.msra.mxu0 %v5097_v6  ;;  %v879_v28 = vld [vmem:[#allocation8 + $0xc8] sm:$0xff] }
  0x7f   :  { %1191 = vmatpush.msrb.mxu1 %v4937_v38  ;;  %1232 = vmatpush.msrb.mxu2 %v5128_v37  ;;  %v1296_v38 = vand.u32 4294901760, %v1295_v63  ;;  %v5226_v43 = vand.u32 4294901760, %v879_v28  ;;  %v872_v63 = vld [vmem:[#allocation8 + $0x90] sm:$0xff] }
  0x80   :  { %1279 = vmatpush.msrb.mxu3 %v1278_v16  ;;  %1124 = vmatpush.msrb.mxu0 %v929_v51  ;;  %v877_v51 = vld [vmem:[#allocation8 + $0xb8] sm:$0xff] }
  0x81   :  { %1193 = vmatpush.msrb.mxu1 %v4944_v41  ;;  %1234 = vmatpush.msrb.mxu2 %v5140_v35  ;;  %v1302_v41 = vand.u32 4294901760, %v1301_v53  ;;  %v5320_v53 = vand.u32 4294901760, %v872_v63 }
  0x82   :  { %1285 = vmatpush.msrb.mxu3 %v1284_v50  ;;  %1128 = vmatpush.msrb.mxu0 %v935_v54  ;;  %v5255_v54 = vand.u32 4294901760, %v877_v51 }
  0x83   :  { %1195 = vmatpush.msrb.mxu1 %v4952_v44  ;;  %1236 = vmatpush.msrb.mxu2 %v5153_v24  ;;  %v878_v44 = vld [vmem:[#allocation8 + $0xc0] sm:$0xff] }
  0x84   :  { %1291 = vmatpush.msrb.mxu3 %v1290_v12  ;;  %1132 = vmatpush.msrb.mxu0 %v941_v60  ;;  %v5245_v47 = vand.u32 4294901760, %v878_v44 }
  0x85   :  { %1197 = vmatpush.msrb.mxu1 %v4961_v48  ;;  %1238 = vmatpush.msrb.mxu2 %v5165_v23  ;;  %v5248_v48 = vsub.f32 %v879_v28, %v5226_v43 }
  0x86   :  { %1297 = vmatpush.msrb.mxu3 %v1296_v38  ;;  %1136 = vmatpush.msrb.mxu0 %v947_v1  ;;  %v5258_v55 = vsub.f32 %v878_v44, %v5245_v47  ;;  %v5271_v1 = vsub.f32 %v877_v51, %v5255_v54 }
  0x87   :  { %1199 = vmatpush.msrb.mxu1 %v4964_v49  ;;  %1240 = vmatpush.msrb.mxu2 %v5226_v43  ;;  %v7382_v49 = vand.u32 4294901760, %v5037_v20  ;;  %v1306_v52 = vand.u32 4294901760, %v5248_v48 }
  0x88   :  { %1303 = vmatpush.msrb.mxu3 %v1302_v41  ;;  %1140 = vmatpush.msrb.mxu0 %v953_v4  ;;  %v875_v4 = vld [vmem:[#allocation8 + $0xa8] sm:$0xff]  ;;  %v1318_v10 = vand.u32 4294901760, %v5271_v1 }
  0x89   :  { %1201 = vmatpush.msrb.mxu1 %v4977_v56  ;;  %1242 = vmatpush.msrb.mxu2 %v5245_v47  ;;  %v7383_v56 = vand.u32 4294901760, %v5043_v22  ;;  %v1307_v60 = vsub.f32 %v5248_v48, %v1306_v52  ;;  %v871_v41 = vld [vmem:[#allocation8 + $0x88] sm:$0xff] }
  0x8a   :  { %1144 = vmatpush.msrb.mxu0 %v959_v14  ;;  %v7385_v14 = vand.u32 4294901760, %v5071_v40  ;;  %v7386_v40 = vand.u32 4294901760, %v5083_v57  ;;  %v7387_v57 = vand.u32 4294901760, %v5095_v5  ;;  %v5332_v51 = vand.u32 4294901760, %v871_v41 }
  0x8b   :  { %1203 = vmatpush.msrb.mxu1 %v4989_v61  ;;  %1244 = vmatpush.msrb.mxu2 %v5255_v54  ;;  %v1312_v61 = vand.u32 4294901760, %v5258_v55  ;;  %v1308_v7 = vand.u32 4294901760, %v1307_v60 }
  0x8c   :  { %1148 = vmatpush.msrb.mxu0 %v965_v19  ;;  %v874_v19 = vld [vmem:[#allocation8 + $0xa0] sm:$0xff] }
  0x8d   :  { %1205 = vmatpush.msrb.mxu1 %v4992_v62  ;;  %v5268_v62 = vand.u32 4294901760, %v876_v58  ;;  %1309 = vmatpush.msrb.mxu3 %v1308_v7  ;;  %v5293_v22 = vand.u32 4294901760, %v874_v19 }
  0x8e   :  { %1152 = vmatpush.msrb.mxu0 %v971_v21  ;;  %v1319_v21 = vsub.f32 %v5271_v1, %v1318_v10 }
  0x8f   :  { %1207 = vmatpush.msrb.mxu1 %v5012_v8  ;;  %v1313_v8 = vsub.f32 %v5258_v55, %v1312_v61  ;;  %1246 = vmatpush.msrb.mxu2 %v5268_v62  ;;  %v5307_v45 = vsub.f32 %v874_v19, %v5293_v22 }
  0x90   :  { %1156 = vmatpush.msrb.mxu0 %v7382_v49 }
  0x91   :  { %1209 = vmatpush.msrb.mxu1 %v5019_v11  ;;  %v5281_v11 = vand.u32 4294901760, %v875_v4  ;;  %v1314_v20 = vand.u32 4294901760, %v1313_v8  ;;  %v1336_v12 = vand.u32 4294901760, %v5307_v45  ;;  %v5347_v8 = vsub.f32 %v871_v41, %v5332_v51 }
  0x92   :  { %1160 = vmatpush.msrb.mxu0 %v7383_v56  ;;  %v5335_v56 = vsub.f32 %v872_v63, %v5320_v53 }
  0x93   :  { %1211 = vmatpush.msrb.mxu1 %v5029_v15  ;;  %v5286_v15 = vsub.f32 %v876_v58, %v5268_v62  ;;  %1248 = vmatpush.msrb.mxu2 %v5281_v11  ;;  %v1337_v44 = vsub.f32 %v5307_v45, %v1336_v12  ;;  %v7389_v58 = vand.u32 4294901760, %v5121_v29  ;;  %v1354_v19 = vand.u32 4294901760, %v5347_v8 }
  0x94   :  { %1164 = vmatpush.msrb.mxu0 %v7384_v2  ;;  %1315 = vmatpush.msrb.mxu3 %v1314_v20  ;;  %v870_v2 = vld [vmem:[#allocation8 + $0x80] sm:$0xff] }
  0x95   :  { %1213 = vmatpush.msrb.mxu1 %v5049_v26  ;;  %v5296_v26 = vsub.f32 %v875_v4, %v5281_v11  ;;  %v1324_v27 = vand.u32 4294901760, %v5286_v15  ;;  %1250 = vmatpush.msrb.mxu2 %v5293_v22  ;;  %v1348_v4 = vand.u32 4294901760, %v5335_v56  ;;  %v5344_v7 = vand.u32 4294901760, %v870_v2 }
  0x96   :  { %1168 = vmatpush.msrb.mxu0 %v7385_v14 }
  0x97   :  { %1215 = vmatpush.msrb.mxu1 %v5061_v32  ;;  %v873_v32 = vld [vmem:[#allocation8 + $0x98] sm:$0xff]  ;;  %v1330_v25 = vand.u32 4294901760, %v5296_v26  ;;  %v1325_v50 = vsub.f32 %v5286_v15, %v1324_v27  ;;  %v1349_v29 = vsub.f32 %v5335_v56, %v1348_v4  ;;  %v5355_v20 = vsub.f32 %v870_v2, %v5344_v7 }
  0x98   :  { %1172 = vmatpush.msrb.mxu0 %v7386_v40  ;;  %v5304_v16 = vand.u32 4294901760, %v873_v32 }
  0x99   :  { %1217 = vmatpush.msrb.mxu1 %v5073_v42  ;;  %v1320_v42 = vand.u32 4294901760, %v1319_v21  ;;  %v1326_v28 = vand.u32 4294901760, %v1325_v50  ;;  %v1350_v21 = vand.u32 4294901760, %v1349_v29  ;;  %v1360_v40 = vand.u32 4294901760, %v5355_v20 }
  0x9a   :  { %1176 = vmatpush.msrb.mxu0 %v7387_v57  ;;  %1252 = vmatpush.msrb.mxu2 %v5304_v16  ;;  %v5323_v38 = vsub.f32 %v873_v32, %v5304_v16  ;;  %v1355_v32 = vsub.f32 %v5347_v8, %v1354_v19 }
  0x9b   :  { %1219 = vmatpush.msrb.mxu1 %v5085_v59  ;;  %1321 = vmatpush.msrb.mxu3 %v1320_v42  ;;  %v1331_v59 = vsub.f32 %v5296_v26, %v1330_v25  ;;  %v1361_v50 = vsub.f32 %v5355_v20, %v1360_v40 }
  0x9c   :  { %1254 = vmatpush.msrb.mxu2 %v5320_v53  ;;  %v1342_v49 = vand.u32 4294901760, %v5323_v38  ;;  %v1356_v42 = vand.u32 4294901760, %v1355_v32 }
  0x9d   :  { %1221 = vmatpush.msrb.mxu1 %v5097_v6  ;;  %v7388_v6 = vand.u32 4294901760, %v5109_v17  ;;  %v1332_v5 = vand.u32 4294901760, %v1331_v59  ;;  %1327 = vmatpush.msrb.mxu3 %v1326_v28  ;;  %v1338_v17 = vand.u32 4294901760, %v1337_v44  ;;  %v1362_v63 = vand.u32 4294901760, %v1361_v50 }
  0x9e   :  { %v1343_v60 = vsub.f32 %v5323_v38, %v1342_v49  ;;  %1256 = vmatpush.msrb.mxu2 %v5332_v51 }
  0x9f   :  { %1180 = vmatpush.msrb.mxu0 %v7388_v6  ;;  %1333 = vmatpush.msrb.mxu3 %v1332_v5 }
  0xa0   :  { %v1344_v14 = vand.u32 4294901760, %v1343_v60  ;;  %1258 = vmatpush.msrb.mxu2 %v5344_v7 }
  0xa1   :  { %1184 = vmatpush.msrb.mxu0 %v7389_v58  ;;  %1339 = vmatpush.msrb.mxu3 %v1338_v17 }
  0xa3   :  { %1345 = vmatpush.msrb.mxu3 %v1344_v14 }
  0xa5   :  { %1351 = vmatpush.msrb.mxu3 %v1350_v21 }
  0xa7   :  { %1357 = vmatpush.msrb.mxu3 %v1356_v42 }
  0xa9   :  { %1363 = vmatpush.msrb.mxu3 %v1362_v63 }
  0xb9   :  { %v238_v57 = vpop.f32.mrf.mxu0 }
  0xba   :  { %v269_v59 = vpop.f32.mrf.mxu1  ;;  %v295_v28 = vpop.f32.mrf.mxu2 }
  0xbb   :  { %v270_v41 = vadd.f32 %v269_v59, %v238_v57  ;;  %v320_v6 = vpop.f32.mrf.mxu3  ;;  %v7390_v59 = vand.u32 4294901760, %v5124_v30 }
  0xbd   :  { %v296_v5 = vadd.f32 %v295_v28, %v270_v41 }
  0xbf   :  { %v321_v44 = vadd.f32 %v320_v6, %v296_v5 }
  0xc1   :  { %v347_v58 = vpop.f32.mrf.mxu0 }
  0xc2   :  { %v348_v17 = vadd.f32 %v347_v58, %v321_v44  ;;  %v370_v60 = vpop.f32.mrf.mxu1  ;;  %v397_v2 = vpop.f32.mrf.mxu2  ;;  %v7391_v58 = vand.u32 4294901760, %v5136_v46 }
  0xc3   :  { %v428_v29 = vpop.f32.mrf.mxu3 }
  0xc4   :  { %v5364_v14 = vadd.f32 %v370_v60, %v348_v17  ;;  %v429_v32 = vadd.f32 %v428_v29, %v397_v2 }
  0xc6   :  { %v918_v21 = vand.u32 4294901760, %v5364_v14 }
  0xc8   :  { %v919_v42 = vsub.f32 %v5364_v14, %v918_v21  ;;  %1024 = vmatmul.f32.vlgmr.msra.gmra.mxu1 %v918_v21 }
  0xc9   :  { %1424 = vmatpush.msra.mxu1 %v5099_v9  ;;  %v454_v50 = vpop.f32.mrf.mxu0 }
  0xca   :  { %v455_v63 = vadd.f32 %v454_v50, %v429_v32  ;;  %1078 = vmatmul.f32.vlgmr.msra.gmra.mxu2 %v919_v42  ;;  %v920_v57 = vand.u32 4294901760, %v919_v42  ;;  %v506_v41 = vpop.f32.mrf.mxu2  ;;  %v1583_v50 = vld [vmem:[#allocation10 + $0x78] sm:$0xff] }
  0xcb   :  { %1426 = vmatpush.msra.mxu1 %v5111_v18  ;;  %1465 = vmatpush.msra.mxu2 %v7390_v59  ;;  %v479_v28 = vpop.f32.mrf.mxu1  ;;  %v529_v5 = vpop.f32.mrf.mxu3 }
  0xcc   :  { %v480_v6 = vadd.f32 %v479_v28, %v455_v63  ;;  %1117 = vmatmul.f32.vlgmr.msra.gmra.mxu3 %v920_v57  ;;  %v921_v44 = vsub.f32 %v919_v42, %v920_v57 }
  0xcd   :  { %1428 = vmatpush.msra.mxu1 %v5128_v37  ;;  %1469 = vmatpush.msra.mxu2 %v7391_v58  ;;  %v1577_v58 = vld [vmem:[#allocation10 + $0x48] sm:$0xff] }
  0xce   :  { %1532 = vmatpush.msra.mxu3 %v5099_v9  ;;  %v507_v17 = vadd.f32 %v506_v41, %v480_v6  ;;  %v922_v60 = vand.u32 4294901760, %v921_v44 }
  0xcf   :  { %1430 = vmatpush.msra.mxu1 %v5140_v35  ;;  %1473 = vmatpush.msra.mxu2 %v1282_v33 }
  0xd0   :  { %1534 = vmatpush.msra.mxu3 %v5111_v18  ;;  %v5380_v2 = vadd.f32 %v529_v5, %v507_v17  ;;  %923 = vmatmul.f32.vlgmr.msra.gmra.mxu0 %v922_v60 }
  0xd1   :  { %1223 = vmatmul.f32.vlgmr.msrb.gmra.mxu1 %v918_v21  ;;  %1371 = vmatpush.msra.mxu0 %v5124_v30  ;;  %v560_v29 = vpop.f32.mrf.mxu0 }
  0xd2   :  { %v5384_v32 = vand.u32 4294901760, %v5380_v2  ;;  %1432 = vmatpush.msra.mxu1 %v5153_v24  ;;  %1477 = vmatpush.msra.mxu2 %v1288_v0  ;;  %v1582_v0 = vld [vmem:[#allocation10 + $0x70] sm:$0xff] }
  0xd3   :  { %1536 = vmatpush.msra.mxu3 %v5128_v37  ;;  %1374 = vmatpush.msra.mxu0 %v5136_v46  ;;  %v591_v9 = vpop.f32.mrf.mxu1  ;;  %v617_v18 = vpop.f32.mrf.mxu2  ;;  %v5417_v57 = vand.u32 4294901760, %v1582_v0 }
  0xd4   :  { %v5393_v33 = vsub.f32 %v5380_v2, %v5384_v32  ;;  %1434 = vmatpush.msra.mxu1 %v5165_v23  ;;  %1481 = vmatpush.msra.mxu2 %v1294_v34  ;;  %v592_v30 = vadd.f32 %v591_v9, %v560_v29  ;;  %v642_v42 = vpop.f32.mrf.mxu3  ;;  %v5406_v34 = vand.u32 4294901760, %v1583_v50 }
  0xd5   :  { %1538 = vmatpush.msra.mxu3 %v5140_v35  ;;  %1377 = vmatpush.msra.mxu0 %v5151_v3  ;;  %v5440_v6 = vsub.f32 %v1582_v0, %v5417_v57  ;;  %v1575_v0 = vld [vmem:[#allocation10 + $0x38] sm:$0xff] }
  0xd6   :  { %v1261_v37 = vand.u32 4294901760, %v5393_v33  ;;  %1436 = vmatpush.msra.mxu1 %v5226_v43  ;;  %1485 = vmatpush.msra.mxu2 %v1300_v39  ;;  %v618_v46 = vadd.f32 %v617_v18, %v592_v30  ;;  %v5478_v30 = vand.u32 4294901760, %v1577_v58 }
  0xd7   :  { %1540 = vmatpush.msra.mxu3 %v5153_v24  ;;  %1380 = vmatpush.msra.mxu0 %v5163_v36  ;;  %v1581_v24 = vld [vmem:[#allocation10 + $0x68] sm:$0xff] }
  0xd8   :  { %1438 = vmatpush.msra.mxu1 %v5245_v47  ;;  %1489 = vmatpush.msra.mxu2 %v1306_v52  ;;  %v643_v3 = vadd.f32 %v642_v42, %v618_v46  ;;  %v1262_v35 = vsub.f32 %v5393_v33, %v1261_v37  ;;  %v5429_v41 = vand.u32 4294901760, %v1581_v24 }
  0xd9   :  { %1542 = vmatpush.msra.mxu3 %v5165_v23  ;;  %1186 = vmatmul.f32.vlgmr.msrb.gmra.mxu0 %v918_v21  ;;  %v669_v39 = vpop.f32.mrf.mxu0  ;;  %v5423_v23 = vsub.f32 %v1583_v50, %v5406_v34  ;;  %v1580_v21 = vld [vmem:[#allocation10 + $0x60] sm:$0xff] }
  0xda   :  { %1383 = vmatpush.msra.mxu0 %v5178_v31  ;;  %1440 = vmatpush.msra.mxu1 %v5255_v54  ;;  %v670_v36 = vadd.f32 %v669_v39, %v643_v3  ;;  %v1263_v63 = vand.u32 4294901760, %v1262_v35  ;;  %v5442_v5 = vand.u32 4294901760, %v1580_v21  ;;  %v1574_v39 = vld [vmem:[#allocation10 + $0x30] sm:$0xff] }
  0xdb   :  { %1493 = vmatpush.msra.mxu2 %v1312_v61  ;;  %1544 = vmatpush.msra.mxu3 %v5226_v43  ;;  %v692_v52 = vpop.f32.mrf.mxu1  ;;  %v719_v59 = vpop.f32.mrf.mxu2  ;;  %v1579_v43 = vld [vmem:[#allocation10 + $0x58] sm:$0xff] }
  0xdc   :  { %1386 = vmatpush.msra.mxu0 %v5188_v13  ;;  %1442 = vmatpush.msra.mxu1 %v5268_v62  ;;  %v5427_v31 = vadd.f32 %v692_v52, %v670_v36  ;;  %v750_v28 = vpop.f32.mrf.mxu3 }
  0xdd   :  { %1497 = vmatpush.msra.mxu2 %v1318_v10  ;;  %1546 = vmatpush.msra.mxu3 %v5245_v47  ;;  %v751_v13 = vadd.f32 %v750_v28, %v719_v59  ;;  %v7333_v47 = vand.u32 4294901760, %v5423_v23  ;;  %v5451_v10 = vsub.f32 %v1581_v24, %v5429_v41  ;;  %v5510_v24 = vand.u32 4294901760, %v1575_v0 }
  0xde   :  { %v5436_v61 = vadd.f32 %v5427_v31, %v5364_v14  ;;  %1264 = vmatmul.f32.vlgmr.msrb.gmra.mxu2 %v1263_v63  ;;  %1389 = vmatpush.msra.mxu0 %v5248_v48  ;;  %v5453_v48 = vand.u32 4294901760, %v1579_v43  ;;  %v1578_v14 = vld [vmem:[#allocation10 + $0x50] sm:$0xff]  ;;  %v1573_v63 = vld [vmem:[#allocation10 + $0x28] sm:$0xff] }
  0xdf   :  { %1444 = vmatpush.msra.mxu1 %v5281_v11  ;;  %1501 = vmatpush.msra.mxu2 %v1324_v27  ;;  %v5462_v27 = vsub.f32 %v1580_v21, %v5442_v5  ;;  %v1644_v29 = vsub.f32 %v5423_v23, %v7333_v47  ;;  %v5469_v9 = vand.u32 4294901760, %v1578_v14  ;;  %v7330_v18 = vand.u32 4294901760, %v5451_v10  ;;  %v1572_v21 = vld [vmem:[#allocation10 + $0x20] sm:$0xff] }
  0xe0   :  { %7392 = vst [vmem:[#allocation28_spill] sm:$0xff] %v5436_v61  ;;  %1548 = vmatpush.msra.mxu3 %v5255_v54  ;;  %1392 = vmatpush.msra.mxu0 %v5258_v55  ;;  %v7331_v55 = vand.u32 4294901760, %v5440_v6  ;;  %v1588_v61 = vld [vmem:[#allocation10 + $0xa0] sm:$0xff] }
  0xe1   :  { %1365 = vmatmul.f32.vlgmr.msrb.gmra.mxu3 %v5384_v32  ;;  %1446 = vmatpush.msra.mxu1 %v5293_v22  ;;  %v776_v44 = vpop.f32.mrf.mxu0  ;;  %v7329_v50 = vand.u32 4294901760, %v5462_v27  ;;  %v5494_v3 = vsub.f32 %v1578_v14, %v5469_v9  ;;  %v5554_v14 = vand.u32 4294901760, %v1572_v21 }
  0xe2   :  { %1505 = vmatpush.msra.mxu2 %v1330_v25  ;;  %1550 = vmatpush.msra.mxu3 %v5268_v62  ;;  %v777_v54 = vadd.f32 %v776_v44, %v751_v13  ;;  %v1576_v25 = vld [vmem:[#allocation10 + $0x40] sm:$0xff] }
  0xe3   :  { %1395 = vmatpush.msra.mxu0 %v5271_v1  ;;  %1448 = vmatpush.msra.mxu1 %v5304_v16  ;;  %v801_v17 = vpop.f32.mrf.mxu1  ;;  %v828_v60 = vpop.f32.mrf.mxu2  ;;  %v5476_v1 = vsub.f32 %v1579_v43, %v5453_v48  ;;  %v5489_v46 = vand.u32 4294901760, %v1576_v25  ;;  %v1662_v36 = vsub.f32 %v5462_v27, %v7329_v50  ;;  %v1571_v43 = vld [vmem:[#allocation10 + $0x18] sm:$0xff] }
  0xe4   :  { %1509 = vmatpush.msra.mxu2 %v1336_v12  ;;  %1552 = vmatpush.msra.mxu3 %v5281_v11  ;;  %v802_v62 = vadd.f32 %v801_v17, %v777_v54  ;;  %v851_v42 = vpop.f32.mrf.mxu3  ;;  %v1650_v11 = vsub.f32 %v5440_v6, %v7331_v55  ;;  %v5566_v17 = vand.u32 4294901760, %v1571_v43 }
  0xe5   :  { %1398 = vmatpush.msra.mxu0 %v5286_v15  ;;  %1450 = vmatpush.msra.mxu1 %v5320_v53  ;;  %v1645_v15 = vand.u32 4294901760, %v1644_v29  ;;  %v7327_v35 = vand.u32 4294901760, %v5476_v1 }
  0xe6   :  { %1513 = vmatpush.msra.mxu2 %v1342_v49  ;;  %1554 = vmatpush.msra.mxu3 %v5293_v22  ;;  %v829_v12 = vadd.f32 %v828_v60, %v802_v62  ;;  %v1656_v49 = vsub.f32 %v5451_v10, %v7330_v18  ;;  %v1569_v60 = vld [vmem:[#allocation10 + $0x8] sm:$0xff]  ;;  %v5576_v62 = vsub.f32 %v1572_v21, %v5554_v14  ;;  %v1590_v18 = vld [vmem:[#allocation10 + $0xb0] sm:$0xff] }
  0xe7   :  { %1401 = vmatpush.msra.mxu0 %v5296_v26  ;;  %1452 = vmatpush.msra.mxu1 %v5332_v51  ;;  %v5506_v26 = vsub.f32 %v1577_v58, %v5478_v30  ;;  %v1668_v52 = vsub.f32 %v5476_v1, %v7327_v35 }
  0xe8   :  { %1517 = vmatpush.msra.mxu2 %v1348_v4  ;;  %1556 = vmatpush.msra.mxu3 %v5304_v16  ;;  %v5499_v22 = vadd.f32 %v851_v42, %v829_v12  ;;  %v1651_v4 = vand.u32 4294901760, %v1650_v11  ;;  %v1568_v12 = vld [vmem:[#allocation10] sm:$0xff] }
  0xe9   :  { %1404 = vmatpush.msra.mxu0 %v5307_v45  ;;  %1454 = vmatpush.msra.mxu1 %v5344_v7  ;;  %v5523_v45 = vsub.f32 %v1576_v25, %v5489_v46  ;;  %v7324_v59 = vand.u32 4294901760, %v5506_v26  ;;  %v1669_v44 = vand.u32 4294901760, %v1668_v52 }
  0xea   :  { %1521 = vmatpush.msra.mxu2 %v1354_v19  ;;  %1558 = vmatpush.msra.mxu3 %v5320_v53  ;;  %v5517_v16 = vadd.f32 %v5499_v22, %v5380_v2  ;;  %v7326_v53 = vand.u32 4294901760, %v5494_v3  ;;  %v5529_v19 = vand.u32 4294901760, %v1574_v39  ;;  %v1657_v2 = vand.u32 4294901760, %v1656_v49 }
  0xeb   :  { %1458 = vmatmul.f32.vlgmr.msra.gmra.mxu1 %v1261_v37  ;;  %1407 = vmatpush.msra.mxu0 %v5323_v38  ;;  %v5540_v38 = vsub.f32 %v1575_v0, %v5510_v24  ;;  %v5542_v37 = vand.u32 4294901760, %v1573_v63  ;;  %v7323_v28 = vand.u32 4294901760, %v5523_v45  ;;  %v1680_v58 = vsub.f32 %v5506_v26, %v7324_v59  ;;  %v1592_v59 = vld [vmem:[#allocation10 + $0xc0] sm:$0xff] }
  0xec   :  { %7393 = vst [vmem:[#allocation29_spill] sm:$0xff] %v5517_v16  ;;  %1646 = vmatpush.msrb.mxu1 %v1645_v15  ;;  %1525 = vmatpush.msra.mxu2 %v1360_v40  ;;  %v1663_v40 = vand.u32 4294901760, %v1662_v36  ;;  %v5552_v13 = vsub.f32 %v1574_v39, %v5529_v19  ;;  %v5588_v15 = vsub.f32 %v1571_v43, %v5566_v17  ;;  %v5590_v49 = vand.u32 4294901760, %v1569_v60 }
  0xed   :  { %1560 = vmatpush.msra.mxu3 %v5332_v51  ;;  %1527 = vmatmul.f32.vlgmr.msra.gmra.mxu2 %v5384_v32  ;;  %v1674_v51 = vsub.f32 %v5494_v3, %v7326_v53  ;;  %v5564_v54 = vsub.f32 %v1573_v63, %v5542_v37  ;;  %v7318_v39 = vand.u32 4294901760, %v5576_v62  ;;  %v5602_v36 = vand.u32 4294901760, %v1568_v12 }
  0xee   :  { %1652 = vmatpush.msrb.mxu1 %v1651_v4  ;;  %1744 = vmatpush.msrb.mxu2 %v5423_v23  ;;  %v7321_v25 = vand.u32 4294901760, %v5552_v13  ;;  %v7316_v52 = vand.u32 4294901760, %v5588_v15  ;;  %v5612_v21 = vsub.f32 %v1569_v60, %v5590_v49  ;;  %v5720_v50 = vand.u32 4294901760, %v1592_v59 }
  0xef   :  { %1410 = vmatpush.msra.mxu0 %v5335_v56  ;;  %1562 = vmatpush.msra.mxu3 %v5344_v7  ;;  %v1570_v56 = vld [vmem:[#allocation10 + $0x10] sm:$0xff]  ;;  %v7322_v7 = vand.u32 4294901760, %v5540_v38  ;;  %v1675_v29 = vand.u32 4294901760, %v1674_v51  ;;  %v7320_v0 = vand.u32 4294901760, %v5564_v54  ;;  %v1710_v43 = vsub.f32 %v5576_v62, %v7318_v39 }
  0xf0   :  { %1564 = vmatmul.f32.vlgmr.msra.gmra.mxu3 %v5384_v32  ;;  %1658 = vmatpush.msrb.mxu1 %v1657_v2  ;;  %v1686_v32 = vsub.f32 %v5523_v45, %v7323_v28  ;;  %v5578_v42 = vand.u32 4294901760, %v1570_v56  ;;  %v7317_v60 = vand.u32 4294901760, %v5612_v21  ;;  %v5743_v16 = vand.u32 4294901760, %v1590_v18 }
  0xf1   :  { %1747 = vmatpush.msrb.mxu2 %v5440_v6  ;;  %1797 = vmatpush.msrb.mxu3 %v5406_v34  ;;  %v1692_v11 = vsub.f32 %v5540_v38, %v7322_v7  ;;  %v1704_v2 = vsub.f32 %v5564_v54, %v7320_v0  ;;  %v1594_v0 = vld [vmem:[#allocation10 + $0xd0] sm:$0xff] }
  0xf2   :  { %1413 = vmatpush.msra.mxu0 %v5347_v8  ;;  %1664 = vmatpush.msrb.mxu1 %v1663_v40  ;;  %v1681_v8 = vand.u32 4294901760, %v1680_v58  ;;  %v5600_v4 = vsub.f32 %v1570_v56, %v5578_v42  ;;  %v1599_v58 = vld [vmem:[#allocation10 + $0xf8] sm:$0xff]  ;;  %v5686_v7 = vand.u32 4294901760, %v1594_v0 }
  0xf3   :  { %1750 = vmatpush.msrb.mxu2 %v5451_v10  ;;  %1799 = vmatpush.msrb.mxu3 %v5417_v57  ;;  %v1693_v63 = vand.u32 4294901760, %v1692_v11  ;;  %v1705_v56 = vand.u32 4294901760, %v1704_v2 }
  0xf4   :  { %1416 = vmatpush.msra.mxu0 %v5355_v20  ;;  %1670 = vmatpush.msrb.mxu1 %v1669_v44  ;;  %v1687_v20 = vand.u32 4294901760, %v1686_v32  ;;  %v7315_v51 = vand.u32 4294901760, %v5600_v4  ;;  %v5622_v44 = vsub.f32 %v1568_v12, %v5602_v36  ;;  %v1716_v32 = vsub.f32 %v5588_v15, %v7316_v52  ;;  %v1596_v52 = vld [vmem:[#allocation10 + $0xe0] sm:$0xff] }
  0xf5   :  { %1419 = vmatmul.f32.vlgmr.msra.gmra.mxu0 %v5393_v33  ;;  %1753 = vmatpush.msrb.mxu2 %v5462_v27  ;;  %v1698_v33 = vsub.f32 %v5552_v13, %v7321_v25  ;;  %v1711_v12 = vand.u32 4294901760, %v1710_v43 }
  0xf6   :  { %1601 = vmatpush.msrb.mxu0 %v5406_v34  ;;  %1801 = vmatpush.msrb.mxu3 %v5429_v41  ;;  %7394 = vst [vmem:[#allocation30_spill] sm:$0xff] %v5622_v44  ;;  %v1722_v11 = vsub.f32 %v5600_v4, %v7315_v51  ;;  %v1717_v2 = vand.u32 4294901760, %v1716_v32 }
  0xf7   :  { %1676 = vmatpush.msrb.mxu1 %v1675_v29  ;;  %1756 = vmatpush.msrb.mxu2 %v5476_v1  ;;  %v1699_v40 = vand.u32 4294901760, %v1698_v33  ;;  %v1598_v29 = vld [vmem:[#allocation10 + $0xf0] sm:$0xff]  ;;  %v1597_v33 = vld [vmem:[#allocation10 + $0xe8] sm:$0xff] }
  0xf8   :  { %1603 = vmatpush.msrb.mxu0 %v5417_v57  ;;  %1803 = vmatpush.msrb.mxu3 %v5442_v5  ;;  %v5653_v51 = vand.u32 4294901760, %v1597_v33 }
  0xf9   :  { %1682 = vmatpush.msrb.mxu1 %v1681_v8  ;;  %1759 = vmatpush.msrb.mxu2 %v5494_v3  ;;  %v5633_v8 = vand.u32 4294901760, %v1599_v58 }
  0xfa   :  { %1605 = vmatpush.msrb.mxu0 %v5429_v41  ;;  %1805 = vmatpush.msrb.mxu3 %v5453_v48 }
  0xfb   :  { %1688 = vmatpush.msrb.mxu1 %v1687_v20  ;;  %1762 = vmatpush.msrb.mxu2 %v5506_v26  ;;  %v7319_v20 = vand.u32 4294901760, %v5622_v44  ;;  %v5651_v43 = vsub.f32 %v1599_v58, %v5633_v8  ;;  %v1595_v58 = vld [vmem:[#allocation10 + $0xd8] sm:$0xff] }
  0xfc   :  { %1607 = vmatpush.msrb.mxu0 %v5442_v5  ;;  %1807 = vmatpush.msrb.mxu3 %v5469_v9 }
  0xfd   :  { %1694 = vmatpush.msrb.mxu1 %v1693_v63  ;;  %1765 = vmatpush.msrb.mxu2 %v5523_v45  ;;  %v5642_v63 = vand.u32 4294901760, %v1598_v29  ;;  %v1734_v32 = vsub.f32 %v5622_v44, %v7319_v20  ;;  %v5671_v20 = vsub.f32 %v1597_v33, %v5653_v51 }
  0xfe   :  { %1609 = vmatpush.msrb.mxu0 %v5453_v48  ;;  %1809 = vmatpush.msrb.mxu3 %v5478_v30 }
  0xff   :  { %1700 = vmatpush.msrb.mxu1 %v1699_v40  ;;  %1768 = vmatpush.msrb.mxu2 %v5540_v38  ;;  %v1728_v40 = vsub.f32 %v5612_v21, %v7317_v60  ;;  %v5662_v60 = vsub.f32 %v1598_v29, %v5642_v63  ;;  %v5674_v29 = vand.u32 4294901760, %v5427_v31  ;;  %v7332_v28 = vand.u32 4294901760, %v5671_v20 }
 0x100   :  { %1611 = vmatpush.msrb.mxu0 %v5469_v9  ;;  %1811 = vmatpush.msrb.mxu3 %v5489_v46 }
 0x101   :  { %1706 = vmatpush.msrb.mxu1 %v1705_v56  ;;  %1771 = vmatpush.msrb.mxu2 %v5552_v13  ;;  %v1723_v56 = vand.u32 4294901760, %v1722_v11  ;;  %v1729_v39 = vand.u32 4294901760, %v1728_v40  ;;  %v7325_v11 = vand.u32 4294901760, %v5651_v43  ;;  %v5677_v40 = vand.u32 4294901760, %v1595_v58 }
 0x102   :  { %1613 = vmatpush.msrb.mxu0 %v5478_v30  ;;  %1813 = vmatpush.msrb.mxu3 %v5510_v24  ;;  %v7328_v25 = vand.u32 4294901760, %v5662_v60 }
 0x103   :  { %1712 = vmatpush.msrb.mxu1 %v1711_v12  ;;  %1774 = vmatpush.msrb.mxu2 %v5564_v54  ;;  %v5665_v12 = vand.u32 4294901760, %v1596_v52 }
 0x104   :  { %1615 = vmatpush.msrb.mxu0 %v5489_v46  ;;  %1815 = vmatpush.msrb.mxu3 %v5529_v19 }
 0x105   :  { %1718 = vmatpush.msrb.mxu1 %v1717_v2  ;;  %1777 = vmatpush.msrb.mxu2 %v5576_v62  ;;  %v1735_v2 = vand.u32 4294901760, %v1734_v32  ;;  %v5684_v33 = vsub.f32 %v1596_v52, %v5665_v12  ;;  %v1985_v32 = vsub.f32 %v5651_v43, %v7325_v11  ;;  %v5700_v52 = vsub.f32 %v1595_v58, %v5677_v40 }
 0x106   :  { %1617 = vmatpush.msrb.mxu0 %v5510_v24  ;;  %1817 = vmatpush.msrb.mxu3 %v5542_v37  ;;  %v1991_v11 = vsub.f32 %v5662_v60, %v7328_v25  ;;  %v5713_v58 = vsub.f32 %v1594_v0, %v5686_v7  ;;  %v1997_v25 = vsub.f32 %v5671_v20, %v7332_v28  ;;  %v1589_v0 = vld [vmem:[#allocation10 + $0xa8] sm:$0xff] }
 0x107   :  { %1724 = vmatpush.msrb.mxu1 %v1723_v56  ;;  %1780 = vmatpush.msrb.mxu2 %v5588_v15  ;;  %7395 = vst [vmem:[#allocation31_spill] sm:$0xff] %v5684_v33  ;;  %v1593_v56 = vld [vmem:[#allocation10 + $0xc8] sm:$0xff]  ;;  %v1986_v35 = vand.u32 4294901760, %v1985_v32 }
 0x108   :  { %1619 = vmatpush.msrb.mxu0 %v5529_v19  ;;  %1819 = vmatpush.msrb.mxu3 %v5554_v14  ;;  %7396 = vst [vmem:[#allocation32_spill] sm:$0xff] %v5700_v52  ;;  %v5707_v53 = vand.u32 4294901760, %v1593_v56  ;;  %v1992_v32 = vand.u32 4294901760, %v1991_v11  ;;  %v1998_v11 = vand.u32 4294901760, %v1997_v25  ;;  %v5756_v25 = vand.u32 4294901760, %v1589_v0 }
 0x109   :  { %1730 = vmatpush.msrb.mxu1 %v1729_v39  ;;  %1783 = vmatpush.msrb.mxu2 %v5600_v4  ;;  %v5696_v39 = vsub.f32 %v5427_v31, %v5674_v29  ;;  %v7335_v31 = vand.u32 4294901760, %v5684_v33 }
 0x10a   :  { %1621 = vmatpush.msrb.mxu0 %v5542_v37  ;;  %1821 = vmatpush.msrb.mxu3 %v5566_v17  ;;  %v5729_v55 = vsub.f32 %v1593_v56, %v5707_v53  ;;  %v5741_v56 = vsub.f32 %v1592_v59, %v5720_v50 }
 0x10b   :  { %1736 = vmatpush.msrb.mxu1 %v1735_v2  ;;  %1786 = vmatpush.msrb.mxu2 %v5612_v21  ;;  %v1591_v2 = vld [vmem:[#allocation10 + $0xb8] sm:$0xff] }
 0x10c   :  { %1623 = vmatpush.msrb.mxu0 %v5554_v14  ;;  %1823 = vmatpush.msrb.mxu3 %v5578_v42  ;;  %v5731_v28 = vand.u32 4294901760, %v1591_v2 }
 0x10d   :  { %1905 = vmatpush.msra.mxu1 %v5406_v34  ;;  %1789 = vmatpush.msrb.mxu2 %v5622_v44  ;;  %v1634_v34 = vand.u32 4294901760, %v5696_v39  ;;  %v5769_v44 = vand.u32 4294901760, %v1588_v61 }
 0x10e   :  { %1625 = vmatpush.msrb.mxu0 %v5566_v17  ;;  %1825 = vmatpush.msrb.mxu3 %v5590_v49  ;;  %v5754_v59 = vsub.f32 %v1591_v2, %v5731_v28  ;;  %v5767_v2 = vsub.f32 %v1590_v18, %v5743_v16  ;;  %v1585_v18 = vld [vmem:[#allocation10 + $0x88] sm:$0xff] }
 0x10f   :  { %1907 = vmatpush.msra.mxu1 %v5417_v57  ;;  %1942 = vmatpush.msra.mxu2 %v5633_v8  ;;  %v2003_v57 = vsub.f32 %v5684_v33, %v7335_v31  ;;  %v1635_v47 = vsub.f32 %v5696_v39, %v1634_v34 }
 0x110   :  { %1627 = vmatpush.msrb.mxu0 %v5578_v42  ;;  %1827 = vmatpush.msrb.mxu3 %v5602_v36 }
 0x111   :  { %1909 = vmatpush.msra.mxu1 %v5429_v41  ;;  %1944 = vmatpush.msra.mxu2 %v5642_v63  ;;  %v7397_v41 = vand.u32 4294901760, %v5700_v52  ;;  %v2004_v33 = vand.u32 4294901760, %v2003_v57  ;;  %v1636_v57 = vand.u32 4294901760, %v1635_v47 }
 0x112   :  { %1987 = vmatpush.msra.mxu3 %v1986_v35  ;;  %1629 = vmatpush.msrb.mxu0 %v5590_v49  ;;  %v5781_v35 = vsub.f32 %v1589_v0, %v5756_v25 }
 0x113   :  { %1911 = vmatpush.msra.mxu1 %v5442_v5  ;;  %1946 = vmatpush.msra.mxu2 %v5653_v51  ;;  %v2009_v31 = vsub.f32 %v5700_v52, %v7397_v41  ;;  %v7398_v5 = vand.u32 4294901760, %v5423_v23  ;;  %v7399_v41 = vand.u32 4294901760, %v5713_v58  ;;  %v7400_v23 = vand.u32 4294901760, %v5440_v6 }
 0x114   :  { %1993 = vmatpush.msra.mxu3 %v1992_v32  ;;  %1631 = vmatpush.msrb.mxu0 %v5602_v36  ;;  %v1587_v32 = vld [vmem:[#allocation10 + $0x98] sm:$0xff]  ;;  %v7402_v6 = vand.u32 4294901760, %v5451_v10 }
 0x115   :  { %1913 = vmatpush.msra.mxu1 %v5453_v48  ;;  %v2015_v52 = vsub.f32 %v5713_v58, %v7399_v41  ;;  %1948 = vmatpush.msra.mxu2 %v5665_v12  ;;  %v2010_v48 = vand.u32 4294901760, %v2009_v31 }
 0x116   :  { %1838 = vmatpush.msra.mxu0 %v7398_v5  ;;  %1999 = vmatpush.msra.mxu3 %v1998_v11  ;;  %v1586_v5 = vld [vmem:[#allocation10 + $0x90] sm:$0xff]  ;;  %v7401_v11 = vand.u32 4294901760, %v5729_v55 }
 0x117   :  { %1792 = vmatmul.f32.vlgmr.msrb.gmra.mxu2 %v5696_v39  ;;  %1915 = vmatpush.msra.mxu1 %v5469_v9  ;;  %v5783_v39 = vand.u32 4294901760, %v1587_v32  ;;  %v2016_v47 = vand.u32 4294901760, %v2015_v52  ;;  %v7403_v9 = vand.u32 4294901760, %v5741_v56  ;;  %v5795_v0 = vand.u32 4294901760, %v1586_v5 }
 0x118   :  { %1842 = vmatpush.msra.mxu0 %v7400_v23  ;;  %1950 = vmatpush.msra.mxu2 %v5677_v40  ;;  %v2021_v41 = vsub.f32 %v5729_v55, %v7401_v11  ;;  %v2038_v23 = vand.u32 4294901760, %v5767_v2  ;;  %v5793_v11 = vsub.f32 %v1588_v61, %v5769_v44  ;;  %v2044_v52 = vand.u32 4294901760, %v5781_v35  ;;  %v1584_v61 = vld [vmem:[#allocation10 + $0x80] sm:$0xff] }
 0x119   :  { %2005 = vmatpush.msra.mxu3 %v2004_v33  ;;  %1917 = vmatpush.msra.mxu1 %v5478_v30  ;;  %v2027_v31 = vsub.f32 %v5741_v56, %v7403_v9  ;;  %v7404_v30 = vand.u32 4294901760, %v5754_v59 }
 0x11a   :  { %1846 = vmatpush.msra.mxu0 %v7402_v6  ;;  %1831 = vmatmul.f32.vlgmr.msrb.gmra.mxu3 %v1634_v34  ;;  %v2022_v10 = vand.u32 4294901760, %v2021_v41  ;;  %v5804_v34 = vsub.f32 %v1587_v32, %v5783_v39  ;;  %v7405_v6 = vand.u32 4294901760, %v5462_v27  ;;  %v2039_v41 = vsub.f32 %v5767_v2, %v2038_v23 }
 0x11b   :  { %1952 = vmatpush.msra.mxu2 %v5686_v7  ;;  %2011 = vmatpush.msra.mxu3 %v2010_v48  ;;  %v2033_v33 = vsub.f32 %v5754_v59, %v7404_v30  ;;  %v5809_v48 = vand.u32 4294901760, %v1585_v18  ;;  %v2050_v9 = vand.u32 4294901760, %v5793_v11  ;;  %v5817_v32 = vsub.f32 %v1586_v5, %v5795_v0 }
 0x11c   :  { %1637 = vmatmul.f32.vlgmr.msrb.gmra.mxu0 %v1636_v57  ;;  %1738 = vmatmul.f32.vlgmr.msrb.gmra.mxu1 %v5674_v29  ;;  %v2028_v57 = vand.u32 4294901760, %v2027_v31  ;;  %v5820_v27 = vand.u32 4294901760, %v5499_v22  ;;  %v5825_v30 = vand.u32 4294901760, %v1584_v61  ;;  %v2045_v31 = vsub.f32 %v5781_v35, %v2044_v52 }
 0x11d   :  { %1850 = vmatpush.msra.mxu0 %v7405_v6  ;;  %1919 = vmatpush.msra.mxu1 %v5489_v46  ;;  %v7406_v46 = vand.u32 4294901760, %v5476_v1  ;;  %v2056_v5 = vand.u32 4294901760, %v5804_v34  ;;  %v7407_v6 = vand.u32 4294901760, %v5494_v3  ;;  %v5836_v1 = vsub.f32 %v1585_v18, %v5809_v48 }
 0x11e   :  { %1954 = vmatpush.msra.mxu2 %v5707_v53  ;;  %2017 = vmatpush.msra.mxu3 %v2016_v47  ;;  %v2034_v47 = vand.u32 4294901760, %v2033_v33  ;;  %v2062_v33 = vand.u32 4294901760, %v5817_v32  ;;  %v7408_v3 = vand.u32 4294901760, %v5506_v26  ;;  %v2046_v18 = vand.u32 4294901760, %v2045_v31 }
 0x11f   :  { %1854 = vmatpush.msra.mxu0 %v7406_v46  ;;  %1921 = vmatpush.msra.mxu1 %v5510_v24  ;;  %v2040_v24 = vand.u32 4294901760, %v2039_v41  ;;  %v5845_v46 = vsub.f32 %v5499_v22, %v5820_v27  ;;  %v7409_v41 = vand.u32 4294901760, %v5523_v45  ;;  %v2068_v22 = vand.u32 4294901760, %v5836_v1 }
 0x120   :  { %1956 = vmatpush.msra.mxu2 %v5720_v50  ;;  %2023 = vmatpush.msra.mxu3 %v2022_v10  ;;  %v2051_v10 = vsub.f32 %v5793_v11, %v2050_v9  ;;  %v7411_v31 = vand.u32 4294901760, %v5552_v13 }
 0x121   :  { %1858 = vmatpush.msra.mxu0 %v7407_v6  ;;  %1923 = vmatpush.msra.mxu1 %v5529_v19  ;;  %v5851_v19 = vsub.f32 %v1584_v61, %v5825_v30  ;;  %v1975_v61 = vand.u32 4294901760, %v5845_v46  ;;  %v2069_v6 = vsub.f32 %v5836_v1, %v2068_v22 }
 0x122   :  { %1958 = vmatpush.msra.mxu2 %v5731_v28  ;;  %2029 = vmatpush.msra.mxu3 %v2028_v57  ;;  %v2057_v57 = vsub.f32 %v5804_v34, %v2056_v5  ;;  %v2052_v26 = vand.u32 4294901760, %v2051_v10 }
 0x123   :  { %1862 = vmatpush.msra.mxu0 %v7408_v3  ;;  %1925 = vmatpush.msra.mxu1 %v5542_v37  ;;  %v2063_v37 = vsub.f32 %v5817_v32, %v2062_v33  ;;  %v2074_v45 = vand.u32 4294901760, %v5851_v19  ;;  %v1976_v13 = vsub.f32 %v5845_v46, %v1975_v61 }
 0x124   :  { %1960 = vmatpush.msra.mxu2 %v5743_v16  ;;  %2035 = vmatpush.msra.mxu3 %v2034_v47  ;;  %v7410_v47 = vand.u32 4294901760, %v5540_v38 }
 0x125   :  { %1866 = vmatpush.msra.mxu0 %v7409_v41  ;;  %1927 = vmatpush.msra.mxu1 %v5554_v14  ;;  %v2058_v14 = vand.u32 4294901760, %v2057_v57  ;;  %v2064_v38 = vand.u32 4294901760, %v2063_v37  ;;  %v1977_v10 = vand.u32 4294901760, %v1976_v13  ;;  %v7419_v57 = vand.u32 4294901760, %v5671_v20  ;;  %v2294_v13 = vld [vmem:[#allocation11 + $0x50] sm:$0xff] }
 0x126   :  { %1962 = vmatpush.msra.mxu2 %v5756_v25  ;;  %2041 = vmatpush.msra.mxu3 %v2040_v24  ;;  %v7413_v24 = vand.u32 4294901760, %v5576_v62  ;;  %v7415_v62 = vand.u32 4294901760, %v5651_v43 }
 0x127   :  { %1870 = vmatpush.msra.mxu0 %v7410_v47  ;;  %1929 = vmatpush.msra.mxu1 %v5566_v17  ;;  %v7412_v17 = vand.u32 4294901760, %v5564_v54  ;;  %v2070_v54 = vand.u32 4294901760, %v2069_v6  ;;  %v2298_v47 = vld [vmem:[#allocation11 + $0x70] sm:$0xff]  ;;  %v2295_v6 = vld [vmem:[#allocation11 + $0x58] sm:$0xff] }
 0x128   :  { %1964 = vmatpush.msra.mxu2 %v5769_v44  ;;  %2047 = vmatpush.msra.mxu3 %v2046_v18  ;;  %v7418_v18 = vand.u32 4294901760, %v5612_v21  ;;  %v7424_v21 = vld [vmem:[#allocation32_spill] sm:$0xff] }
 0x129   :  { %1874 = vmatpush.msra.mxu0 %v7411_v31  ;;  %1931 = vmatpush.msra.mxu1 %v5578_v42  ;;  %v2075_v42 = vsub.f32 %v5851_v19, %v2074_v45 }
 0x12a   :  { %1966 = vmatpush.msra.mxu2 %v5783_v39  ;;  %2053 = vmatpush.msra.mxu3 %v2052_v26  ;;  %v7422_v26 = vld [vmem:[#allocation31_spill] sm:$0xff] }
 0x12b   :  { %1878 = vmatpush.msra.mxu0 %v7412_v17  ;;  %1933 = vmatpush.msra.mxu1 %v5590_v49  ;;  %v7414_v49 = vand.u32 4294901760, %v5588_v15  ;;  %v2076_v3 = vand.u32 4294901760, %v2075_v42  ;;  %v7417_v15 = vand.u32 4294901760, %v5662_v60  ;;  %v7423_v37 = vand.u32 4294901760, %v7422_v26  ;;  %v2293_v42 = vld [vmem:[#allocation11 + $0x48] sm:$0xff] }
 0x12c   :  { %1968 = vmatpush.msra.mxu2 %v5795_v0  ;;  %2059 = vmatpush.msra.mxu3 %v2058_v14 }
 0x12d   :  { %1882 = vmatpush.msra.mxu0 %v7413_v24  ;;  %1935 = vmatpush.msra.mxu1 %v5602_v36  ;;  %v7416_v36 = vand.u32 4294901760, %v5600_v4  ;;  %v7420_v4 = vld [vmem:[#allocation30_spill] sm:$0xff]  ;;  %v2292_v24 = vld [vmem:[#allocation11 + $0x40] sm:$0xff] }
 0x12e   :  { %1970 = vmatpush.msra.mxu2 %v5809_v48  ;;  %2065 = vmatpush.msra.mxu3 %v2064_v38  ;;  %v7421_v41 = vand.u32 4294901760, %v7420_v4  ;;  %v2288_v4 = vld [vmem:[#allocation11 + $0x20] sm:$0xff] }
 0x12f   :  { %1937 = vmatmul.f32.vlgmr.msra.gmra.mxu1 %v5674_v29  ;;  %1886 = vmatpush.msra.mxu0 %v7414_v49  ;;  %v2291_v49 = vld [vmem:[#allocation11 + $0x38] sm:$0xff] }
 0x130   :  { %2138 = vmatpush.msrb.mxu1 %v5633_v8  ;;  %1972 = vmatpush.msra.mxu2 %v5825_v30 }
 0x131   :  { %2071 = vmatpush.msra.mxu3 %v2070_v54  ;;  %1978 = vmatmul.f32.vlgmr.msra.gmra.mxu2 %v1977_v10  ;;  %v5994_v54 = vand.u32 4294901760, %v2293_v42 }
 0x132   :  { %2140 = vmatpush.msrb.mxu1 %v5642_v63  ;;  %2179 = vmatpush.msrb.mxu2 %v7415_v62  ;;  %v2290_v62 = vld [vmem:[#allocation11 + $0x30] sm:$0xff] }
 0x133   :  { %1890 = vmatpush.msra.mxu0 %v7416_v36  ;;  %2077 = vmatpush.msra.mxu3 %v2076_v3  ;;  %v6020_v3 = vsub.f32 %v2293_v42, %v5994_v54 }
 0x134   :  { %2079 = vmatmul.f32.vlgmr.msra.gmra.mxu3 %v5820_v27  ;;  %2142 = vmatpush.msrb.mxu1 %v5653_v51 }
 0x135   :  { %2183 = vmatpush.msrb.mxu2 %v7417_v15  ;;  %2246 = vmatpush.msrb.mxu3 %v5633_v8  ;;  %v7425_v8 = vand.u32 4294901760, %v7424_v21  ;;  %v2289_v15 = vld [vmem:[#allocation11 + $0x28] sm:$0xff] }
 0x136   :  { %1894 = vmatpush.msra.mxu0 %v7418_v18  ;;  %2144 = vmatpush.msrb.mxu1 %v5665_v12 }
 0x137   :  { %2187 = vmatpush.msrb.mxu2 %v7419_v57  ;;  %2248 = vmatpush.msrb.mxu3 %v5642_v63  ;;  %v2299_v63 = vld [vmem:[#allocation11 + $0x78] sm:$0xff]  ;;  %v7352_v57 = vand.u32 4294901760, %v6020_v3 }
 0x138   :  { %1898 = vmatpush.msra.mxu0 %v7421_v41  ;;  %2146 = vmatpush.msrb.mxu1 %v5677_v40 }
 0x139   :  { %1900 = vmatmul.f32.vlgmr.msra.gmra.mxu0 %v5674_v29  ;;  %2191 = vmatpush.msrb.mxu2 %v7423_v37  ;;  %v7426_v29 = vand.u32 4294901760, %v5713_v58 }
 0x13a   :  { %2085 = vmatpush.msrb.mxu0 %v5651_v43  ;;  %2250 = vmatpush.msrb.mxu3 %v5653_v51  ;;  %v5931_v51 = vand.u32 4294901760, %v2299_v63  ;;  %v7427_v43 = vand.u32 4294901760, %v5729_v55 }
 0x13b   :  { %2148 = vmatpush.msrb.mxu1 %v5686_v7  ;;  %2195 = vmatpush.msrb.mxu2 %v7425_v8 }
 0x13c   :  { %2088 = vmatpush.msrb.mxu0 %v5662_v60  ;;  %2252 = vmatpush.msrb.mxu3 %v5665_v12  ;;  %v2297_v60 = vld [vmem:[#allocation11 + $0x68] sm:$0xff]  ;;  %v5938_v12 = vand.u32 4294901760, %v2298_v47  ;;  %v5946_v14 = vsub.f32 %v2299_v63, %v5931_v51  ;;  %v2396_v63 = vsub.f32 %v6020_v3, %v7352_v57 }
 0x13d   :  { %2150 = vmatpush.msrb.mxu1 %v5707_v53  ;;  %2199 = vmatpush.msrb.mxu2 %v7426_v29  ;;  %v5948_v31 = vand.u32 4294901760, %v2297_v60 }
 0x13e   :  { %2091 = vmatpush.msrb.mxu0 %v5671_v20  ;;  %2254 = vmatpush.msrb.mxu3 %v5677_v40  ;;  %v7428_v20 = vand.u32 4294901760, %v5741_v56  ;;  %v2296_v40 = vld [vmem:[#allocation11 + $0x60] sm:$0xff]  ;;  %v5956_v38 = vsub.f32 %v2298_v47, %v5938_v12 }
 0x13f   :  { %2152 = vmatpush.msrb.mxu1 %v5720_v50  ;;  %2203 = vmatpush.msrb.mxu2 %v7427_v43  ;;  %v5958_v17 = vand.u32 4294901760, %v2296_v40  ;;  %v2285_v43 = vld [vmem:[#allocation11 + $0x8] sm:$0xff] }
 0x140   :  { %2094 = vmatpush.msrb.mxu0 %v7422_v26  ;;  %2256 = vmatpush.msrb.mxu3 %v5686_v7  ;;  %v7429_v7 = vand.u32 4294901760, %v5754_v59  ;;  %v2287_v26 = vld [vmem:[#allocation11 + $0x18] sm:$0xff] }
 0x141   :  { %2154 = vmatpush.msrb.mxu1 %v5731_v28  ;;  %2207 = vmatpush.msrb.mxu2 %v7428_v20  ;;  %v6076_v47 = vand.u32 4294901760, %v2287_v26 }
 0x142   :  { %2097 = vmatpush.msrb.mxu0 %v7424_v21  ;;  %2258 = vmatpush.msrb.mxu3 %v5707_v53  ;;  %v7360_v53 = vand.u32 4294901760, %v5946_v14  ;;  %v6064_v21 = vand.u32 4294901760, %v2288_v4 }
 0x143   :  { %2156 = vmatpush.msrb.mxu1 %v5743_v16  ;;  %2211 = vmatpush.msrb.mxu2 %v7429_v7 }
 0x144   :  { %2100 = vmatpush.msrb.mxu0 %v5713_v58  ;;  %2260 = vmatpush.msrb.mxu3 %v5720_v50  ;;  %v5967_v58 = vsub.f32 %v2297_v60, %v5948_v31  ;;  %v5969_v50 = vand.u32 4294901760, %v2295_v6 }
 0x145   :  { %2158 = vmatpush.msrb.mxu1 %v5756_v25  ;;  %2215 = vmatpush.msrb.mxu2 %v2038_v23  ;;  %v5983_v23 = vand.u32 4294901760, %v2294_v13 }
 0x146   :  { %2103 = vmatpush.msrb.mxu0 %v5729_v55  ;;  %2262 = vmatpush.msrb.mxu3 %v5731_v28  ;;  %v7358_v55 = vand.u32 4294901760, %v5956_v38  ;;  %v5978_v28 = vsub.f32 %v2296_v40, %v5958_v17  ;;  %v6086_v40 = vsub.f32 %v2288_v4, %v6064_v21 }
 0x147   :  { %2160 = vmatpush.msrb.mxu1 %v5769_v44  ;;  %2219 = vmatpush.msrb.mxu2 %v2044_v52  ;;  %v5992_v52 = vsub.f32 %v2295_v6, %v5969_v50  ;;  %v2284_v6 = vld [vmem:[#allocation11] sm:$0xff] }
 0x148   :  { %2106 = vmatpush.msrb.mxu0 %v5741_v56  ;;  %2264 = vmatpush.msrb.mxu3 %v5743_v16  ;;  %v2360_v16 = vsub.f32 %v5946_v14, %v7360_v53  ;;  %v7357_v56 = vand.u32 4294901760, %v5967_v58 }
 0x149   :  { %2162 = vmatpush.msrb.mxu1 %v5783_v39  ;;  %2223 = vmatpush.msrb.mxu2 %v2050_v9  ;;  %v6005_v9 = vand.u32 4294901760, %v2292_v24  ;;  %v7354_v10 = vand.u32 4294901760, %v5992_v52 }
 0x14a   :  { %2109 = vmatpush.msrb.mxu0 %v5754_v59  ;;  %2266 = vmatpush.msrb.mxu3 %v5756_v25  ;;  %v2366_v59 = vsub.f32 %v5956_v38, %v7358_v55  ;;  %v7355_v25 = vand.u32 4294901760, %v5978_v28 }
 0x14b   :  { %2164 = vmatpush.msrb.mxu1 %v5795_v0  ;;  %2227 = vmatpush.msrb.mxu2 %v2056_v5  ;;  %v6011_v5 = vsub.f32 %v2294_v13, %v5983_v23  ;;  %v6033_v36 = vsub.f32 %v2292_v24, %v6005_v9  ;;  %v2384_v18 = vsub.f32 %v5992_v52, %v7354_v10 }
 0x14c   :  { %2112 = vmatpush.msrb.mxu0 %v5767_v2  ;;  %2268 = vmatpush.msrb.mxu3 %v5769_v44  ;;  %v2361_v44 = vand.u32 4294901760, %v2360_v16  ;;  %v2372_v2 = vsub.f32 %v5967_v58, %v7357_v56  ;;  %v6098_v24 = vsub.f32 %v2287_v26, %v6076_v47  ;;  %v6100_v16 = vand.u32 4294901760, %v2285_v43 }
 0x14d   :  { %2166 = vmatpush.msrb.mxu1 %v5809_v48  ;;  %2231 = vmatpush.msrb.mxu2 %v2062_v33  ;;  %v6025_v33 = vand.u32 4294901760, %v2291_v49  ;;  %v7351_v41 = vand.u32 4294901760, %v6033_v36  ;;  %v2385_v8 = vand.u32 4294901760, %v2384_v18 }
 0x14e   :  { %2115 = vmatpush.msrb.mxu0 %v5781_v35  ;;  %2270 = vmatpush.msrb.mxu3 %v5783_v39  ;;  %v2367_v35 = vand.u32 4294901760, %v2366_v59  ;;  %v2378_v39 = vsub.f32 %v5978_v28, %v7355_v25  ;;  %v7346_v59 = vand.u32 4294901760, %v6086_v40  ;;  %v2306_v25 = vld [vmem:[#allocation11 + $0xb0] sm:$0xff] }
 0x14f   :  { %2168 = vmatpush.msrb.mxu1 %v5825_v30  ;;  %2235 = vmatpush.msrb.mxu2 %v2068_v22  ;;  %v7353_v22 = vand.u32 4294901760, %v6011_v5  ;;  %v6249_v53 = vand.u32 4294901760, %v2306_v25 }
 0x150   :  { %2118 = vmatpush.msrb.mxu0 %v5793_v11  ;;  %2272 = vmatpush.msrb.mxu3 %v5795_v0  ;;  %v6040_v11 = vand.u32 4294901760, %v2290_v62  ;;  %v2373_v0 = vand.u32 4294901760, %v2372_v2 }
 0x151   :  { %2172 = vmatmul.f32.vlgmr.msrb.gmra.mxu1 %v1975_v61  ;;  %2239 = vmatpush.msrb.mxu2 %v2074_v45  ;;  %v6050_v61 = vsub.f32 %v2291_v49, %v6025_v33  ;;  %v6052_v45 = vand.u32 4294901760, %v2289_v15 }
 0x152   :  { %2362 = vmatpush.msra.mxu1 %v2361_v44  ;;  %2121 = vmatpush.msrb.mxu0 %v5804_v34  ;;  %v2379_v34 = vand.u32 4294901760, %v2378_v39  ;;  %v6062_v37 = vsub.f32 %v2290_v62, %v6040_v11  ;;  %v6112_v44 = vand.u32 4294901760, %v2284_v6  ;;  %v6122_v39 = vsub.f32 %v2285_v43, %v6100_v16 }
 0x153   :  { %2274 = vmatpush.msrb.mxu3 %v5809_v48  ;;  %2241 = vmatmul.f32.vlgmr.msrb.gmra.mxu2 %v5820_v27  ;;  %v2390_v48 = vsub.f32 %v6011_v5, %v7353_v22  ;;  %v6074_v29 = vsub.f32 %v2289_v15, %v6052_v45 }
 0x154   :  { %2368 = vmatpush.msra.mxu1 %v2367_v35  ;;  %2460 = vmatpush.msra.mxu2 %v5946_v14  ;;  %v7348_v20 = vand.u32 4294901760, %v6062_v37  ;;  %v7345_v35 = vand.u32 4294901760, %v6098_v24  ;;  %v6132_v4 = vsub.f32 %v2284_v6, %v6112_v44 }
 0x155   :  { %2124 = vmatpush.msrb.mxu0 %v5817_v32  ;;  %2276 = vmatpush.msrb.mxu3 %v5825_v30  ;;  %v2286_v32 = vld [vmem:[#allocation11 + $0x10] sm:$0xff]  ;;  %v7349_v30 = vand.u32 4294901760, %v6050_v61  ;;  %v2391_v60 = vand.u32 4294901760, %v2390_v48  ;;  %v7347_v42 = vand.u32 4294901760, %v6074_v29 }
 0x156   :  { %2278 = vmatmul.f32.vlgmr.msrb.gmra.mxu3 %v5820_v27  ;;  %2374 = vmatpush.msra.mxu1 %v2373_v0  ;;  %v2402_v27 = vsub.f32 %v6033_v36, %v7351_v41  ;;  %v6088_v7 = vand.u32 4294901760, %v2286_v32  ;;  %v2426_v0 = vsub.f32 %v6086_v40, %v7346_v59  ;;  %v2432_v48 = vsub.f32 %v6098_v24, %v7345_v35  ;;  %v2309_v59 = vld [vmem:[#allocation11 + $0xc8] sm:$0xff] }
 0x157   :  { %2463 = vmatpush.msra.mxu2 %v5956_v38  ;;  %2513 = vmatpush.msra.mxu3 %v5931_v51  ;;  %v2408_v13 = vsub.f32 %v6050_v61, %v7349_v30  ;;  %v2420_v62 = vsub.f32 %v6074_v29, %v7347_v42  ;;  %v7342_v43 = vand.u32 4294901760, %v6132_v4  ;;  %v6212_v30 = vand.u32 4294901760, %v2309_v59 }
 0x158   :  { %2127 = vmatpush.msrb.mxu0 %v5836_v1  ;;  %2380 = vmatpush.msra.mxu1 %v2379_v34  ;;  %v2397_v1 = vand.u32 4294901760, %v2396_v63  ;;  %v6110_v49 = vsub.f32 %v2286_v32, %v6088_v7  ;;  %v2315_v34 = vld [vmem:[#allocation11 + $0xf8] sm:$0xff]  ;;  %v2314_v63 = vld [vmem:[#allocation11 + $0xf0] sm:$0xff]  ;;  %v2427_v32 = vand.u32 4294901760, %v2426_v0 }
 0x159   :  { %2466 = vmatpush.msra.mxu2 %v5967_v58  ;;  %2515 = vmatpush.msra.mxu3 %v5938_v12  ;;  %v2409_v2 = vand.u32 4294901760, %v2408_v13  ;;  %v2421_v26 = vand.u32 4294901760, %v2420_v62  ;;  %v6156_v13 = vand.u32 4294901760, %v2314_v63 }
 0x15a   :  { %2130 = vmatpush.msrb.mxu0 %v5851_v19  ;;  %2386 = vmatpush.msra.mxu1 %v2385_v8  ;;  %v2403_v19 = vand.u32 4294901760, %v2402_v27  ;;  %v7344_v18 = vand.u32 4294901760, %v6110_v49  ;;  %v7343_v8 = vand.u32 4294901760, %v6122_v39 }
 0x15b   :  { %2133 = vmatmul.f32.vlgmr.msrb.gmra.mxu0 %v5845_v46  ;;  %2469 = vmatpush.msra.mxu2 %v5978_v28  ;;  %v2414_v46 = vsub.f32 %v6062_v37, %v7348_v20 }
 0x15c   :  { %2317 = vmatpush.msra.mxu0 %v5931_v51  ;;  %2517 = vmatpush.msra.mxu3 %v5948_v31  ;;  %v2438_v27 = vsub.f32 %v6110_v49, %v7344_v18  ;;  %v2444_v6 = vsub.f32 %v6122_v39, %v7343_v8  ;;  %v2310_v8 = vld [vmem:[#allocation11 + $0xd0] sm:$0xff] }
 0x15d   :  { %2392 = vmatpush.msra.mxu1 %v2391_v60  ;;  %2472 = vmatpush.msra.mxu2 %v5992_v52  ;;  %v2415_v15 = vand.u32 4294901760, %v2414_v46  ;;  %v6148_v60 = vand.u32 4294901760, %v2315_v34 }
 0x15e   :  { %2319 = vmatpush.msra.mxu0 %v5938_v12  ;;  %2519 = vmatpush.msra.mxu3 %v5958_v17  ;;  %v2439_v46 = vand.u32 4294901760, %v2438_v27  ;;  %v2445_v27 = vand.u32 4294901760, %v2444_v6 }
 0x15f   :  { %2398 = vmatpush.msra.mxu1 %v2397_v1  ;;  %2475 = vmatpush.msra.mxu2 %v6011_v5  ;;  %v2433_v1 = vand.u32 4294901760, %v2432_v48  ;;  %v6165_v62 = vsub.f32 %v2315_v34, %v6148_v60  ;;  %v7430_v48 = vld [vmem:[#allocation28_spill] sm:$0xff] }
 0x160   :  { %2321 = vmatpush.msra.mxu0 %v5948_v31  ;;  %2521 = vmatpush.msra.mxu3 %v5969_v50 }
 0x161   :  { %2404 = vmatpush.msra.mxu1 %v2403_v19  ;;  %2478 = vmatpush.msra.mxu2 %v6020_v3  ;;  %v2313_v19 = vld [vmem:[#allocation11 + $0xe8] sm:$0xff]  ;;  %v7350_v35 = vand.u32 4294901760, %v6165_v62 }
 0x162   :  { %2323 = vmatpush.msra.mxu0 %v5958_v17  ;;  %2523 = vmatpush.msra.mxu3 %v5983_v23  ;;  %v6169_v0 = vand.u32 4294901760, %v2313_v19 }
 0x163   :  { %2410 = vmatpush.msra.mxu1 %v2409_v2  ;;  %2481 = vmatpush.msra.mxu2 %v6033_v36  ;;  %v2450_v2 = vsub.f32 %v6132_v4, %v7342_v43  ;;  %v6176_v43 = vsub.f32 %v2314_v63, %v6156_v13 }
 0x164   :  { %2325 = vmatpush.msra.mxu0 %v5969_v50  ;;  %2525 = vmatpush.msra.mxu3 %v5994_v54  ;;  %v6189_v63 = vsub.f32 %v2313_v19, %v6169_v0  ;;  %v2701_v19 = vsub.f32 %v6165_v62, %v7350_v35  ;;  %v2307_v35 = vld [vmem:[#allocation11 + $0xb8] sm:$0xff] }
 0x165   :  { %2416 = vmatpush.msra.mxu1 %v2415_v15  ;;  %2484 = vmatpush.msra.mxu2 %v6050_v61  ;;  %v2312_v15 = vld [vmem:[#allocation11 + $0xe0] sm:$0xff]  ;;  %v2451_v18 = vand.u32 4294901760, %v2450_v2  ;;  %v6195_v2 = vand.u32 4294901760, %v2310_v8 }
 0x166   :  { %2327 = vmatpush.msra.mxu0 %v5983_v23  ;;  %2527 = vmatpush.msra.mxu3 %v6005_v9  ;;  %v6180_v34 = vand.u32 4294901760, %v2312_v15  ;;  %v7359_v20 = vand.u32 4294901760, %v6189_v63  ;;  %v2702_v22 = vand.u32 4294901760, %v2701_v19 }
 0x167   :  { %2422 = vmatpush.msra.mxu1 %v2421_v26  ;;  %2487 = vmatpush.msra.mxu2 %v6062_v37  ;;  %v2311_v26 = vld [vmem:[#allocation11 + $0xd8] sm:$0xff] }
 0x168   :  { %2329 = vmatpush.msra.mxu0 %v5994_v54  ;;  %2529 = vmatpush.msra.mxu3 %v6025_v33  ;;  %v6200_v42 = vsub.f32 %v2312_v15, %v6180_v34 }
 0x169   :  { %2428 = vmatpush.msra.mxu1 %v2427_v32  ;;  %2490 = vmatpush.msra.mxu2 %v6074_v29  ;;  %v6172_v32 = vand.u32 4294901760, %v7430_v48 }
 0x16a   :  { %2331 = vmatpush.msra.mxu0 %v6005_v9  ;;  %2531 = vmatpush.msra.mxu3 %v6040_v11  ;;  %v7361_v41 = vand.u32 4294901760, %v6200_v42 }
 0x16b   :  { %2434 = vmatpush.msra.mxu1 %v2433_v1  ;;  %2493 = vmatpush.msra.mxu2 %v6086_v40  ;;  %v6184_v1 = vand.u32 4294901760, %v2311_v26  ;;  %v2349_v6 = vsub.f32 %v7430_v48, %v6172_v32 }
 0x16c   :  { %2333 = vmatpush.msra.mxu0 %v6025_v33  ;;  %2533 = vmatpush.msra.mxu3 %v6052_v45 }
 0x16d   :  { %2440 = vmatpush.msra.mxu1 %v2439_v46  ;;  %2496 = vmatpush.msra.mxu2 %v6098_v24  ;;  %v7356_v46 = vand.u32 4294901760, %v6176_v43  ;;  %v6207_v48 = vsub.f32 %v2311_v26, %v6184_v1  ;;  %v6220_v26 = vsub.f32 %v2310_v8, %v6195_v2  ;;  %v6235_v8 = vsub.f32 %v2309_v59, %v6212_v30 }
 0x16e   :  { %2335 = vmatpush.msra.mxu0 %v6040_v11  ;;  %2535 = vmatpush.msra.mxu3 %v6064_v21 }
 0x16f   :  { %2446 = vmatpush.msra.mxu1 %v2445_v27  ;;  %2499 = vmatpush.msra.mxu2 %v6110_v49  ;;  %7431 = vst [vmem:[#allocation30_spill] sm:$0xff] %v6207_v48  ;;  %v2308_v27 = vld [vmem:[#allocation11 + $0xc0] sm:$0xff]  ;;  %v2707_v15 = vsub.f32 %v6176_v43, %v7356_v46  ;;  %v7362_v10 = vand.u32 4294901760, %v6207_v48  ;;  %v6237_v46 = vand.u32 4294901760, %v2307_v35  ;;  %v7365_v55 = vand.u32 4294901760, %v6220_v26 }
 0x170   :  { %2337 = vmatpush.msra.mxu0 %v6052_v45  ;;  %2537 = vmatpush.msra.mxu3 %v6076_v47  ;;  %7432 = vst [vmem:[#allocation31_spill] sm:$0xff] %v6220_v26  ;;  %v6225_v57 = vand.u32 4294901760, %v2308_v27 }
 0x171   :  { %2452 = vmatpush.msra.mxu1 %v2451_v18  ;;  %2502 = vmatpush.msra.mxu2 %v6122_v39  ;;  %v2350_v18 = vand.u32 4294901760, %v2349_v6  ;;  %v2708_v19 = vand.u32 4294901760, %v2707_v15  ;;  %v2304_v15 = vld [vmem:[#allocation11 + $0xa0] sm:$0xff] }
 0x172   :  { %2339 = vmatpush.msra.mxu0 %v6064_v21  ;;  %2539 = vmatpush.msra.mxu3 %v6088_v7  ;;  %v6247_v59 = vsub.f32 %v2308_v27, %v6225_v57  ;;  %v6259_v27 = vsub.f32 %v2307_v35, %v6237_v46  ;;  %v6271_v35 = vsub.f32 %v2306_v25, %v6249_v53 }
 0x173   :  { %2454 = vmatmul.f32.vlgmr.msra.gmra.mxu1 %v6172_v32  ;;  %2505 = vmatpush.msra.mxu2 %v6132_v4  ;;  %v2351_v56 = vsub.f32 %v2349_v6, %v2350_v18 }
 0x174   :  { %2621 = vmatpush.msrb.mxu1 %v5931_v51  ;;  %2341 = vmatpush.msra.mxu0 %v6076_v47  ;;  %v2713_v51 = vsub.f32 %v6189_v63, %v7359_v20  ;;  %v2719_v20 = vsub.f32 %v6200_v42, %v7361_v41 }
 0x175   :  { %2541 = vmatpush.msra.mxu3 %v6100_v16  ;;  %2508 = vmatmul.f32.vlgmr.msra.gmra.mxu2 %v2349_v6  ;;  %v2725_v6 = vsub.f32 %v6207_v48, %v7362_v10  ;;  %v2731_v10 = vsub.f32 %v6220_v26, %v7365_v55  ;;  %v2303_v48 = vld [vmem:[#allocation11 + $0x98] sm:$0xff]  ;;  %v7433_v55 = vand.u32 4294901760, %v5946_v14  ;;  %v7434_v26 = vand.u32 4294901760, %v6235_v8 }
 0x176   :  { %2623 = vmatpush.msrb.mxu1 %v5938_v12  ;;  %2658 = vmatpush.msrb.mxu2 %v6148_v60  ;;  %v2305_v12 = vld [vmem:[#allocation11 + $0xa8] sm:$0xff]  ;;  %v7435_v14 = vand.u32 4294901760, %v5956_v38  ;;  %v7437_v38 = vand.u32 4294901760, %v5967_v58  ;;  %v7439_v58 = vand.u32 4294901760, %v5978_v28 }
 0x177   :  { %2343 = vmatpush.msra.mxu0 %v6088_v7  ;;  %2543 = vmatpush.msra.mxu3 %v6112_v44  ;;  %v6261_v41 = vand.u32 4294901760, %v2305_v12 }
 0x178   :  { %2547 = vmatmul.f32.vlgmr.msra.gmra.mxu3 %v2350_v18  ;;  %2625 = vmatpush.msrb.mxu1 %v5948_v31  ;;  %v2714_v31 = vand.u32 4294901760, %v2713_v51  ;;  %v6273_v18 = vand.u32 4294901760, %v2304_v15  ;;  %v6285_v51 = vand.u32 4294901760, %v2303_v48 }
 0x179   :  { %2660 = vmatpush.msrb.mxu2 %v6156_v13  ;;  %2703 = vmatpush.msrb.mxu3 %v2702_v22  ;;  %v2352_v22 = vand.u32 4294901760, %v2351_v56  ;;  %v2726_v56 = vand.u32 4294901760, %v2725_v6  ;;  %v6283_v25 = vsub.f32 %v2305_v12, %v6261_v41  ;;  %v2732_v6 = vand.u32 4294901760, %v2731_v10 }
 0x17a   :  { %2345 = vmatpush.msra.mxu0 %v6100_v16  ;;  %2627 = vmatpush.msrb.mxu1 %v5958_v17  ;;  %v2720_v17 = vand.u32 4294901760, %v2719_v20  ;;  %v6296_v12 = vsub.f32 %v2304_v15, %v6273_v18  ;;  %v2301_v20 = vld [vmem:[#allocation11 + $0x88] sm:$0xff]  ;;  %v7438_v10 = vand.u32 4294901760, %v6259_v27  ;;  %v6309_v15 = vsub.f32 %v2303_v48, %v6285_v51 }
 0x17b   :  { %2662 = vmatpush.msrb.mxu2 %v6169_v0  ;;  %2709 = vmatpush.msrb.mxu3 %v2708_v19  ;;  %v2302_v19 = vld [vmem:[#allocation11 + $0x90] sm:$0xff] }
 0x17c   :  { %2347 = vmatpush.msra.mxu0 %v6112_v44  ;;  %2629 = vmatpush.msrb.mxu1 %v5969_v50  ;;  %v2737_v50 = vsub.f32 %v6235_v8, %v7434_v26 }
 0x17d   :  { %2353 = vmatmul.f32.vlgmr.msra.gmra.mxu0 %v2352_v22  ;;  %2664 = vmatpush.msrb.mxu2 %v6180_v34  ;;  %v6298_v22 = vand.u32 4294901760, %v2302_v19 }
 0x17e   :  { %2554 = vmatpush.msrb.mxu0 %v7433_v55  ;;  %2715 = vmatpush.msrb.mxu3 %v2714_v31  ;;  %v7436_v55 = vand.u32 4294901760, %v6247_v59  ;;  %v7368_v31 = vand.u32 4294901760, %v6271_v35 }
 0x17f   :  { %2631 = vmatpush.msrb.mxu1 %v5983_v23  ;;  %2666 = vmatpush.msrb.mxu2 %v6184_v1  ;;  %v2738_v23 = vand.u32 4294901760, %v2737_v50  ;;  %v6322_v48 = vsub.f32 %v2302_v19, %v6298_v22  ;;  %v2772_v19 = vand.u32 4294901760, %v6309_v15 }
 0x180   :  { %2558 = vmatpush.msrb.mxu0 %v7435_v14  ;;  %2721 = vmatpush.msrb.mxu3 %v2720_v17  ;;  %v2743_v26 = vsub.f32 %v6247_v59, %v7436_v55  ;;  %v2749_v17 = vsub.f32 %v6259_v27, %v7438_v10  ;;  %v2760_v14 = vand.u32 4294901760, %v6283_v25  ;;  %v2300_v55 = vld [vmem:[#allocation11 + $0x80] sm:$0xff]  ;;  %v2755_v50 = vsub.f32 %v6271_v35, %v7368_v31 }
 0x181   :  { %2633 = vmatpush.msrb.mxu1 %v5994_v54  ;;  %2668 = vmatpush.msrb.mxu2 %v6195_v2  ;;  %v6313_v54 = vand.u32 4294901760, %v2301_v20  ;;  %v7440_v10 = vld [vmem:[#allocation29_spill] sm:$0xff]  ;;  %v6329_v28 = vand.u32 4294901760, %v2300_v55  ;;  %v7442_v31 = vand.u32 4294901760, %v6011_v5  ;;  %v7443_v5 = vand.u32 4294901760, %v6020_v3 }
 0x182   :  { %2562 = vmatpush.msrb.mxu0 %v7437_v38  ;;  %2727 = vmatpush.msrb.mxu3 %v2726_v56  ;;  %v2744_v56 = vand.u32 4294901760, %v2743_v26  ;;  %v2766_v38 = vand.u32 4294901760, %v6296_v12  ;;  %v2750_v26 = vand.u32 4294901760, %v2749_v17  ;;  %v2778_v17 = vand.u32 4294901760, %v6322_v48 }
 0x183   :  { %2635 = vmatpush.msrb.mxu1 %v6005_v9  ;;  %2670 = vmatpush.msrb.mxu2 %v6212_v30  ;;  %v6325_v9 = vand.u32 4294901760, %v7440_v10 }
 0x184   :  { %2566 = vmatpush.msrb.mxu0 %v7439_v58  ;;  %2733 = vmatpush.msrb.mxu3 %v2732_v6  ;;  %v7441_v6 = vand.u32 4294901760, %v5992_v52  ;;  %v2761_v58 = vsub.f32 %v6283_v25, %v2760_v14  ;;  %v2756_v52 = vand.u32 4294901760, %v2755_v50  ;;  %v2779_v3 = vsub.f32 %v6322_v48, %v2778_v17 }
 0x185   :  { %2637 = vmatpush.msrb.mxu1 %v6025_v33  ;;  %2672 = vmatpush.msrb.mxu2 %v6225_v57  ;;  %v6340_v33 = vsub.f32 %v2301_v20, %v6313_v54 }
 0x186   :  { %2570 = vmatpush.msrb.mxu0 %v7441_v6  ;;  %2739 = vmatpush.msrb.mxu3 %v2738_v23  ;;  %v2767_v23 = vsub.f32 %v6296_v12, %v2766_v38  ;;  %v6350_v6 = vsub.f32 %v7440_v10, %v6325_v9  ;;  %v2762_v20 = vand.u32 4294901760, %v2761_v58  ;;  %v7445_v10 = vand.u32 4294901760, %v6050_v61 }
 0x187   :  { %2639 = vmatpush.msrb.mxu1 %v6040_v11  ;;  %2674 = vmatpush.msrb.mxu2 %v6237_v46  ;;  %v6355_v11 = vsub.f32 %v2300_v55, %v6329_v28  ;;  %v2780_v58 = vand.u32 4294901760, %v2779_v3  ;;  %v3017_v3 = vld [vmem:[#allocation14 + $0x68] sm:$0xff] }
 0x188   :  { %2574 = vmatpush.msrb.mxu0 %v7442_v31  ;;  %2745 = vmatpush.msrb.mxu3 %v2744_v56  ;;  %v2773_v31 = vsub.f32 %v6309_v15, %v2772_v19  ;;  %v7444_v56 = vand.u32 4294901760, %v6033_v36  ;;  %v2768_v55 = vand.u32 4294901760, %v2767_v23  ;;  %v2691_v50 = vand.u32 4294901760, %v6350_v6 }
 0x189   :  { %2641 = vmatpush.msrb.mxu1 %v6052_v45  ;;  %2676 = vmatpush.msrb.mxu2 %v6249_v53  ;;  %v2784_v45 = vand.u32 4294901760, %v6340_v33 }
 0x18a   :  { %2578 = vmatpush.msrb.mxu0 %v7443_v5  ;;  %2751 = vmatpush.msrb.mxu3 %v2750_v26  ;;  %v2774_v36 = vand.u32 4294901760, %v2773_v31  ;;  %v2692_v61 = vsub.f32 %v6350_v6, %v2691_v50  ;;  %v7454_v31 = vand.u32 4294901760, %v6189_v63 }
 0x18b   :  { %2643 = vmatpush.msrb.mxu1 %v6064_v21  ;;  %2678 = vmatpush.msrb.mxu2 %v6261_v41  ;;  %v2790_v21 = vand.u32 4294901760, %v6355_v11  ;;  %v2785_v26 = vsub.f32 %v6340_v33, %v2784_v45 }
 0x18c   :  { %2582 = vmatpush.msrb.mxu0 %v7444_v56  ;;  %2757 = vmatpush.msrb.mxu3 %v2756_v52  ;;  %v7447_v52 = vand.u32 4294901760, %v6074_v29  ;;  %v2693_v23 = vand.u32 4294901760, %v2692_v61  ;;  %v7449_v29 = vand.u32 4294901760, %v6098_v24  ;;  %v7453_v24 = vand.u32 4294901760, %v6122_v39  ;;  %v7457_v39 = vld [vmem:[#allocation30_spill] sm:$0xff] }
 0x18d   :  { %2645 = vmatpush.msrb.mxu1 %v6076_v47  ;;  %2680 = vmatpush.msrb.mxu2 %v6273_v18  ;;  %v7446_v47 = vand.u32 4294901760, %v6062_v37  ;;  %v2786_v37 = vand.u32 4294901760, %v2785_v26  ;;  %v7456_v56 = vand.u32 4294901760, %v6200_v42  ;;  %v6462_v26 = vand.u32 4294901760, %v3017_v3 }
 0x18e   :  { %2586 = vmatpush.msrb.mxu0 %v7445_v10  ;;  %2763 = vmatpush.msrb.mxu3 %v2762_v20  ;;  %v7452_v20 = vand.u32 4294901760, %v6176_v43  ;;  %v7462_v10 = vand.u32 4294901760, %v6247_v59 }
 0x18f   :  { %2647 = vmatpush.msrb.mxu1 %v6088_v7  ;;  %2682 = vmatpush.msrb.mxu2 %v6285_v51  ;;  %v2791_v7 = vsub.f32 %v6355_v11, %v2790_v21 }
 0x190   :  { %2590 = vmatpush.msrb.mxu0 %v7446_v47  ;;  %2769 = vmatpush.msrb.mxu3 %v2768_v55  ;;  %v7459_v55 = vld [vmem:[#allocation31_spill] sm:$0xff]  ;;  %v3015_v47 = vld [vmem:[#allocation14 + $0x58] sm:$0xff] }
 0x191   :  { %2649 = vmatpush.msrb.mxu1 %v6100_v16  ;;  %2684 = vmatpush.msrb.mxu2 %v6298_v22  ;;  %v7448_v16 = vand.u32 4294901760, %v6086_v40  ;;  %v2792_v5 = vand.u32 4294901760, %v2791_v7  ;;  %v7451_v40 = vand.u32 4294901760, %v6110_v49  ;;  %v7455_v49 = vand.u32 4294901760, %v6132_v4  ;;  %v3019_v4 = vld [vmem:[#allocation14 + $0x78] sm:$0xff]  ;;  %v3014_v7 = vld [vmem:[#allocation14 + $0x50] sm:$0xff] }
 0x192   :  { %2594 = vmatpush.msrb.mxu0 %v7447_v52  ;;  %2775 = vmatpush.msrb.mxu3 %v2774_v36  ;;  %v6454_v36 = vpop.f32.mrf.mxu2 }
 0x193   :  { %2651 = vmatpush.msrb.mxu1 %v6112_v44  ;;  %2686 = vmatpush.msrb.mxu2 %v6313_v54  ;;  %v7450_v44 = vand.u32 4294901760, %v6165_v62 }
 0x194   :  { %2598 = vmatpush.msrb.mxu0 %v7448_v16  ;;  %2781 = vmatpush.msrb.mxu3 %v2780_v58  ;;  %v6485_v16 = vsub.f32 %v3017_v3, %v6462_v26 }
 0x195   :  { %2653 = vmatmul.f32.vlgmr.msrb.gmra.mxu1 %v6172_v32  ;;  %2688 = vmatpush.msrb.mxu2 %v6329_v28 }
 0x196   :  { %2854 = vmatpush.msra.mxu1 %v6148_v60  ;;  %2602 = vmatpush.msrb.mxu0 %v7449_v29  ;;  %v6500_v29 = vand.u32 4294901760, %v3014_v7 }
 0x197   :  { %2787 = vmatpush.msrb.mxu3 %v2786_v37  ;;  %2694 = vmatmul.f32.vlgmr.msrb.gmra.mxu2 %v2693_v23  ;;  %v6487_v23 = vand.u32 4294901760, %v3015_v47 }
 0x198   :  { %2856 = vmatpush.msra.mxu1 %v6156_v13  ;;  %2895 = vmatpush.msra.mxu2 %v7450_v44  ;;  %v3012_v44 = vld [vmem:[#allocation14 + $0x40] sm:$0xff] }
 0x199   :  { %2606 = vmatpush.msrb.mxu0 %v7451_v40  ;;  %2793 = vmatpush.msrb.mxu3 %v2792_v5  ;;  %v6489_v5 = vpop.f32.mrf.mxu3  ;;  %v3075_v40 = vand.u32 4294901760, %v6485_v16 }
 0x19a   :  { %2795 = vmatmul.f32.vlgmr.msrb.gmra.mxu3 %v6325_v9  ;;  %2858 = vmatpush.msra.mxu1 %v6169_v0 }
 0x19b   :  { %2899 = vmatpush.msra.mxu2 %v7452_v20  ;;  %2962 = vmatpush.msra.mxu3 %v6148_v60  ;;  %v7458_v60 = vand.u32 4294901760, %v7457_v39  ;;  %v6516_v20 = vsub.f32 %v3015_v47, %v6487_v23 }
 0x19c   :  { %2610 = vmatpush.msrb.mxu0 %v7453_v24  ;;  %2860 = vmatpush.msra.mxu1 %v6180_v34 }
 0x19d   :  { %2903 = vmatpush.msra.mxu2 %v7454_v31  ;;  %2964 = vmatpush.msra.mxu3 %v6156_v13  ;;  %v6431_v13 = vpop.f32.mrf.mxu1  ;;  %v6530_v31 = vsub.f32 %v3014_v7, %v6500_v29 }
 0x19e   :  { %2614 = vmatpush.msrb.mxu0 %v7455_v49  ;;  %2862 = vmatpush.msra.mxu1 %v6184_v1 }
 0x19f   :  { %2616 = vmatmul.f32.vlgmr.msrb.gmra.mxu0 %v6172_v32  ;;  %2907 = vmatpush.msra.mxu2 %v7456_v56  ;;  %v6433_v32 = vpop.f32.mrf.mxu0 }
 0x1a0   :  { %2801 = vmatpush.msra.mxu0 %v6165_v62  ;;  %2966 = vmatpush.msra.mxu3 %v6169_v0  ;;  %v7460_v62 = vand.u32 4294901760, %v7459_v55  ;;  %v3018_v0 = vld [vmem:[#allocation14 + $0x70] sm:$0xff] }
 0x1a1   :  { %2864 = vmatpush.msra.mxu1 %v6195_v2  ;;  %2911 = vmatpush.msra.mxu2 %v7458_v60  ;;  %v6550_v60 = vpop.f32.mrf.mxu3 }
 0x1a2   :  { %2804 = vmatpush.msra.mxu0 %v6176_v43  ;;  %2968 = vmatpush.msra.mxu3 %v6180_v34  ;;  %v7461_v43 = vand.u32 4294901760, %v6235_v8  ;;  %v6443_v34 = vand.u32 4294901760, %v3019_v4 }
 0x1a3   :  { %2866 = vmatpush.msra.mxu1 %v6212_v30  ;;  %2915 = vmatpush.msra.mxu2 %v7460_v62 }
 0x1a4   :  { %2807 = vmatpush.msra.mxu0 %v6189_v63  ;;  %2970 = vmatpush.msra.mxu3 %v6184_v1  ;;  %v6450_v63 = vand.u32 4294901760, %v3018_v0  ;;  %v3016_v1 = vld [vmem:[#allocation14 + $0x60] sm:$0xff] }
 0x1a5   :  { %2868 = vmatpush.msra.mxu1 %v6225_v57  ;;  %2919 = vmatpush.msra.mxu2 %v7461_v43  ;;  %v6472_v61 = vand.u32 4294901760, %v3016_v1  ;;  %v6476_v52 = vpop.f32.mrf.mxu1  ;;  %v3008_v43 = vld [vmem:[#allocation14 + $0x20] sm:$0xff] }
 0x1a6   :  { %2810 = vmatpush.msra.mxu0 %v6200_v42  ;;  %2972 = vmatpush.msra.mxu3 %v6195_v2  ;;  %v7463_v42 = vand.u32 4294901760, %v6259_v27  ;;  %v6460_v2 = vsub.f32 %v3019_v4, %v6443_v34  ;;  %v6470_v58 = vsub.f32 %v3018_v0, %v6450_v63  ;;  %v3093_v0 = vand.u32 4294901760, %v6530_v31 }
 0x1a7   :  { %2870 = vmatpush.msra.mxu1 %v6237_v46  ;;  %2923 = vmatpush.msra.mxu2 %v7462_v10  ;;  %v6478_v37 = vpop.f32.mrf.mxu0  ;;  %v6591_v7 = vand.u32 4294901760, %v3008_v43 }
 0x1a8   :  { %2813 = vmatpush.msra.mxu0 %v7457_v39  ;;  %2974 = vmatpush.msra.mxu3 %v6212_v30  ;;  %v7464_v30 = vand.u32 4294901760, %v6271_v35  ;;  %v3094_v47 = vsub.f32 %v6530_v31, %v3093_v0 }
 0x1a9   :  { %2872 = vmatpush.msra.mxu1 %v6249_v53  ;;  %2927 = vmatpush.msra.mxu2 %v7463_v42 }
 0x1aa   :  { %2816 = vmatpush.msra.mxu0 %v7459_v55  ;;  %2976 = vmatpush.msra.mxu3 %v6225_v57  ;;  %v3063_v57 = vand.u32 4294901760, %v6460_v2  ;;  %v3009_v55 = vld [vmem:[#allocation14 + $0x28] sm:$0xff] }
 0x1ab   :  { %2874 = vmatpush.msra.mxu1 %v6261_v41  ;;  %2931 = vmatpush.msra.mxu2 %v7464_v30 }
 0x1ac   :  { %2819 = vmatpush.msra.mxu0 %v6235_v8  ;;  %2978 = vmatpush.msra.mxu3 %v6237_v46  ;;  %v3013_v8 = vld [vmem:[#allocation14 + $0x48] sm:$0xff]  ;;  %v3069_v46 = vand.u32 4294901760, %v6470_v58 }
 0x1ad   :  { %2876 = vmatpush.msra.mxu1 %v6273_v18  ;;  %2935 = vmatpush.msra.mxu2 %v2760_v14  ;;  %v6498_v14 = vsub.f32 %v3016_v1, %v6472_v61  ;;  %v6537_v49 = vpop.f32.mrf.mxu1  ;;  %v6579_v1 = vand.u32 4294901760, %v3009_v55 }
 0x1ae   :  { %2822 = vmatpush.msra.mxu0 %v6247_v59  ;;  %2980 = vmatpush.msra.mxu3 %v6249_v53  ;;  %v6504_v59 = vand.u32 4294901760, %v3013_v8  ;;  %v6506_v53 = vpop.f32.mrf.mxu2 }
 0x1af   :  { %2878 = vmatpush.msra.mxu1 %v6285_v51  ;;  %2939 = vmatpush.msra.mxu2 %v2766_v38  ;;  %v3064_v38 = vsub.f32 %v6460_v2, %v3063_v57  ;;  %v3081_v24 = vand.u32 4294901760, %v6498_v14 }
 0x1b0   :  { %2825 = vmatpush.msra.mxu0 %v6259_v27  ;;  %2982 = vmatpush.msra.mxu3 %v6261_v41  ;;  %v6520_v41 = vand.u32 4294901760, %v3012_v44  ;;  %v3011_v27 = vld [vmem:[#allocation14 + $0x38] sm:$0xff] }
 0x1b1   :  { %2880 = vmatpush.msra.mxu1 %v6298_v22  ;;  %2943 = vmatpush.msra.mxu2 %v2772_v19  ;;  %v3070_v19 = vsub.f32 %v6470_v58, %v3069_v46  ;;  %v3065_v56 = vand.u32 4294901760, %v3064_v38  ;;  %v6548_v39 = vand.u32 4294901760, %v3011_v27  ;;  %v3082_v62 = vsub.f32 %v6498_v14, %v3081_v24 }
 0x1b2   :  { %2828 = vmatpush.msra.mxu0 %v6271_v35  ;;  %2984 = vmatpush.msra.mxu3 %v6273_v18  ;;  %v6535_v18 = vsub.f32 %v3013_v8, %v6504_v59  ;;  %v3010_v35 = vld [vmem:[#allocation14 + $0x30] sm:$0xff]  ;;  %v6555_v4 = vsub.f32 %v3012_v44, %v6520_v41 }
 0x1b3   :  { %2882 = vmatpush.msra.mxu1 %v6313_v54  ;;  %2947 = vmatpush.msra.mxu2 %v2778_v17  ;;  %v6539_v17 = vpop.f32.mrf.mxu0  ;;  %v6577_v10 = vsub.f32 %v3011_v27, %v6548_v39  ;;  %v3083_v42 = vand.u32 4294901760, %v3082_v62 }
 0x1b4   :  { %2831 = vmatpush.msra.mxu0 %v6283_v25  ;;  %2986 = vmatpush.msra.mxu3 %v6285_v51  ;;  %v3076_v25 = vsub.f32 %v6485_v16, %v3075_v40  ;;  %v3087_v51 = vand.u32 4294901760, %v6516_v20 }
 0x1b5   :  { %2884 = vmatpush.msra.mxu1 %v6329_v28  ;;  %2951 = vmatpush.msra.mxu2 %v2784_v45  ;;  %v3071_v45 = vand.u32 4294901760, %v3070_v19  ;;  %v1739_v44 = vpop.f32.mrf.mxu1  ;;  %v3111_v27 = vand.u32 4294901760, %v6577_v10  ;;  %v6602_v19 = vsub.f32 %v3009_v55, %v6579_v1  ;;  %v6617_v55 = vsub.f32 %v3008_v43, %v6591_v7 }
 0x1b6   :  { %2834 = vmatpush.msra.mxu0 %v6296_v12  ;;  %2988 = vmatpush.msra.mxu3 %v6298_v22  ;;  %v6565_v12 = vand.u32 4294901760, %v3010_v35  ;;  %v3099_v22 = vand.u32 4294901760, %v6535_v18  ;;  %v3088_v3 = vsub.f32 %v6516_v20, %v3087_v51 }
 0x1b7   :  { %2888 = vmatmul.f32.vlgmr.msra.gmra.mxu1 %v2691_v50  ;;  %2955 = vmatpush.msra.mxu2 %v2790_v21  ;;  %v6570_v50 = vpop.f32.mrf.mxu2  ;;  %v3077_v21 = vand.u32 4294901760, %v3076_v25  ;;  %v7372_v43 = vand.u32 4294901760, %v6602_v19 }
 0x1b8   :  { %2837 = vmatpush.msra.mxu0 %v6309_v15  ;;  %2990 = vmatpush.msra.mxu3 %v6313_v54  ;;  %v7369_v15 = vand.u32 4294901760, %v6555_v4  ;;  %v3007_v54 = vld [vmem:[#allocation14 + $0x18] sm:$0xff]  ;;  %v6589_v30 = vsub.f32 %v3010_v35, %v6565_v12  ;;  %v3089_v38 = vand.u32 4294901760, %v3088_v3  ;;  %v3004_v3 = vld [vmem:[#allocation14] sm:$0xff] }
 0x1b9   :  { %3066 = vmatpush.msrb.mxu1 %v3065_v56  ;;  %2957 = vmatmul.f32.vlgmr.msra.gmra.mxu2 %v6325_v9  ;;  %v6604_v35 = vand.u32 4294901760, %v3007_v54  ;;  %v3095_v56 = vand.u32 4294901760, %v3094_v47 }
 0x1ba   :  { %2840 = vmatpush.msra.mxu0 %v6322_v48  ;;  %2992 = vmatpush.msra.mxu3 %v6329_v28  ;;  %v1026_v48 = vadd.f32 %v6431_v13, %v6433_v32  ;;  %v3100_v28 = vsub.f32 %v6535_v18, %v3099_v22  ;;  %v3106_v13 = vsub.f32 %v6555_v4, %v7369_v15  ;;  %v3005_v32 = vld [vmem:[#allocation14 + $0x8] sm:$0xff]  ;;  %v7370_v25 = vand.u32 4294901760, %v6589_v30 }
 0x1bb   :  { %3072 = vmatpush.msrb.mxu1 %v3071_v45  ;;  %2994 = vmatmul.f32.vlgmr.msra.gmra.mxu3 %v6325_v9  ;;  %v3006_v9 = vld [vmem:[#allocation14 + $0x10] sm:$0xff]  ;;  %v1638_v8 = vpop.f32.mrf.mxu0  ;;  %v6629_v47 = vsub.f32 %v3007_v54, %v6604_v35  ;;  %v6631_v15 = vand.u32 4294901760, %v3005_v32  ;;  %v6643_v54 = vand.u32 4294901760, %v3004_v3 }
 0x1bc   :  { %2843 = vmatpush.msra.mxu0 %v6340_v33  ;;  %3164 = vmatpush.msrb.mxu2 %v6460_v2  ;;  %v6607_v33 = vpop.f32.mrf.mxu3  ;;  %v6619_v45 = vand.u32 4294901760, %v3006_v9  ;;  %v1740_v62 = vadd.f32 %v1739_v44, %v1638_v8 }
 0x1bd   :  { %3078 = vmatpush.msrb.mxu1 %v3077_v21  ;;  %3217 = vmatpush.msrb.mxu3 %v6443_v34  ;;  %v3101_v21 = vand.u32 4294901760, %v3100_v28  ;;  %v7371_v28 = vand.u32 4294901760, %v6617_v55 }
 0x1be   :  { %2846 = vmatpush.msra.mxu0 %v6355_v11  ;;  %3167 = vmatpush.msrb.mxu2 %v6470_v58  ;;  %v1080_v11 = vadd.f32 %v6454_v36, %v1026_v48  ;;  %v3107_v36 = vand.u32 4294901760, %v3106_v13  ;;  %v3118_v48 = vsub.f32 %v6589_v30, %v7370_v25  ;;  %v6641_v8 = vsub.f32 %v3006_v9, %v6619_v45 }
 0x1bf   :  { %3084 = vmatpush.msrb.mxu1 %v3083_v42  ;;  %2849 = vmatmul.f32.vlgmr.msra.gmra.mxu0 %v6350_v6  ;;  %v1793_v42 = vpop.f32.mrf.mxu2  ;;  %v3112_v6 = vsub.f32 %v6577_v10, %v3111_v27  ;;  %v3135_v9 = vand.u32 4294901760, %v6629_v47  ;;  %v6654_v25 = vsub.f32 %v3005_v32, %v6631_v15  ;;  %v6665_v32 = vsub.f32 %v3004_v3, %v6643_v54 }
 0x1c0   :  { %3021 = vmatpush.msrb.mxu0 %v6443_v34  ;;  %3170 = vmatpush.msrb.mxu2 %v6485_v16  ;;  %v1119_v44 = vadd.f32 %v6489_v5, %v1080_v11 }
 0x1c1   :  { %3090 = vmatpush.msrb.mxu1 %v3089_v38  ;;  %3219 = vmatpush.msrb.mxu3 %v6450_v63  ;;  %v1794_v38 = vadd.f32 %v1793_v42, %v1740_v62  ;;  %v3113_v13 = vand.u32 4294901760, %v3112_v6  ;;  %v3119_v62 = vand.u32 4294901760, %v3118_v48  ;;  %v3141_v42 = vand.u32 4294901760, %v6641_v8 }
 0x1c2   :  { %3023 = vmatpush.msrb.mxu0 %v6450_v63  ;;  %3173 = vmatpush.msrb.mxu2 %v6498_v14  ;;  %v1188_v5 = vadd.f32 %v6478_v37, %v1119_v44  ;;  %v3136_v48 = vsub.f32 %v6629_v47, %v3135_v9  ;;  %v3147_v44 = vand.u32 4294901760, %v6654_v25 }
 0x1c3   :  { %3096 = vmatpush.msrb.mxu1 %v3095_v56  ;;  %3221 = vmatpush.msrb.mxu3 %v6462_v26  ;;  %v3124_v56 = vsub.f32 %v6602_v19, %v7372_v43  ;;  %v1901_v6 = vpop.f32.mrf.mxu0 }
 0x1c4   :  { %3025 = vmatpush.msrb.mxu0 %v6462_v26  ;;  %3176 = vmatpush.msrb.mxu2 %v6516_v20  ;;  %v1832_v11 = vpop.f32.mrf.mxu3  ;;  %v1225_v3 = vadd.f32 %v6476_v52, %v1188_v5  ;;  %v3148_v5 = vsub.f32 %v6654_v25, %v3147_v44 }
 0x1c5   :  { %3102 = vmatpush.msrb.mxu1 %v3101_v21  ;;  %3223 = vmatpush.msrb.mxu3 %v6472_v61  ;;  %v3130_v21 = vsub.f32 %v6617_v55, %v7371_v28  ;;  %v1833_v37 = vadd.f32 %v1832_v11, %v1794_v38  ;;  %v3142_v38 = vsub.f32 %v6641_v8, %v3141_v42  ;;  %v1938_v11 = vpop.f32.mrf.mxu1 }
 0x1c6   :  { %3027 = vmatpush.msrb.mxu0 %v6472_v61  ;;  %3179 = vmatpush.msrb.mxu2 %v6530_v31  ;;  %v1266_v52 = vadd.f32 %v6506_v53, %v1225_v3  ;;  %v7465_v31 = vand.u32 4294901760, %v6555_v4 }
 0x1c7   :  { %3108 = vmatpush.msrb.mxu1 %v3107_v36  ;;  %3225 = vmatpush.msrb.mxu3 %v6487_v23  ;;  %v3125_v36 = vand.u32 4294901760, %v3124_v56  ;;  %v1902_v28 = vadd.f32 %v1901_v6, %v1833_v37  ;;  %v3131_v43 = vand.u32 4294901760, %v3130_v21  ;;  %v3137_v56 = vand.u32 4294901760, %v3136_v48 }
 0x1c8   :  { %3029 = vmatpush.msrb.mxu0 %v6487_v23  ;;  %3182 = vmatpush.msrb.mxu2 %v6535_v18  ;;  %v3143_v21 = vand.u32 4294901760, %v3142_v38  ;;  %v1367_v6 = vadd.f32 %v6550_v60, %v1266_v52  ;;  %v3149_v37 = vand.u32 4294901760, %v3148_v5 }
 0x1c9   :  { %3114 = vmatpush.msrb.mxu1 %v3113_v13  ;;  %3227 = vmatpush.msrb.mxu3 %v6500_v29  ;;  %v3153_v13 = vand.u32 4294901760, %v6665_v32 }
 0x1ca   :  { %3031 = vmatpush.msrb.mxu0 %v6500_v29  ;;  %3185 = vmatpush.msrb.mxu2 %v6555_v4 }
 0x1cb   :  { %3120 = vmatpush.msrb.mxu1 %v3119_v62  ;;  %3229 = vmatpush.msrb.mxu3 %v6504_v59  ;;  %v1939_v62 = vadd.f32 %v1938_v11, %v1902_v28  ;;  %v3154_v53 = vsub.f32 %v6665_v32, %v3153_v13 }
 0x1cc   :  { %3033 = vmatpush.msrb.mxu0 %v6504_v59  ;;  %3188 = vmatpush.msrb.mxu2 %v6577_v10  ;;  %v2080_v60 = vpop.f32.mrf.mxu3 }
 0x1cd   :  { %3126 = vmatpush.msrb.mxu1 %v3125_v36  ;;  %3231 = vmatpush.msrb.mxu3 %v6520_v41  ;;  %v1979_v36 = vpop.f32.mrf.mxu2  ;;  %v3155_v48 = vand.u32 4294901760, %v3154_v53  ;;  %v3374_v53 = vld [vmem:[#allocation16 + $0x68] sm:$0xff] }
 0x1ce   :  { %3035 = vmatpush.msrb.mxu0 %v6520_v41  ;;  %3191 = vmatpush.msrb.mxu2 %v6589_v30  ;;  %v1980_v28 = vadd.f32 %v1979_v36, %v1939_v62  ;;  %v6739_v36 = vand.u32 4294901760, %v3374_v53 }
 0x1cf   :  { %3132 = vmatpush.msrb.mxu1 %v3131_v43  ;;  %3233 = vmatpush.msrb.mxu3 %v6548_v39  ;;  %v1421_v43 = vadd.f32 %v6539_v17, %v1367_v6  ;;  %v6733_v6 = vld [vmem:[#allocation13] sm:$0xff] }
 0x1d0   :  { %3037 = vmatpush.msrb.mxu0 %v6548_v39  ;;  %3194 = vmatpush.msrb.mxu2 %v6602_v19  ;;  %v2081_v17 = vadd.f32 %v2080_v60, %v1980_v28 }
 0x1d1   :  { %3138 = vmatpush.msrb.mxu1 %v3137_v56  ;;  %3235 = vmatpush.msrb.mxu3 %v6565_v12  ;;  %v1460_v3 = vadd.f32 %v6537_v49, %v1421_v43  ;;  %v2173_v56 = vpop.f32.mrf.mxu1 }
 0x1d2   :  { %3039 = vmatpush.msrb.mxu0 %v6565_v12  ;;  %3197 = vmatpush.msrb.mxu2 %v6617_v55 }
 0x1d3   :  { %3144 = vmatpush.msrb.mxu1 %v3143_v21  ;;  %3237 = vmatpush.msrb.mxu3 %v6579_v1  ;;  %v1529_v49 = vadd.f32 %v6570_v50, %v1460_v3  ;;  %v3375_v21 = vld [vmem:[#allocation16 + $0x70] sm:$0xff]  ;;  %v3372_v3 = vld [vmem:[#allocation16 + $0x58] sm:$0xff] }
 0x1d4   :  { %3041 = vmatpush.msrb.mxu0 %v6579_v1  ;;  %3200 = vmatpush.msrb.mxu2 %v6629_v47  ;;  %v6802_v18 = vand.u32 4294901760, %v3372_v3 }
 0x1d5   :  { %3150 = vmatpush.msrb.mxu1 %v3149_v37  ;;  %3239 = vmatpush.msrb.mxu3 %v6591_v7  ;;  %v6726_v50 = vadd.f32 %v6607_v33, %v1529_v49 }
 0x1d6   :  { %3043 = vmatpush.msrb.mxu0 %v6591_v7  ;;  %3203 = vmatpush.msrb.mxu2 %v6641_v8 }
 0x1d7   :  { %3156 = vmatpush.msrb.mxu1 %v3155_v48  ;;  %3241 = vmatpush.msrb.mxu3 %v6604_v35 }
 0x1d8   :  { %3045 = vmatpush.msrb.mxu0 %v6604_v35  ;;  %v2134_v38 = vpop.f32.mrf.mxu0  ;;  %3206 = vmatpush.msrb.mxu2 %v6654_v25 }
 0x1d9   :  { %3325 = vmatpush.msra.mxu1 %v6443_v34  ;;  %v2135_v52 = vadd.f32 %v2134_v38, %v2081_v17  ;;  %3243 = vmatpush.msrb.mxu3 %v6619_v45  ;;  %v2242_v34 = vpop.f32.mrf.mxu2  ;;  %v7466_v17 = vand.u32 4294901760, %v6589_v30  ;;  %v3370_v38 = vld [vmem:[#allocation16 + $0x48] sm:$0xff]  ;;  %v3369_v30 = vld [vmem:[#allocation16 + $0x40] sm:$0xff] }
 0x1da   :  { %3047 = vmatpush.msrb.mxu0 %v6619_v45  ;;  %3209 = vmatpush.msrb.mxu2 %v6665_v32 }
 0x1db   :  { %3327 = vmatpush.msra.mxu1 %v6450_v63  ;;  %v2174_v5 = vadd.f32 %v2173_v56, %v2135_v52  ;;  %3245 = vmatpush.msrb.mxu3 %v6631_v15  ;;  %v2279_v63 = vpop.f32.mrf.mxu3  ;;  %v6825_v52 = vand.u32 4294901760, %v3370_v38  ;;  %v7467_v56 = vand.u32 4294901760, %v6602_v19  ;;  %v6840_v19 = vand.u32 4294901760, %v3369_v30 }
 0x1dc   :  { %3049 = vmatpush.msrb.mxu0 %v6631_v15 }
 0x1dd   :  { %3329 = vmatpush.msra.mxu1 %v6462_v26  ;;  %v2243_v11 = vadd.f32 %v2242_v34, %v2174_v5  ;;  %3247 = vmatpush.msrb.mxu3 %v6643_v54  ;;  %v3376_v26 = vld [vmem:[#allocation16 + $0x78] sm:$0xff]  ;;  %v6836_v34 = vsub.f32 %v3370_v38, %v6825_v52 }
 0x1de   :  { %3051 = vmatpush.msrb.mxu0 %v6643_v54  ;;  %v6735_v37 = vand.u32 4294901760, %v3376_v26 }
 0x1df   :  { %3331 = vmatpush.msra.mxu1 %v6472_v61  ;;  %v6730_v62 = vadd.f32 %v2279_v63, %v2243_v11  ;;  %v6737_v61 = vand.u32 4294901760, %v3375_v21  ;;  %v7468_v11 = vand.u32 4294901760, %v6617_v55  ;;  %v3368_v63 = vld [vmem:[#allocation16 + $0x38] sm:$0xff]  ;;  %v6854_v55 = vsub.f32 %v3369_v30, %v6840_v19 }
 0x1e0   :  { %3258 = vmatpush.msra.mxu0 %v3063_v57  ;;  %v6747_v2 = vsub.f32 %v3376_v26, %v6735_v37  ;;  %3378 = vmatpush.msra.mxu2 %v6735_v37 }
 0x1e1   :  { %3333 = vmatpush.msra.mxu1 %v6487_v23  ;;  %v2999_v33 = vsub.f32 %v6726_v50, %v6730_v62  ;;  %v6750_v57 = vsub.f32 %v3375_v21, %v6737_v61  ;;  %v6753_v23 = vsub.f32 %v3374_v53, %v6739_v36  ;;  %v3456_v21 = vand.u32 4294901760, %v6836_v34 }
 0x1e2   :  { %3262 = vmatpush.msra.mxu0 %v3069_v46  ;;  %v3420_v58 = vand.u32 4294901760, %v6747_v2  ;;  %3380 = vmatpush.msra.mxu2 %v6737_v61  ;;  %v6848_v53 = vand.u32 4294901760, %v3368_v63  ;;  %v3462_v47 = vand.u32 4294901760, %v6854_v55 }
 0x1e3   :  { %3335 = vmatpush.msra.mxu1 %v6500_v29  ;;  %v6757_v43 = vmul.f32 %v2999_v33, %v6733_v6  ;;  %v3426_v46 = vand.u32 4294901760, %v6750_v57  ;;  %v3432_v29 = vand.u32 4294901760, %v6753_v23  ;;  %v3367_v33 = vld [vmem:[#allocation16 + $0x30] sm:$0xff] }
 0x1e4   :  { %3266 = vmatpush.msra.mxu0 %v3075_v40  ;;  %v3421_v16 = vsub.f32 %v6747_v2, %v3420_v58  ;;  %3382 = vmatpush.msra.mxu2 %v6739_v36  ;;  %v3463_v8 = vsub.f32 %v6854_v55, %v3462_v47 }
 0x1e5   :  { %3337 = vmatpush.msra.mxu1 %v6504_v59  ;;  %v6769_v28 = vand.u32 4294901760, %v6757_v43  ;;  %v3427_v59 = vsub.f32 %v6750_v57, %v3426_v46  ;;  %v3433_v40 = vsub.f32 %v6753_v23, %v3432_v29 }
 0x1e6   :  { %3270 = vmatpush.msra.mxu0 %v3081_v24 }
 0x1e7   :  { %3339 = vmatpush.msra.mxu1 %v6520_v41  ;;  %v3053_v14 = vsub.f32 %v6757_v43, %v6769_v28  ;;  %v3422_v41 = vand.u32 4294901760, %v3421_v16  ;;  %v3428_v24 = vand.u32 4294901760, %v3427_v59  ;;  %v3434_v60 = vand.u32 4294901760, %v3433_v40 }
 0x1e8   :  { %3274 = vmatpush.msra.mxu0 %v3087_v51  ;;  %3158 = vmatmul.f32.vlgmr.msrb.gmra.mxu1 %v6769_v28  ;;  %v3373_v51 = vld [vmem:[#allocation16 + $0x60] sm:$0xff]  ;;  %v3457_v16 = vsub.f32 %v6836_v34, %v3456_v21  ;;  %v6861_v59 = vsub.f32 %v3368_v63, %v6848_v53  ;;  %v6863_v40 = vand.u32 4294901760, %v3367_v33 }
 0x1e9   :  { %3341 = vmatpush.msra.mxu1 %v6548_v39  ;;  %3212 = vmatmul.f32.vlgmr.msrb.gmra.mxu2 %v3053_v14  ;;  %v3054_v48 = vand.u32 4294901760, %v3053_v14  ;;  %v6794_v39 = vand.u32 4294901760, %v3373_v51 }
 0x1ea   :  { %3278 = vmatpush.msra.mxu0 %v3093_v0  ;;  %3423 = vmatpush.msra.mxu3 %v3422_v41  ;;  %v3468_v41 = vand.u32 4294901760, %v6861_v59 }
 0x1eb   :  { %3343 = vmatpush.msra.mxu1 %v6565_v12  ;;  %3251 = vmatmul.f32.vlgmr.msrb.gmra.mxu3 %v3054_v48  ;;  %v3055_v20 = vsub.f32 %v3053_v14, %v3054_v48  ;;  %v6800_v12 = vsub.f32 %v3373_v51, %v6794_v39  ;;  %v3458_v14 = vand.u32 4294901760, %v3457_v16 }
 0x1ec   :  { %3282 = vmatpush.msra.mxu0 %v3099_v22  ;;  %3429 = vmatpush.msra.mxu3 %v3428_v24  ;;  %v3371_v22 = vld [vmem:[#allocation16 + $0x50] sm:$0xff]  ;;  %v6872_v24 = vsub.f32 %v3367_v33, %v6863_v40  ;;  %v3361_v33 = vld [vmem:[#allocation16] sm:$0xff] }
 0x1ed   :  { %3345 = vmatpush.msra.mxu1 %v6579_v1  ;;  %v3056_v0 = vand.u32 4294901760, %v3055_v20  ;;  %3384 = vmatpush.msra.mxu2 %v6794_v39  ;;  %v3438_v4 = vand.u32 4294901760, %v6800_v12  ;;  %v6810_v1 = vsub.f32 %v3372_v3, %v6802_v18 }
 0x1ee   :  { %3286 = vmatpush.msra.mxu0 %v7465_v31  ;;  %3435 = vmatpush.msra.mxu3 %v3434_v60  ;;  %v3469_v60 = vsub.f32 %v6861_v59, %v3468_v41  ;;  %v3474_v20 = vand.u32 4294901760, %v6872_v24  ;;  %v3364_v31 = vld [vmem:[#allocation16 + $0x18] sm:$0xff] }
 0x1ef   :  { %3347 = vmatpush.msra.mxu1 %v6591_v7  ;;  %3057 = vmatmul.f32.vlgmr.msrb.gmra.mxu0 %v3056_v0  ;;  %v6812_v7 = vand.u32 4294901760, %v3371_v22  ;;  %v3439_v10 = vsub.f32 %v6800_v12, %v3438_v4  ;;  %v6905_v32 = vand.u32 4294901760, %v3364_v31 }
 0x1f0   :  { %3290 = vmatpush.msra.mxu0 %v3111_v27  ;;  %3386 = vmatpush.msra.mxu2 %v6802_v18  ;;  %v3444_v27 = vand.u32 4294901760, %v6810_v1  ;;  %v3470_v0 = vand.u32 4294901760, %v3469_v60  ;;  %v3475_v3 = vsub.f32 %v6872_v24, %v3474_v20 }
 0x1f1   :  { %3349 = vmatpush.msra.mxu1 %v6604_v35  ;;  %v6823_v35 = vsub.f32 %v3371_v22, %v6812_v7  ;;  %v6917_v30 = vsub.f32 %v3364_v31, %v6905_v32 }
 0x1f2   :  { %3294 = vmatpush.msra.mxu0 %v7466_v17  ;;  %3388 = vmatpush.msra.mxu2 %v6812_v7  ;;  %v3445_v49 = vsub.f32 %v6810_v1, %v3444_v27 }
 0x1f3   :  { %3351 = vmatpush.msra.mxu1 %v6619_v45  ;;  %v3440_v45 = vand.u32 4294901760, %v3439_v10  ;;  %v3450_v5 = vand.u32 4294901760, %v6823_v35 }
 0x1f4   :  { %3298 = vmatpush.msra.mxu0 %v7467_v56  ;;  %3390 = vmatpush.msra.mxu2 %v6825_v52 }
 0x1f5   :  { %3353 = vmatpush.msra.mxu1 %v6631_v15  ;;  %3441 = vmatpush.msra.mxu3 %v3440_v45  ;;  %v3446_v15 = vand.u32 4294901760, %v3445_v49  ;;  %v3451_v26 = vsub.f32 %v6823_v35, %v3450_v5  ;;  %v3362_v45 = vld [vmem:[#allocation16 + $0x8] sm:$0xff] }
 0x1f6   :  { %3302 = vmatpush.msra.mxu0 %v7468_v11  ;;  %3392 = vmatpush.msra.mxu2 %v6840_v19 }
 0x1f7   :  { %3355 = vmatpush.msra.mxu1 %v6643_v54  ;;  %3447 = vmatpush.msra.mxu3 %v3446_v15  ;;  %v3452_v54 = vand.u32 4294901760, %v3451_v26  ;;  %v6926_v15 = vand.u32 4294901760, %v3362_v45  ;;  %v3492_v26 = vand.u32 4294901760, %v6917_v30 }
 0x1f8   :  { %3357 = vmatmul.f32.vlgmr.msra.gmra.mxu1 %v6769_v28  ;;  %3306 = vmatpush.msra.mxu0 %v3135_v9  ;;  %v3366_v9 = vld [vmem:[#allocation16 + $0x28] sm:$0xff] }
 0x1f9   :  { %3574 = vmatpush.msrb.mxu1 %v6735_v37  ;;  %3453 = vmatpush.msra.mxu3 %v3452_v54  ;;  %v6874_v48 = vand.u32 4294901760, %v3366_v9  ;;  %v3734_v54 = vld [vmem:[#allocation17 + $0x78] sm:$0xff] }
 0x1fa   :  { %3310 = vmatpush.msra.mxu0 %v3141_v42  ;;  %v3365_v42 = vld [vmem:[#allocation16 + $0x20] sm:$0xff]  ;;  %3394 = vmatpush.msra.mxu2 %v6848_v53  ;;  %v6943_v60 = vand.u32 4294901760, %v3734_v54 }
 0x1fb   :  { %3576 = vmatpush.msrb.mxu1 %v6737_v61  ;;  %3459 = vmatpush.msra.mxu3 %v3458_v14  ;;  %v6888_v51 = vsub.f32 %v3366_v9, %v6874_v48  ;;  %v6890_v25 = vand.u32 4294901760, %v3365_v42  ;;  %v6934_v14 = vsub.f32 %v3362_v45, %v6926_v15 }
 0x1fc   :  { %3314 = vmatpush.msra.mxu0 %v3147_v44  ;;  %v3464_v44 = vand.u32 4294901760, %v3463_v8  ;;  %3396 = vmatpush.msra.mxu2 %v6863_v40  ;;  %v6936_v8 = vand.u32 4294901760, %v3361_v33 }
 0x1fd   :  { %3578 = vmatpush.msrb.mxu1 %v6739_v36  ;;  %v3480_v22 = vand.u32 4294901760, %v6888_v51  ;;  %v6902_v17 = vsub.f32 %v3365_v42, %v6890_v25  ;;  %v3493_v42 = vsub.f32 %v6917_v30, %v3492_v26  ;;  %v7376_v31 = vand.u32 4294901760, %v6934_v14 }
 0x1fe   :  { %3318 = vmatpush.msra.mxu0 %v3153_v13  ;;  %3465 = vmatpush.msra.mxu3 %v3464_v44  ;;  %v3363_v13 = vld [vmem:[#allocation16 + $0x10] sm:$0xff] }
 0x1ff   :  { %3320 = vmatmul.f32.vlgmr.msra.gmra.mxu0 %v6769_v28  ;;  %3580 = vmatpush.msrb.mxu1 %v6794_v39  ;;  %v3476_v28 = vand.u32 4294901760, %v3475_v3  ;;  %v3481_v38 = vsub.f32 %v6888_v51, %v3480_v22  ;;  %v3486_v10 = vand.u32 4294901760, %v6902_v17  ;;  %v6912_v56 = vand.u32 4294901760, %v3363_v13  ;;  %v3733_v3 = vld [vmem:[#allocation17 + $0x70] sm:$0xff] }
 0x200   :  { %3521 = vmatpush.msrb.mxu0 %v6747_v2  ;;  %3398 = vmatpush.msra.mxu2 %v6874_v48  ;;  %v3505_v45 = vsub.f32 %v6934_v14, %v7376_v31 }
 0x201   :  { %3582 = vmatpush.msrb.mxu1 %v6802_v18  ;;  %3471 = vmatpush.msra.mxu3 %v3470_v0  ;;  %v3482_v49 = vand.u32 4294901760, %v3481_v38  ;;  %v3487_v11 = vsub.f32 %v6902_v17, %v3486_v10  ;;  %v6924_v63 = vsub.f32 %v3363_v13, %v6912_v56  ;;  %v6951_v0 = vsub.f32 %v3361_v33, %v6936_v8 }
 0x202   :  { %3524 = vmatpush.msrb.mxu0 %v6750_v57  ;;  %3400 = vmatpush.msra.mxu2 %v6890_v25  ;;  %v3494_v13 = vand.u32 4294901760, %v3493_v42  ;;  %v3506_v33 = vand.u32 4294901760, %v3505_v45  ;;  %v3730_v57 = vld [vmem:[#allocation17 + $0x58] sm:$0xff] }
 0x203   :  { %3584 = vmatpush.msrb.mxu1 %v6812_v7  ;;  %3477 = vmatpush.msra.mxu3 %v3476_v28  ;;  %v3488_v16 = vand.u32 4294901760, %v3487_v11  ;;  %v3498_v9 = vand.u32 4294901760, %v6924_v63  ;;  %v6956_v28 = vsub.f32 %v3734_v54, %v6943_v60  ;;  %v6965_v11 = vand.u32 4294901760, %v3733_v3 }
 0x204   :  { %3527 = vmatpush.msrb.mxu0 %v6753_v23  ;;  %3402 = vmatpush.msra.mxu2 %v6905_v32  ;;  %v3728_v23 = vld [vmem:[#allocation17 + $0x48] sm:$0xff] }
 0x205   :  { %3586 = vmatpush.msrb.mxu1 %v6825_v52  ;;  %3483 = vmatpush.msra.mxu3 %v3482_v49  ;;  %v3499_v44 = vsub.f32 %v6924_v63, %v3498_v9  ;;  %v7375_v49 = vand.u32 4294901760, %v6951_v0  ;;  %v6981_v45 = vsub.f32 %v3733_v3, %v6965_v11 }
 0x206   :  { %3530 = vmatpush.msrb.mxu0 %v6800_v12  ;;  %3404 = vmatpush.msra.mxu2 %v6912_v56 }
 0x207   :  { %3588 = vmatpush.msrb.mxu1 %v6840_v19  ;;  %3489 = vmatpush.msra.mxu3 %v3488_v16  ;;  %v3500_v38 = vand.u32 4294901760, %v3499_v44  ;;  %v3511_v54 = vsub.f32 %v6951_v0, %v7375_v49  ;;  %v7373_v16 = vand.u32 4294901760, %v6956_v28  ;;  %v3732_v44 = vld [vmem:[#allocation17 + $0x68] sm:$0xff] }
 0x208   :  { %3533 = vmatpush.msrb.mxu0 %v6810_v1  ;;  %3406 = vmatpush.msra.mxu2 %v6926_v15 }
 0x209   :  { %3590 = vmatpush.msrb.mxu1 %v6848_v53  ;;  %3495 = vmatpush.msra.mxu3 %v3494_v13  ;;  %v3512_v42 = vand.u32 4294901760, %v3511_v54  ;;  %v6978_v13 = vand.u32 4294901760, %v3732_v44  ;;  %v3779_v2 = vsub.f32 %v6956_v28, %v7373_v16 }
 0x20a   :  { %3536 = vmatpush.msrb.mxu0 %v6823_v35  ;;  %3408 = vmatpush.msra.mxu2 %v6936_v8  ;;  %v3725_v35 = vld [vmem:[#allocation17 + $0x30] sm:$0xff] }
 0x20b   :  { %3592 = vmatpush.msrb.mxu1 %v6863_v40  ;;  %3501 = vmatpush.msra.mxu3 %v3500_v38  ;;  %v3731_v38 = vld [vmem:[#allocation17 + $0x60] sm:$0xff]  ;;  %v6994_v3 = vsub.f32 %v3732_v44, %v6978_v13  ;;  %v3780_v44 = vand.u32 4294901760, %v3779_v2  ;;  %v7030_v2 = vand.u32 4294901760, %v3728_v23 }
 0x20c   :  { %3539 = vmatpush.msrb.mxu0 %v6836_v34  ;;  %3615 = vmatpush.msrb.mxu2 %v3420_v58  ;;  %v7374_v58 = vand.u32 4294901760, %v6981_v45  ;;  %v3724_v34 = vld [vmem:[#allocation17 + $0x28] sm:$0xff] }
 0x20d   :  { %3594 = vmatpush.msrb.mxu1 %v6874_v48  ;;  %3507 = vmatpush.msra.mxu3 %v3506_v33  ;;  %v6991_v33 = vand.u32 4294901760, %v3731_v38  ;;  %v3790_v54 = vand.u32 4294901760, %v6994_v3 }
 0x20e   :  { %3542 = vmatpush.msrb.mxu0 %v6854_v55  ;;  %3619 = vmatpush.msrb.mxu2 %v3426_v46  ;;  %v3785_v46 = vsub.f32 %v6981_v45, %v7374_v58 }
 0x20f   :  { %3596 = vmatpush.msrb.mxu1 %v6890_v25  ;;  %3513 = vmatpush.msra.mxu3 %v3512_v42  ;;  %v7003_v42 = vand.u32 4294901760, %v3730_v57  ;;  %v7006_v16 = vsub.f32 %v3731_v38, %v6991_v33  ;;  %v3791_v58 = vsub.f32 %v6994_v3, %v3790_v54 }
 0x210   :  { %3545 = vmatpush.msrb.mxu0 %v6861_v59  ;;  %3623 = vmatpush.msrb.mxu2 %v3432_v29  ;;  %v3786_v29 = vand.u32 4294901760, %v3785_v46 }
 0x211   :  { %3598 = vmatpush.msrb.mxu1 %v6905_v32  ;;  %3682 = vmatpush.msrb.mxu3 %v6735_v37  ;;  %v3729_v37 = vld [vmem:[#allocation17 + $0x50] sm:$0xff]  ;;  %v7377_v49 = vand.u32 4294901760, %v7006_v16 }
 0x212   :  { %3548 = vmatpush.msrb.mxu0 %v6872_v24  ;;  %v7017_v31 = vand.u32 4294901760, %v3729_v37  ;;  %3627 = vmatpush.msrb.mxu2 %v3438_v4  ;;  %v3727_v4 = vld [vmem:[#allocation17 + $0x40] sm:$0xff] }
 0x213   :  { %3600 = vmatpush.msrb.mxu1 %v6912_v56  ;;  %3684 = vmatpush.msrb.mxu3 %v6737_v61  ;;  %v7024_v61 = vsub.f32 %v3730_v57, %v7003_v42  ;;  %v3797_v38 = vsub.f32 %v7006_v16, %v7377_v49  ;;  %v3792_v57 = vand.u32 4294901760, %v3791_v58  ;;  %v7042_v49 = vand.u32 4294901760, %v3727_v4 }
 0x214   :  { %3551 = vmatpush.msrb.mxu0 %v6888_v51  ;;  %v7033_v12 = vsub.f32 %v3729_v37, %v7017_v31  ;;  %3631 = vmatpush.msrb.mxu2 %v3444_v27  ;;  %v7045_v37 = vsub.f32 %v3728_v23, %v7030_v2  ;;  %v3726_v27 = vld [vmem:[#allocation17 + $0x38] sm:$0xff] }
 0x215   :  { %3602 = vmatpush.msrb.mxu1 %v6926_v15  ;;  %3686 = vmatpush.msrb.mxu3 %v6739_v36  ;;  %v3802_v36 = vand.u32 4294901760, %v7024_v61  ;;  %v3798_v1 = vand.u32 4294901760, %v3797_v38  ;;  %v7058_v23 = vand.u32 4294901760, %v3726_v27 }
 0x216   :  { %3554 = vmatpush.msrb.mxu0 %v6902_v17  ;;  %v7378_v46 = vand.u32 4294901760, %v7033_v12  ;;  %3635 = vmatpush.msrb.mxu2 %v3450_v5 }
 0x217   :  { %3604 = vmatpush.msrb.mxu1 %v6936_v8  ;;  %3688 = vmatpush.msrb.mxu3 %v6794_v39  ;;  %v3803_v39 = vsub.f32 %v7024_v61, %v3802_v36 }
 0x218   :  { %3557 = vmatpush.msrb.mxu0 %v6917_v30  ;;  %v3809_v58 = vsub.f32 %v7033_v12, %v7378_v46  ;;  %3639 = vmatpush.msrb.mxu2 %v3456_v21  ;;  %v7071_v46 = vand.u32 4294901760, %v3725_v35 }
 0x219   :  { %3781 = vmatpush.msra.mxu1 %v3780_v44  ;;  %3690 = vmatpush.msrb.mxu3 %v6802_v18  ;;  %v3814_v44 = vand.u32 4294901760, %v7045_v37  ;;  %v7061_v18 = vsub.f32 %v3727_v4, %v7042_v49  ;;  %v3804_v5 = vand.u32 4294901760, %v3803_v39 }
 0x21a   :  { %3560 = vmatpush.msrb.mxu0 %v6924_v63  ;;  %3643 = vmatpush.msrb.mxu2 %v3462_v47  ;;  %v3810_v21 = vand.u32 4294901760, %v3809_v58  ;;  %v7089_v55 = vsub.f32 %v3725_v35, %v7071_v46  ;;  %v3723_v47 = vld [vmem:[#allocation17 + $0x20] sm:$0xff]  ;;  %v3722_v35 = vld [vmem:[#allocation17 + $0x18] sm:$0xff]  ;;  %v2548_v63 = vpop.f32.mrf.mxu3 }
 0x21b   :  { %3787 = vmatpush.msra.mxu1 %v3786_v29  ;;  %3692 = vmatpush.msrb.mxu3 %v6812_v7  ;;  %v3815_v29 = vsub.f32 %v7045_v37, %v3814_v44  ;;  %v3820_v38 = vand.u32 4294901760, %v7061_v18  ;;  %v7075_v7 = vsub.f32 %v3726_v27, %v7058_v23 }
 0x21c   :  { %3563 = vmatpush.msrb.mxu0 %v6934_v14  ;;  %3647 = vmatpush.msrb.mxu2 %v3468_v41  ;;  %v7380_v58 = vand.u32 4294901760, %v7089_v55 }
 0x21d   :  { %3793 = vmatpush.msra.mxu1 %v3792_v57  ;;  %3694 = vmatpush.msrb.mxu3 %v6825_v52  ;;  %v3821_v4 = vsub.f32 %v7061_v18, %v3820_v38  ;;  %v7083_v57 = vand.u32 4294901760, %v3724_v34  ;;  %v7379_v52 = vand.u32 4294901760, %v7075_v7  ;;  %v3816_v39 = vand.u32 4294901760, %v3815_v29 }
 0x21e   :  { %3566 = vmatpush.msrb.mxu0 %v6951_v0  ;;  %3651 = vmatpush.msrb.mxu2 %v3474_v20  ;;  %v7107_v29 = vand.u32 4294901760, %v3722_v35 }
 0x21f   :  { %3799 = vmatpush.msra.mxu1 %v3798_v1  ;;  %3696 = vmatpush.msrb.mxu3 %v6840_v19  ;;  %v7093_v1 = vand.u32 4294901760, %v3723_v47  ;;  %v7096_v27 = vsub.f32 %v3724_v34, %v7083_v57  ;;  %v3827_v19 = vsub.f32 %v7075_v7, %v7379_v52  ;;  %v3822_v59 = vand.u32 4294901760, %v3821_v4  ;;  %v2455_v4 = vpop.f32.mrf.mxu1 }
 0x220   :  { %3736 = vmatpush.msra.mxu0 %v6943_v60  ;;  %3655 = vmatpush.msrb.mxu2 %v3480_v22 }
 0x221   :  { %3805 = vmatpush.msra.mxu1 %v3804_v5  ;;  %3698 = vmatpush.msrb.mxu3 %v6848_v53  ;;  %v2354_v5 = vpop.f32.mrf.mxu0  ;;  %v7381_v41 = vand.u32 4294901760, %v7096_v27  ;;  %v7110_v34 = vsub.f32 %v3723_v47, %v7093_v1  ;;  %v3833_v53 = vsub.f32 %v7089_v55, %v7380_v58  ;;  %v3828_v52 = vand.u32 4294901760, %v3827_v19 }
 0x222   :  { %3738 = vmatpush.msra.mxu0 %v6965_v11  ;;  %v7128_v58 = vsub.f32 %v3722_v35, %v7107_v29  ;;  %3659 = vmatpush.msrb.mxu2 %v3486_v10  ;;  %v3719_v35 = vld [vmem:[#allocation17] sm:$0xff] }
 0x223   :  { %3811 = vmatpush.msra.mxu1 %v3810_v21  ;;  %3700 = vmatpush.msrb.mxu3 %v6863_v40  ;;  %v3721_v21 = vld [vmem:[#allocation17 + $0x10] sm:$0xff]  ;;  %v3839_v24 = vsub.f32 %v7096_v27, %v7381_v41  ;;  %v3844_v20 = vand.u32 4294901760, %v7110_v34  ;;  %v2456_v40 = vadd.f32 %v2455_v4, %v2354_v5  ;;  %v3834_v19 = vand.u32 4294901760, %v3833_v53  ;;  %v2509_v5 = vpop.f32.mrf.mxu2 }
 0x224   :  { %3740 = vmatpush.msra.mxu0 %v6978_v13  ;;  %v7123_v47 = vand.u32 4294901760, %v3721_v21  ;;  %3663 = vmatpush.msrb.mxu2 %v3492_v26  ;;  %v7146_v17 = vand.u32 4294901760, %v3719_v35 }
 0x225   :  { %3817 = vmatpush.msra.mxu1 %v3816_v39  ;;  %3702 = vmatpush.msrb.mxu3 %v6874_v48  ;;  %v3720_v39 = vld [vmem:[#allocation17 + $0x8] sm:$0xff]  ;;  %v3845_v41 = vsub.f32 %v7110_v34, %v3844_v20  ;;  %v3850_v48 = vand.u32 4294901760, %v7128_v58 }
 0x226   :  { %3742 = vmatpush.msra.mxu0 %v6991_v33  ;;  %v7135_v51 = vand.u32 4294901760, %v3720_v39  ;;  %v7138_v22 = vsub.f32 %v3721_v21, %v7123_v47  ;;  %v2510_v21 = vadd.f32 %v2509_v5, %v2456_v40  ;;  %3667 = vmatpush.msrb.mxu2 %v3498_v9  ;;  %v7163_v4 = vsub.f32 %v3719_v35, %v7146_v17 }
 0x227   :  { %3823 = vmatpush.msra.mxu1 %v3822_v59  ;;  %3704 = vmatpush.msrb.mxu3 %v6890_v25  ;;  %v3840_v59 = vand.u32 4294901760, %v3839_v24  ;;  %v3851_v25 = vsub.f32 %v7128_v58, %v3850_v48  ;;  %v7469_v40 = vand.u32 4294901760, %v6934_v14  ;;  %v7470_v35 = vand.u32 4294901760, %v6951_v0 }
 0x228   :  { %3744 = vmatpush.msra.mxu0 %v7003_v42  ;;  %v3856_v53 = vand.u32 4294901760, %v7138_v22  ;;  %v7149_v10 = vsub.f32 %v3720_v39, %v7135_v51  ;;  %v3868_v24 = vand.u32 4294901760, %v7163_v4  ;;  %v2549_v39 = vadd.f32 %v2548_v63, %v2510_v21 }
 0x229   :  { %3829 = vmatpush.msra.mxu1 %v3828_v52  ;;  %3706 = vmatpush.msrb.mxu3 %v6905_v32  ;;  %v3846_v52 = vand.u32 4294901760, %v3845_v41  ;;  %v3852_v32 = vand.u32 4294901760, %v3851_v25  ;;  %v2617_v9 = vpop.f32.mrf.mxu0 }
 0x22a   :  { %3746 = vmatpush.msra.mxu0 %v7017_v31  ;;  %v3857_v30 = vsub.f32 %v7138_v22, %v3856_v53  ;;  %v3862_v26 = vand.u32 4294901760, %v7149_v10  ;;  %3671 = vmatpush.msrb.mxu2 %v7469_v40  ;;  %v2618_v14 = vadd.f32 %v2617_v9, %v2549_v39 }
 0x22b   :  { %3835 = vmatpush.msra.mxu1 %v3834_v19  ;;  %3708 = vmatpush.msrb.mxu3 %v6912_v56  ;;  %v3869_v19 = vsub.f32 %v7163_v4, %v3868_v24  ;;  %v2695_v0 = vpop.f32.mrf.mxu2 }
 0x22c   :  { %3748 = vmatpush.msra.mxu0 %v7030_v2  ;;  %v3863_v41 = vsub.f32 %v7149_v10, %v3862_v26  ;;  %v3858_v56 = vand.u32 4294901760, %v3857_v30  ;;  %3675 = vmatpush.msrb.mxu2 %v7470_v35 }
 0x22d   :  { %3841 = vmatpush.msra.mxu1 %v3840_v59  ;;  %3710 = vmatpush.msrb.mxu3 %v6926_v15  ;;  %v3870_v15 = vand.u32 4294901760, %v3869_v19  ;;  %v2654_v59 = vpop.f32.mrf.mxu1 }
 0x22e   :  { %3750 = vmatpush.msra.mxu0 %v7042_v49  ;;  %v3864_v5 = vand.u32 4294901760, %v3863_v41  ;;  %v2655_v21 = vadd.f32 %v2654_v59, %v2618_v14 }
 0x22f   :  { %3847 = vmatpush.msra.mxu1 %v3846_v52  ;;  %3712 = vmatpush.msrb.mxu3 %v6936_v8  ;;  %v2796_v8 = vpop.f32.mrf.mxu3 }
 0x230   :  { %3752 = vmatpush.msra.mxu0 %v7058_v23  ;;  %v2696_v25 = vadd.f32 %v2695_v0, %v2655_v21 }
 0x231   :  { %3853 = vmatpush.msra.mxu1 %v3852_v32 }
 0x232   :  { %3754 = vmatpush.msra.mxu0 %v7071_v46  ;;  %v2797_v52 = vadd.f32 %v2796_v8, %v2696_v25 }
 0x233   :  { %3859 = vmatpush.msra.mxu1 %v3858_v56 }
 0x234   :  { %3756 = vmatpush.msra.mxu0 %v7083_v57 }
 0x235   :  { %3865 = vmatpush.msra.mxu1 %v3864_v5  ;;  %v2889_v41 = vpop.f32.mrf.mxu1 }
 0x236   :  { %3758 = vmatpush.msra.mxu0 %v7093_v1 }
 0x237   :  { %3871 = vmatpush.msra.mxu1 %v3870_v15 }
 0x238   :  { %3760 = vmatpush.msra.mxu0 %v7107_v29 }
 0x23a   :  { %3762 = vmatpush.msra.mxu0 %v7123_v47 }
 0x23c   :  { %3764 = vmatpush.msra.mxu0 %v7135_v51  ;;  %v2850_v30 = vpop.f32.mrf.mxu0  ;;  %v2958_v63 = vpop.f32.mrf.mxu2 }
 0x23d   :  { %v2851_v32 = vadd.f32 %v2850_v30, %v2797_v52 }
 0x23e   :  { %3766 = vmatpush.msra.mxu0 %v7146_v17  ;;  %v2995_v39 = vpop.f32.mrf.mxu3 }
 0x23f   :  { %v2890_v40 = vadd.f32 %v2889_v41, %v2851_v32  ;;  %v7473_v32 = vand.u32 4294901760, %v7006_v16 }
 0x241   :  { %v2959_v9 = vadd.f32 %v2958_v63, %v2890_v40 }
 0x243   :  { %v2996_v56 = vadd.f32 %v2995_v39, %v2959_v9 }
 0x245   :  { %v3001_v19 = vsub.f32 %v2996_v56, %v6726_v50  ;;  %v7471_v50 = vand.u32 4294901760, %v6956_v28 }
 0x247   :  { %v3002_v35 = vsub.f32 %v3001_v19, %v6730_v62 }
 0x249   :  { %v3003_v14 = vmul.f32 %v3002_v35, %v6733_v6 }
 0x24b   :  { %v3718_v5 = vadd.f32 %v3003_v14, %v6757_v43  ;;  %v3409_v15 = vand.u32 4294901760, %v3003_v14  ;;  %v7472_v43 = vand.u32 4294901760, %v6981_v45 }
 0x24d   :  { %v7193_v59 = vand.u32 4294901760, %v3718_v5  ;;  %3515 = vmatmul.f32.vlgmr.msra.gmra.mxu3 %v3409_v15  ;;  %v3410_v21 = vsub.f32 %v3003_v14, %v3409_v15 }
 0x24e   :  { %3932 = vmatpush.msra.mxu3 %v6943_v60 }
 0x24f   :  { %3569 = vmatmul.f32.vlgmr.msrb.gmra.mxu0 %v3410_v21  ;;  %v3411_v0 = vand.u32 4294901760, %v3410_v21  ;;  %v7197_v25 = vsub.f32 %v3718_v5, %v7193_v59 }
 0x250   :  { %3934 = vmatpush.msra.mxu3 %v6965_v11  ;;  %3973 = vmatpush.msrb.mxu0 %v7471_v50 }
 0x251   :  { %3608 = vmatmul.f32.vlgmr.msrb.gmra.mxu1 %v3411_v0  ;;  %v3412_v62 = vsub.f32 %v3410_v21, %v3411_v0  ;;  %v3769_v6 = vand.u32 4294901760, %v7197_v25 }
 0x252   :  { %3936 = vmatpush.msra.mxu3 %v6978_v13  ;;  %3977 = vmatpush.msrb.mxu0 %v7472_v43 }
 0x253   :  { %4040 = vmatpush.msrb.mxu1 %v6943_v60  ;;  %v3413_v8 = vand.u32 4294901760, %v3412_v62  ;;  %v3770_v52 = vsub.f32 %v7197_v25, %v3769_v6  ;;  %v7474_v60 = vand.u32 4294901760, %v7033_v12 }
 0x254   :  { %3938 = vmatpush.msra.mxu3 %v6991_v33  ;;  %3981 = vmatpush.msrb.mxu0 %v3790_v54 }
 0x255   :  { %4042 = vmatpush.msrb.mxu1 %v6965_v11  ;;  %3414 = vmatmul.f32.vlgmr.msra.gmra.mxu2 %v3413_v8  ;;  %v3771_v30 = vand.u32 4294901760, %v3770_v52  ;;  %v7477_v11 = vand.u32 4294901760, %v7096_v27 }
 0x256   :  { %3714 = vmatmul.f32.vlgmr.msrb.gmra.mxu3 %v3409_v15  ;;  %3879 = vmatpush.msra.mxu2 %v6956_v28  ;;  %v7475_v28 = vand.u32 4294901760, %v7075_v7 }
 0x257   :  { %3940 = vmatpush.msra.mxu3 %v7003_v42  ;;  %3985 = vmatpush.msrb.mxu0 %v7473_v32 }
 0x258   :  { %4044 = vmatpush.msrb.mxu1 %v6978_v13  ;;  %3772 = vmatmul.f32.vlgmr.msra.gmra.mxu0 %v3771_v30 }
 0x259   :  { %3882 = vmatpush.msra.mxu2 %v6981_v45  ;;  %3942 = vmatpush.msra.mxu3 %v7017_v31 }
 0x25a   :  { %3989 = vmatpush.msrb.mxu0 %v3802_v36  ;;  %4046 = vmatpush.msrb.mxu1 %v6991_v33  ;;  %v4079_v33 = vld [vmem:[%s7302_s10] sm:$0xff]  ;;  %s4737_s10 = smov [#allocation20]  }
 0x25b   :  { %3873 = vmatmul.f32.vlgmr.msra.gmra.mxu1 %v7193_v59  ;;  %3885 = vmatpush.msra.mxu2 %v6994_v3  ;;  %v4082_v54 = vsel %vm4080_vm1, %v4079_v33, 0  ;;  %s4387_s13 = sshll.u32 %s4737_s10, 4  ;;  %s4388_s13 = int_to_ptr.vmem [resolvable:$true] %s4387_s13 }
 0x25c   :  { %3944 = vmatpush.msra.mxu3 %v7030_v2  ;;  %3993 = vmatpush.msrb.mxu0 %v7474_v60  ;;  %v4101_v36 = vand.u32 4294901760, %v4082_v54 }
 0x25d   :  { %4048 = vmatpush.msrb.mxu1 %v7003_v42  ;;  %3888 = vmatpush.msra.mxu2 %v7006_v16 }
 0x25e   :  { %3946 = vmatpush.msra.mxu3 %v7042_v49  ;;  %3997 = vmatpush.msrb.mxu0 %v3814_v44 }
 0x25f   :  { %4050 = vmatpush.msrb.mxu1 %v7017_v31  ;;  %3677 = vmatmul.f32.vlgmr.msrb.gmra.mxu2 %v3409_v15  ;;  %v7476_v31 = vand.u32 4294901760, %v7089_v55 }
 0x260   :  { %3891 = vmatpush.msra.mxu2 %v7024_v61  ;;  %3948 = vmatpush.msra.mxu3 %v7058_v23 }
 0x261   :  { %4001 = vmatpush.msrb.mxu0 %v3820_v38  ;;  %4052 = vmatpush.msrb.mxu1 %v7030_v2 }
 0x262   :  { %3894 = vmatpush.msra.mxu2 %v7033_v12  ;;  %3950 = vmatpush.msra.mxu3 %v7071_v46 }
 0x263   :  { %4005 = vmatpush.msrb.mxu0 %v7475_v28  ;;  %4054 = vmatpush.msrb.mxu1 %v7042_v49 }
 0x264   :  { %3897 = vmatpush.msra.mxu2 %v7045_v37  ;;  %3952 = vmatpush.msra.mxu3 %v7083_v57 }
 0x265   :  { %4009 = vmatpush.msrb.mxu0 %v7476_v31  ;;  %4056 = vmatpush.msrb.mxu1 %v7058_v23  ;;  %v3159_v16 = vpop.f32.mrf.mxu1  ;;  %v4102_v23 = vsub.f32 %v4082_v54, %v4101_v36 }
 0x266   :  { %3900 = vmatpush.msra.mxu2 %v7061_v18  ;;  %3954 = vmatpush.msra.mxu3 %v7093_v1 }
 0x267   :  { %4013 = vmatpush.msrb.mxu0 %v7477_v11  ;;  %4058 = vmatpush.msrb.mxu1 %v7071_v46 }
 0x268   :  { %3903 = vmatpush.msra.mxu2 %v7075_v7  ;;  %3956 = vmatpush.msra.mxu3 %v7107_v29 }
 0x269   :  { %4017 = vmatpush.msrb.mxu0 %v3844_v20  ;;  %4060 = vmatpush.msrb.mxu1 %v7083_v57  ;;  %v4103_v57 = vand.u32 4294901760, %v4102_v23 }
 0x26a   :  { %3906 = vmatpush.msra.mxu2 %v7089_v55  ;;  %3958 = vmatpush.msra.mxu3 %v7123_v47 }
 0x26b   :  { %4021 = vmatpush.msrb.mxu0 %v3850_v48  ;;  %4062 = vmatpush.msrb.mxu1 %v7093_v1 }
 0x26c   :  { %3909 = vmatpush.msra.mxu2 %v7096_v27  ;;  %3960 = vmatpush.msra.mxu3 %v7135_v51  ;;  %v3058_v49 = vpop.f32.mrf.mxu0  ;;  %v3213_v13 = vpop.f32.mrf.mxu2 }
 0x26d   :  { %4025 = vmatpush.msrb.mxu0 %v3856_v53  ;;  %4064 = vmatpush.msrb.mxu1 %v7107_v29  ;;  %v3160_v42 = vadd.f32 %v3159_v16, %v3058_v49 }
 0x26e   :  { %3912 = vmatpush.msra.mxu2 %v7110_v34  ;;  %3962 = vmatpush.msra.mxu3 %v7146_v17  ;;  %v3252_v45 = vpop.f32.mrf.mxu3  ;;  %v4104_v34 = vsub.f32 %v4102_v23, %v4103_v57 }
 0x26f   :  { %4029 = vmatpush.msrb.mxu0 %v3862_v26  ;;  %4066 = vmatpush.msrb.mxu1 %v7123_v47  ;;  %v3214_v37 = vadd.f32 %v3213_v13, %v3160_v42  ;;  %v4230_v26 = vld [vmem:[#allocation19] sm:$0xff] }
 0x270   :  { %3966 = vmatmul.f32.vlgmr.msra.gmra.mxu3 %v3769_v6  ;;  %3915 = vmatpush.msra.mxu2 %v7128_v58 }
 0x271   :  { %4033 = vmatpush.msrb.mxu0 %v3868_v24  ;;  %4068 = vmatpush.msrb.mxu1 %v7135_v51  ;;  %v3253_v38 = vadd.f32 %v3252_v45, %v3214_v37  ;;  %v4232_v24 = vsel %vm4080_vm1, %v4230_v26, 0 }
 0x272   :  { %4035 = vmatmul.f32.vlgmr.msrb.gmra.mxu0 %v7193_v59  ;;  %3918 = vmatpush.msra.mxu2 %v7138_v22  ;;  %v4105_v22 = vand.u32 4294901760, %v4104_v34  ;;  %v4251_v63 = vand.u32 4294901760, %v4232_v24 }
 0x273   :  { %4070 = vmatpush.msrb.mxu1 %v7146_v17 }
 0x274   :  { %4072 = vmatmul.f32.vlgmr.msrb.gmra.mxu1 %v7193_v59  ;;  %3921 = vmatpush.msra.mxu2 %v7149_v10  ;;  %v4252_v56 = vsub.f32 %v4232_v24, %v4251_v63 }
 0x275   :  { %v3358_v61 = vpop.f32.mrf.mxu1 }
 0x276   :  { %3924 = vmatpush.msra.mxu2 %v7163_v4  ;;  %v4253_v15 = vand.u32 4294901760, %v4252_v56 }
 0x277   :  { %3927 = vmatmul.f32.vlgmr.msra.gmra.mxu2 %v7197_v25 }
 0x278   :  { %v4254_v25 = vsub.f32 %v4252_v56, %v4253_v15 }
 0x27a   :  { %v4255_v6 = vand.u32 4294901760, %v4254_v25 }
 0x27c   :  { %v3321_v3 = vpop.f32.mrf.mxu0 }
 0x27d   :  { %v3322_v55 = vadd.f32 %v3321_v3, %v3253_v38 }
 0x27f   :  { %v3359_v20 = vadd.f32 %v3358_v61, %v3322_v55 }
 0x2cc   :  { %v3570_v44 = vpop.f32.mrf.mxu0 }
 0x2ce   :  { %v3609_v7 = vpop.f32.mrf.mxu1 }
 0x2d0   :  { %v3516_v2 = vpop.f32.mrf.mxu3 }
 0x2d5   :  { %v3773_v41 = vpop.f32.mrf.mxu0 }
 0x2d8   :  { %v3415_v12 = vpop.f32.mrf.mxu2  ;;  %v3874_v40 = vpop.f32.mrf.mxu1 }
 0x2d9   :  { %v3517_v46 = vadd.f32 %v3516_v2, %v3415_v12  ;;  %v3715_v29 = vpop.f32.mrf.mxu3  ;;  %v3875_v9 = vadd.f32 %v3874_v40, %v3773_v41 }
 0x2db   :  { %v3571_v18 = vadd.f32 %v3570_v44, %v3517_v46 }
 0x2dd   :  { %v3610_v1 = vadd.f32 %v3609_v7, %v3571_v18 }
 0x2e2   :  { %v3678_v27 = vpop.f32.mrf.mxu2 }
 0x2e3   :  { %v3679_v58 = vadd.f32 %v3678_v27, %v3610_v1 }
 0x2e5   :  { %v3716_v47 = vadd.f32 %v3715_v29, %v3679_v58 }
 0x2e7   :  { %v4076_v51 = vsub.f32 %v3359_v20, %v3716_v47 }
 0x2e9   :  { %v4099_v48 = vand.u32 4294901760, %v4076_v51 }
 0x2eb   :  { %v4126_v53 = vsub.f32 %v4076_v51, %v4099_v48  ;;  %4100 = vmatpush.msrb.mxu2 %v4099_v48 }
 0x2ec   :  { %4106 = vmatmul.f32.vlgmr.msrb.gmra.mxu2 %v4105_v22 }
 0x2ed   :  { %4153 = vmatpush.msra.mxu2 %v4126_v53  ;;  %v4127_v17 = vand.u32 4294901760, %v4126_v53 }
 0x2ef   :  { %4202 = vmatpush.msrb.mxu2 %v4127_v17  ;;  %v4128_v10 = vsub.f32 %v4126_v53, %v4127_v17  ;;  %v4036_v5 = vpop.f32.mrf.mxu0 }
 0x2f1   :  { %v4129_v4 = vand.u32 4294901760, %v4128_v10  ;;  %v4073_v21 = vpop.f32.mrf.mxu1 }
 0x2f3   :  { %4130 = vmatpush.msrb.mxu3 %v4129_v4  ;;  %v3967_v35 = vpop.f32.mrf.mxu3 }
 0x2f4   :  { %4156 = vmatmul.f32.vlgmr.msra.gmra.mxu2 %v4102_v23  ;;  %4132 = vmatmul.f32.vlgmr.msrb.gmra.mxu3 %v4101_v36 }
 0x2f5   :  { %4176 = vmatpush.msra.mxu3 %v4099_v48 }
 0x2f7   :  { %4224 = vmatpush.msrb.mxu3 %v4099_v48 }
 0x2fa   :  { %v3928_v39 = vpop.f32.mrf.mxu2 }
 0x2fb   :  { %v3929_v19 = vadd.f32 %v3928_v39, %v3875_v9 }
 0x2fc   :  { %4204 = vmatmul.f32.vlgmr.msrb.gmra.mxu2 %v4101_v36  ;;  %4180 = vmatmul.f32.vlgmr.msra.gmra.mxu3 %v4103_v57 }
 0x2fd   :  { %v3968_v14 = vadd.f32 %v3967_v35, %v3929_v19 }
 0x2ff   :  { %v4037_v59 = vadd.f32 %v4036_v5, %v3968_v14 }
 0x301   :  { %v4074_v0 = vadd.f32 %v4073_v21, %v4037_v59 }
 0x303   :  { %v4077_v50 = vsub.f32 %v4074_v0, %v3359_v20 }
 0x304   :  { %4226 = vmatmul.f32.vlgmr.msrb.gmra.mxu3 %v4101_v36 }
 0x305   :  { %v4078_v62 = vsub.f32 %v4077_v50, %v3716_v47 }
 0x307   :  { %v4249_v43 = vand.u32 4294901760, %v4078_v62 }
 0x309   :  { %4250 = vmatpush.msra.mxu2 %v4249_v43  ;;  %4326 = vmatpush.msra.mxu1 %v4249_v43  ;;  %v4276_v8 = vsub.f32 %v4078_v62, %v4249_v43 }
 0x30a   :  { %4256 = vmatmul.f32.vlgmr.msra.gmra.mxu2 %v4255_v6  ;;  %4330 = vmatmul.f32.vlgmr.msra.gmra.mxu1 %v4253_v15 }
 0x30b   :  { %4303 = vmatpush.msra.mxu0 %v4276_v8  ;;  %v4277_v52 = vand.u32 4294901760, %v4276_v8 }
 0x30c   :  { %4306 = vmatmul.f32.vlgmr.msra.gmra.mxu0 %v4252_v56 }
 0x30d   :  { %4352 = vmatpush.msrb.mxu2 %v4277_v52  ;;  %v4278_v30 = vsub.f32 %v4276_v8, %v4277_v52 }
 0x30f   :  { %v4279_v32 = vand.u32 4294901760, %v4278_v30 }
 0x311   :  { %4280 = vmatpush.msra.mxu3 %v4279_v32 }
 0x312   :  { %4282 = vmatmul.f32.vlgmr.msra.gmra.mxu3 %v4251_v63  ;;  %4354 = vmatmul.f32.vlgmr.msrb.gmra.mxu2 %v4251_v63 }
 0x313   :  { %4374 = vmatpush.msrb.mxu3 %v4249_v43 }
 0x31a   :  { %4376 = vmatmul.f32.vlgmr.msrb.gmra.mxu3 %v4251_v63 }
 0x36f   :  { %v4107_v60 = vpop.f32.mrf.mxu2 }
 0x377   :  { %v4133_v28 = vpop.f32.mrf.mxu3  ;;  %v4157_v31 = vpop.f32.mrf.mxu2 }
 0x378   :  { %v4134_v45 = vadd.f32 %v4133_v28, %v4107_v60 }
 0x37a   :  { %v4158_v33 = vadd.f32 %v4157_v31, %v4134_v45 }
 0x37f   :  { %v4181_v11 = vpop.f32.mrf.mxu3  ;;  %v4205_v49 = vpop.f32.mrf.mxu2 }
 0x380   :  { %v4182_v2 = vadd.f32 %v4181_v11, %v4158_v33 }
 0x382   :  { %v4206_v37 = vadd.f32 %v4205_v49, %v4182_v2 }
 0x387   :  { %v4227_v16 = vpop.f32.mrf.mxu3  ;;  %v4331_v61 = vpop.f32.mrf.mxu1 }
 0x388   :  { %v4228_v18 = vadd.f32 %v4227_v16, %v4206_v37 }
 0x389   :  { %v4307_v54 = vpop.f32.mrf.mxu0 }
 0x38d   :  { %v4257_v13 = vpop.f32.mrf.mxu2 }
 0x395   :  { %v4283_v3 = vpop.f32.mrf.mxu3  ;;  %v4355_v36 = vpop.f32.mrf.mxu2 }
 0x396   :  { %v4284_v42 = vadd.f32 %v4283_v3, %v4257_v13 }
 0x398   :  { %v4308_v12 = vadd.f32 %v4307_v54, %v4284_v42 }
 0x39a   :  { %v4332_v46 = vadd.f32 %v4331_v61, %v4308_v12 }
 0x39c   :  { %v4356_v44 = vadd.f32 %v4355_v36, %v4332_v46 }
 0x39d   :  { %v4377_v23 = vpop.f32.mrf.mxu3 }
 0x39e   :  { %v4378_v38 = vadd.f32 %v4377_v23, %v4356_v44 }
 0x3a0   :  { %v4380_v7 = vsub.f32 %v4228_v18, %v4378_v38 }
 0x3a2   :  { %4381 = vst [vmem:[#allocation20] sm:$0xff] %v4380_v7 }
 0x3a3   :  { %4392 = dma.vmem_to_hbm [thread:$0]  %s4388_s13, 128, %s4390_s16, [#allocation4]  }
 0x3a4   :  { %4720 = dma.done.wait [#allocation4], 128  }
 0x3a5   :  { %4721 = vsyncadd [#allocation4], 4294967168 }
 0x3a6   :  { %4397 = vsyncpa [#allocation3], 1 }
 0x3a7   :  { %4398 = vsyncpa [#allocation6], 1 }
 0x3a8   :  { %4399 = vsyncpa [#allocation9], 1 }
 0x3a9   :  { %4400 = vsyncpa [#allocation12], 1 }
 0x3aa   :  { %4401 = vsyncpa [#allocation15], 1 }
 0x3ab   :  { %4402 = vsyncpa [#allocation18], 1 }
 0x3ac   :  { %4403 = vsyncpa [#allocation4], 1 }

</bundles_post_ra>
